<compile_context>
chip_gen: v7x
topology: tpu7x:2x2x1
jax: 0.10.0
libtpu: 0.0.40
codegen_flags: <defaults>
</compile_context>

<pallas_src>
import numpy as np
import jax
import jax.numpy as jnp
from jax.experimental import pallas as pl
from jax.experimental.pallas import tpu as pltpu

KSIZE = 7
PAD = KSIZE // 2  # 3
SUB = 8           # images per finalize sub-chunk (bounds vreg pressure)


def _round_up(v, m):
    return ((v + m - 1) // m) * m


def _vmem_limit_bytes():
    """Per-generation scoped VMEM limit (v7x: 64 MiB/TC, v5e/v6e: 128 MiB)."""
    try:
        kind = jax.devices()[0].device_kind.lower()
    except Exception:
        kind = ""
    phys = (64 << 20) if "v7" in kind else (128 << 20)
    try:
        phys = min(phys, int(pltpu.get_tpu_info().vmem_capacity_bytes))
    except Exception:
        pass
    return int(min(max(phys - (16 << 20), 24 << 20), 96 << 20))


def _make_kernel(W, HW, B_BLK, F, L2):
    n_sub = B_BLK // SUB
    base = F - PAD * W - PAD       # lane offset of the (dh=0, dw=0) window

    def kernel(w_ref, mask_ref, x_ref, o_ref, sum_ref, max_ref, ga_ref, gm_ref):
        # w_ref    : SMEM (98,)  f32   [avg weights * (1/C), max weights]
        # mask_ref : VMEM (7, L2) f32  per-dw column-validity masks (constants)
        # x_ref    : VMEM (B_BLK, C_BLK, HW)  channel chunk of B_BLK images
        # o_ref    : VMEM (B_BLK, HW)         lane-dense attention maps
        # sum_ref  : VMEM (B_BLK, HW) f32     running channel sum
        # max_ref  : VMEM (B_BLK, HW) f32     running channel max
        # ga_ref   : VMEM (SUB, L2) f32       zero-padded avg(sum) conv slab
        # gm_ref   : VMEM (SUB, L2) f32       zero-padded max conv slab
        ci = pl.program_id(1)
        nc = pl.num_programs(1)

        # ---- init accumulators on the first channel chunk ----
        @pl.when(ci == 0)
        def _init():
            sum_ref[...] = jnp.zeros_like(sum_ref)
            max_ref[...] = jnp.full(max_ref.shape, -jnp.inf, max_ref.dtype)

        # ---- fused single-pass sum & max: one contiguous block read,
        # native sublane (axis=1) reductions ----
        xb = x_ref[...].astype(jnp.float32)               # (B_BLK, C_BLK, HW)
        sum_ref[...] = sum_ref[...] + jnp.sum(xb, axis=1)
        max_ref[...] = jnp.maximum(max_ref[...], jnp.max(xb, axis=1))

        # ---- last channel chunk: 7x7 same-conv (2 -> 1 ch) + sigmoid ----
        @pl.when(ci == nc - 1)
        def _finalize():
            # Zero the padded slabs once per batch block; only the
            # lane-aligned interior [F : F+HW) is rewritten per sub-chunk,
            # so the borders stay zero.
            ga_ref[...] = jnp.zeros_like(ga_ref)
            gm_ref[...] = jnp.zeros_like(gm_ref)
            masks = [mask_ref[dw:dw + 1, :] for dw in range(KSIZE)]  # (1, L2)

            for s in range(n_sub):                       # static unroll
                b0 = s * SUB
                # 1/C is folded into the avg weights -> use raw sums.
                ga_ref[:, F:F + HW] = sum_ref[b0:b0 + SUB, :]
                gm_ref[:, F:F + HW] = max_ref[b0:b0 + SUB, :]
                g_avg = ga_ref[...]                      # (SUB, L2)
                g_max = gm_ref[...]

                acc = jnp.zeros((SUB, HW), jnp.float32)
                for dw in range(KSIZE):
                    ma = g_avg * masks[dw]               # masked once per dw
                    mm = g_max * masks[dw]
                    for dh in range(KSIZE):
                        off = base + dh * W + dw         # static lane offset
                        wa = w_ref[dh * KSIZE + dw]                  # avg tap
                        wm = w_ref[KSIZE * KSIZE + dh * KSIZE + dw]  # max tap
                        acc = acc + wa * ma[:, off:off + HW] \
                                  + wm * mm[:, off:off + HW]
                o_ref[b0:b0 + SUB, :] = jax.nn.sigmoid(acc).astype(o_ref.dtype)

    return kernel


def spatial_attention(x, weight):
    """x: (N, C, H, W), weight: (1, 2, 7, 7), no bias -> (N, 1, H, W)."""
    N, C, H, W = x.shape
    HW = H * W
    itemsize = x.dtype.itemsize

    # Lane-dense view (metadata-only reshape).
    x2 = x.reshape(N, C, HW)

    # Pad batch to a multiple of 8 so every sublane block / slice is aligned.
    n_pad = _round_up(N, 8)
    if n_pad != N:
        x2 = jnp.pad(x2, ((0, n_pad - N), (0, 0), (0, 0)))

    # ---- VMEM-budget based tiling --------------------------------------
    vmem_limit = _vmem_limit_bytes()
    target = min(2 << 20, vmem_limit // 8)   # bytes per (double-buffered) x block

    # Grow the channel chunk first (keeps the finalize working set small).
    if C % 8 == 0:
        c_blk = 8
        for c in range(8, C + 1, 8):
            if C % c == 0 and 8 * c * HW * itemsize <= target:
                c_blk = c
    else:
        c_blk = C                            # full-extent block (always legal)

    # Then grow the batch block (multiples of 8, divides padded N, capped).
    b_blk = 8
    if c_blk == C:
        for b in range(8, min(n_pad, 32) + 1, 8):
            if n_pad % b == 0 and b * c_blk * HW * itemsize <= target:
                b_blk = b

    # v7x megacore: keep >=2 steps on the parallel (batch) axis when possible.
    if n_pad // b_blk < 2 and b_blk % 16 == 0:
        b_blk //= 2

    grid = (n_pad // b_blk, C // c_blk)

    # ---- host-side constants --------------------------------------------
    # Conv weight OIHW (1,2,7,7): in-channel 0 = avg, 1 = max.  Fold 1/C of
    # the channel mean into the avg-channel weights.
    w2 = weight.astype(jnp.float32).reshape(2, KSIZE * KSIZE)
    w_flat = jnp.concatenate([w2[0] / float(C), w2[1]])         # (98,)

    # Zero-padded flat-feature geometry: interior starts at lane-aligned F.
    F = _round_up(PAD * W + PAD, 128)
    L2 = _round_up(F + HW + PAD * W + PAD, 128)
    base = F - PAD * W - PAD

    lanes = np.arange(L2)
    masks_np = np.zeros((KSIZE, L2), np.float32)
    for dw in range(KSIZE):
        w_out = (lanes - (base + dw)) % W        # output column at this lane
        col = w_out + dw - PAD                   # tap column
        masks_np[dw] = ((col >= 0) & (col < W)).astype(np.float32)
    masks = jnp.asarray(masks_np)

    kernel = _make_kernel(W, HW, b_blk, F, L2)

    out = pl.pallas_call(
        kernel,
        out_shape=jax.ShapeDtypeStruct((n_pad, HW), x.dtype),
        grid=grid,
        in_specs=[
            pl.BlockSpec(memory_space=pltpu.MemorySpace.SMEM),          # weights
            pl.BlockSpec((KSIZE, L2), lambda b, c: (0, 0)),             # dw masks
            pl.BlockSpec((b_blk, c_blk, HW), lambda b, c: (b, c, 0)),   # x chunk
        ],
        out_specs=pl.BlockSpec((b_blk, HW), lambda b, c: (b, 0)),
        scratch_shapes=[
            pltpu.VMEM((b_blk, HW), jnp.float32),    # running channel sum
            pltpu.VMEM((b_blk, HW), jnp.float32),    # running channel max
            pltpu.VMEM((SUB, L2), jnp.float32),      # padded avg(sum) conv slab
            pltpu.VMEM((SUB, L2), jnp.float32),      # padded max conv slab
        ],
        compiler_params=pltpu.CompilerParams(
            dimension_semantics=("parallel", "arbitrary"),
            vmem_limit_bytes=vmem_limit,
        ),
    )(w_flat, masks, x2)

    return out[:N].reshape(N, 1, H, W)


def _reference(x, weight):
    """Pure-JAX reference matching the PyTorch forward."""
    avg = jnp.mean(x, axis=1, keepdims=True)
    mx = jnp.max(x, axis=1, keepdims=True)
    feat = jnp.concatenate([avg, mx], axis=1)
    out = jax.lax.conv_general_dilated(
        feat, weight, window_strides=(1, 1),
        padding=((PAD, PAD), (PAD, PAD)),
        dimension_numbers=("NCHW", "OIHW", "NCHW"),
        precision=jax.lax.Precision.HIGHEST)
    return jax.nn.sigmoid(out)


if __name__ == "__main__":
    key = jax.random.PRNGKey(0)
    kx, kw = jax.random.split(key)

    N, C, H, W = 2, 4, 16, 16
    x = jax.random.normal(kx, (N, C, H, W), dtype=jnp.float32)

    # Deterministic conv weight init matching nn.Conv2d(2, 1, 7, bias=False).
    fan_in = 2 * KSIZE * KSIZE
    bound = 1.0 / float(fan_in) ** 0.5
    weight = jax.random.uniform(
        kw, (1, 2, KSIZE, KSIZE), minval=-bound, maxval=bound, dtype=jnp.float32)

    out = jax.block_until_ready(spatial_attention(x, weight))
    ref = jax.block_until_ready(_reference(x, weight))

    assert out.shape == (N, 1, H, W)
    err = float(jnp.max(jnp.abs(out - ref)))
    assert err < 1e-5, f"max abs err {err}"
    print("KERNEL_OK")
</pallas_src>

<mosaic_0001>
module attributes {stable_mosaic.version = 11 : i64} {
  func.func @kernel(%arg0: i32, %arg1: i32, %arg2: memref<98xf32, #tpu.memory_space<smem>>, %arg3: memref<7x512xf32, #tpu.memory_space<vmem>>, %arg4: memref<8x4x256xf32, #tpu.memory_space<vmem>>, %arg5: memref<8x256xf32, #tpu.memory_space<vmem>>, %arg6: memref<8x256xf32, #tpu.memory_space<vmem>>, %arg7: memref<8x256xf32, #tpu.memory_space<vmem>>, %arg8: memref<8x512xf32, #tpu.memory_space<vmem>>, %arg9: memref<8x512xf32, #tpu.memory_space<vmem>>) attributes {dimension_semantics = [#tpu.dimension_semantics<parallel>, #tpu.dimension_semantics<arbitrary>], iteration_bounds = array<i64: 1, 1>, scalar_prefetch = 0 : i64, scratch_operands = 4 : i64, tpu.core_type = #tpu.core_type<tc>, window_params = [{transform_indices = @transform_0, window_bounds = array<i64: 98>}, {pipeline_mode = #tpu.pipeline_mode<synchronous>, transform_indices = @transform_1, window_bounds = array<i64: 7, 512>}, {transform_indices = @transform_2, window_bounds = array<i64: 8, 4, 256>}, {transform_indices = @transform_3, window_bounds = array<i64: 8, 256>}]} {
    %c0_i32 = arith.constant 0 : i32
    %0 = arith.cmpi eq, %arg1, %c0_i32 : i32
    %1 = arith.extui %0 : i1 to i32
    %c0_i32_0 = arith.constant 0 : i32
    %2 = arith.cmpi ne, %1, %c0_i32_0 : i32
    scf.if %2 {
      %cst_14 = arith.constant 0.000000e+00 : f32
      %15 = vector.broadcast %cst_14 : f32 to vector<8x256xf32>
      %c0_15 = arith.constant 0 : index
      %c0_16 = arith.constant 0 : index
      %16 = vector.load %arg6[%c0_15, %c0_16] : memref<8x256xf32, #tpu.memory_space<vmem>>, vector<8x256xf32>
      tpu.vector_store %arg6[%c0_15, %c0_16], %15 {strides = array<i32>} : memref<8x256xf32, #tpu.memory_space<vmem>>, vector<8x256xf32>,
      %cst_17 = arith.constant 0xFF800000 : f32
      %17 = vector.broadcast %cst_17 : f32 to vector<8x256xf32>
      %c0_18 = arith.constant 0 : index
      %c0_19 = arith.constant 0 : index
      %18 = vector.load %arg7[%c0_18, %c0_19] : memref<8x256xf32, #tpu.memory_space<vmem>>, vector<8x256xf32>
      tpu.vector_store %arg7[%c0_18, %c0_19], %17 {strides = array<i32>} : memref<8x256xf32, #tpu.memory_space<vmem>>, vector<8x256xf32>,
    } else {
    }
    %c0 = arith.constant 0 : index
    %c0_1 = arith.constant 0 : index
    %c0_2 = arith.constant 0 : index
    %3 = vector.load %arg4[%c0, %c0_1, %c0_2] : memref<8x4x256xf32, #tpu.memory_space<vmem>>, vector<8x4x256xf32>
    %c0_3 = arith.constant 0 : index
    %c0_4 = arith.constant 0 : index
    %4 = vector.load %arg6[%c0_3, %c0_4] : memref<8x256xf32, #tpu.memory_space<vmem>>, vector<8x256xf32>
    %cst = arith.constant dense<0.000000e+00> : vector<8x256xf32>
    %5 = vector.multi_reduction <add>, %3, %cst [1] : vector<8x4x256xf32> to vector<8x256xf32>
    %6 = arith.addf %4, %5 : vector<8x256xf32>
    %c0_5 = arith.constant 0 : index
    %c0_6 = arith.constant 0 : index
    %7 = vector.load %arg6[%c0_5, %c0_6] : memref<8x256xf32, #tpu.memory_space<vmem>>, vector<8x256xf32>
    tpu.vector_store %arg6[%c0_5, %c0_6], %6 {strides = array<i32>} : memref<8x256xf32, #tpu.memory_space<vmem>>, vector<8x256xf32>,
    %c0_7 = arith.constant 0 : index
    %c0_8 = arith.constant 0 : index
    %8 = vector.load %arg7[%c0_7, %c0_8] : memref<8x256xf32, #tpu.memory_space<vmem>>, vector<8x256xf32>
    %cst_9 = arith.constant dense<0xFF800000> : vector<8x256xf32>
    %9 = vector.multi_reduction <maximumf>, %3, %cst_9 [1] : vector<8x4x256xf32> to vector<8x256xf32>
    %10 = arith.maximumf %8, %9 : vector<8x256xf32>
    %c0_10 = arith.constant 0 : index
    %c0_11 = arith.constant 0 : index
    %11 = vector.load %arg7[%c0_10, %c0_11] : memref<8x256xf32, #tpu.memory_space<vmem>>, vector<8x256xf32>
    tpu.vector_store %arg7[%c0_10, %c0_11], %10 {strides = array<i32>} : memref<8x256xf32, #tpu.memory_space<vmem>>, vector<8x256xf32>,
    %c0_i32_12 = arith.constant 0 : i32
    %12 = arith.cmpi eq, %arg1, %c0_i32_12 : i32
    %13 = arith.extui %12 : i1 to i32
    %c0_i32_13 = arith.constant 0 : i32
    %14 = arith.cmpi ne, %13, %c0_i32_13 : i32
    scf.if %14 {
      %cst_14 = arith.constant 0.000000e+00 : f32
      %15 = vector.broadcast %cst_14 : f32 to vector<8x512xf32>
      %c0_15 = arith.constant 0 : index
      %c0_16 = arith.constant 0 : index
      %16 = vector.load %arg8[%c0_15, %c0_16] : memref<8x512xf32, #tpu.memory_space<vmem>>, vector<8x512xf32>
      tpu.vector_store %arg8[%c0_15, %c0_16], %15 {strides = array<i32>} : memref<8x512xf32, #tpu.memory_space<vmem>>, vector<8x512xf32>,
      %cst_17 = arith.constant 0.000000e+00 : f32
      %17 = vector.broadcast %cst_17 : f32 to vector<8x512xf32>
      %c0_18 = arith.constant 0 : index
      %c0_19 = arith.constant 0 : index
      %18 = vector.load %arg9[%c0_18, %c0_19] : memref<8x512xf32, #tpu.memory_space<vmem>>, vector<8x512xf32>
      tpu.vector_store %arg9[%c0_18, %c0_19], %17 {strides = array<i32>} : memref<8x512xf32, #tpu.memory_space<vmem>>, vector<8x512xf32>,
      %c0_20 = arith.constant 0 : index
      %c0_21 = arith.constant 0 : index
      %19 = vector.load %arg3[%c0_20, %c0_21] : memref<7x512xf32, #tpu.memory_space<vmem>>, vector<1x512xf32>
      %c1 = arith.constant 1 : index
      %c0_22 = arith.constant 0 : index
      %20 = vector.load %arg3[%c1, %c0_22] : memref<7x512xf32, #tpu.memory_space<vmem>>, vector<1x512xf32>
      %c2 = arith.constant 2 : index
      %c0_23 = arith.constant 0 : index
      %21 = vector.load %arg3[%c2, %c0_23] : memref<7x512xf32, #tpu.memory_space<vmem>>, vector<1x512xf32>
      %c3 = arith.constant 3 : index
      %c0_24 = arith.constant 0 : index
      %22 = vector.load %arg3[%c3, %c0_24] : memref<7x512xf32, #tpu.memory_space<vmem>>, vector<1x512xf32>
      %c4 = arith.constant 4 : index
      %c0_25 = arith.constant 0 : index
      %23 = vector.load %arg3[%c4, %c0_25] : memref<7x512xf32, #tpu.memory_space<vmem>>, vector<1x512xf32>
      %c5 = arith.constant 5 : index
      %c0_26 = arith.constant 0 : index
      %24 = vector.load %arg3[%c5, %c0_26] : memref<7x512xf32, #tpu.memory_space<vmem>>, vector<1x512xf32>
      %c6 = arith.constant 6 : index
      %c0_27 = arith.constant 0 : index
      %25 = vector.load %arg3[%c6, %c0_27] : memref<7x512xf32, #tpu.memory_space<vmem>>, vector<1x512xf32>
      %c0_28 = arith.constant 0 : index
      %c0_29 = arith.constant 0 : index
      %26 = vector.load %arg6[%c0_28, %c0_29] : memref<8x256xf32, #tpu.memory_space<vmem>>, vector<8x256xf32>
      %c0_30 = arith.constant 0 : index
      %c128 = arith.constant 128 : index
      %27 = vector.load %arg8[%c0_30, %c128] : memref<8x512xf32, #tpu.memory_space<vmem>>, vector<8x256xf32>
      tpu.vector_store %arg8[%c0_30, %c128], %26 {strides = array<i32>} : memref<8x512xf32, #tpu.memory_space<vmem>>, vector<8x256xf32>,
      %c0_31 = arith.constant 0 : index
      %c0_32 = arith.constant 0 : index
      %28 = vector.load %arg7[%c0_31, %c0_32] : memref<8x256xf32, #tpu.memory_space<vmem>>, vector<8x256xf32>
      %c0_33 = arith.constant 0 : index
      %c128_34 = arith.constant 128 : index
      %29 = vector.load %arg9[%c0_33, %c128_34] : memref<8x512xf32, #tpu.memory_space<vmem>>, vector<8x256xf32>
      tpu.vector_store %arg9[%c0_33, %c128_34], %28 {strides = array<i32>} : memref<8x512xf32, #tpu.memory_space<vmem>>, vector<8x256xf32>,
      %c0_35 = arith.constant 0 : index
      %c0_36 = arith.constant 0 : index
      %30 = vector.load %arg8[%c0_35, %c0_36] : memref<8x512xf32, #tpu.memory_space<vmem>>, vector<8x512xf32>
      %c0_37 = arith.constant 0 : index
      %c0_38 = arith.constant 0 : index
      %31 = vector.load %arg9[%c0_37, %c0_38] : memref<8x512xf32, #tpu.memory_space<vmem>>, vector<8x512xf32>
      %cst_39 = arith.constant 0.000000e+00 : f32
      %32 = vector.broadcast %cst_39 : f32 to vector<8x256xf32>
      %33 = vector.broadcast %19 : vector<1x512xf32> to vector<8x512xf32>
      %34 = arith.mulf %30, %33 : vector<8x512xf32>
      %35 = vector.broadcast %19 : vector<1x512xf32> to vector<8x512xf32>
      %36 = arith.mulf %31, %35 : vector<8x512xf32>
      %c0_40 = arith.constant 0 : index
      %37 = memref.load %arg2[%c0_40] : memref<98xf32, #tpu.memory_space<smem>>
      %c49 = arith.constant 49 : index
      %38 = memref.load %arg2[%c49] : memref<98xf32, #tpu.memory_space<smem>>
      %39 = vector.extract_strided_slice %34 {offsets = [0, 77], sizes = [8, 256], strides = [1, 1]} : vector<8x512xf32> to vector<8x256xf32>
      %40 = vector.broadcast %37 : f32 to vector<8x256xf32>
      %41 = arith.mulf %40, %39 : vector<8x256xf32>
      %42 = arith.addf %32, %41 : vector<8x256xf32>
      %43 = vector.extract_strided_slice %36 {offsets = [0, 77], sizes = [8, 256], strides = [1, 1]} : vector<8x512xf32> to vector<8x256xf32>
      %44 = vector.broadcast %38 : f32 to vector<8x256xf32>
      %45 = arith.mulf %44, %43 : vector<8x256xf32>
      %46 = arith.addf %42, %45 : vector<8x256xf32>
      %c7 = arith.constant 7 : index
      %47 = memref.load %arg2[%c7] : memref<98xf32, #tpu.memory_space<smem>>
      %c56 = arith.constant 56 : index
      %48 = memref.load %arg2[%c56] : memref<98xf32, #tpu.memory_space<smem>>
      %49 = vector.extract_strided_slice %34 {offsets = [0, 93], sizes = [8, 256], strides = [1, 1]} : vector<8x512xf32> to vector<8x256xf32>
      %50 = vector.broadcast %47 : f32 to vector<8x256xf32>
      %51 = arith.mulf %50, %49 : vector<8x256xf32>
      %52 = arith.addf %46, %51 : vector<8x256xf32>
      %53 = vector.extract_strided_slice %36 {offsets = [0, 93], sizes = [8, 256], strides = [1, 1]} : vector<8x512xf32> to vector<8x256xf32>
      %54 = vector.broadcast %48 : f32 to vector<8x256xf32>
      %55 = arith.mulf %54, %53 : vector<8x256xf32>
      %56 = arith.addf %52, %55 : vector<8x256xf32>
      %c14 = arith.constant 14 : index
      %57 = memref.load %arg2[%c14] : memref<98xf32, #tpu.memory_space<smem>>
      %c63 = arith.constant 63 : index
      %58 = memref.load %arg2[%c63] : memref<98xf32, #tpu.memory_space<smem>>
      %59 = vector.extract_strided_slice %34 {offsets = [0, 109], sizes = [8, 256], strides = [1, 1]} : vector<8x512xf32> to vector<8x256xf32>
      %60 = vector.broadcast %57 : f32 to vector<8x256xf32>
      %61 = arith.mulf %60, %59 : vector<8x256xf32>
      %62 = arith.addf %56, %61 : vector<8x256xf32>
      %63 = vector.extract_strided_slice %36 {offsets = [0, 109], sizes = [8, 256], strides = [1, 1]} : vector<8x512xf32> to vector<8x256xf32>
      %64 = vector.broadcast %58 : f32 to vector<8x256xf32>
      %65 = arith.mulf %64, %63 : vector<8x256xf32>
      %66 = arith.addf %62, %65 : vector<8x256xf32>
      %c21 = arith.constant 21 : index
      %67 = memref.load %arg2[%c21] : memref<98xf32, #tpu.memory_space<smem>>
      %c70 = arith.constant 70 : index
      %68 = memref.load %arg2[%c70] : memref<98xf32, #tpu.memory_space<smem>>
      %69 = vector.extract_strided_slice %34 {offsets = [0, 125], sizes = [8, 256], strides = [1, 1]} : vector<8x512xf32> to vector<8x256xf32>
      %70 = vector.broadcast %67 : f32 to vector<8x256xf32>
      %71 = arith.mulf %70, %69 : vector<8x256xf32>
      %72 = arith.addf %66, %71 : vector<8x256xf32>
      %73 = vector.extract_strided_slice %36 {offsets = [0, 125], sizes = [8, 256], strides = [1, 1]} : vector<8x512xf32> to vector<8x256xf32>
      %74 = vector.broadcast %68 : f32 to vector<8x256xf32>
      %75 = arith.mulf %74, %73 : vector<8x256xf32>
      %76 = arith.addf %72, %75 : vector<8x256xf32>
      %c28 = arith.constant 28 : index
      %77 = memref.load %arg2[%c28] : memref<98xf32, #tpu.memory_space<smem>>
      %c77 = arith.constant 77 : index
      %78 = memref.load %arg2[%c77] : memref<98xf32, #tpu.memory_space<smem>>
      %79 = vector.extract_strided_slice %34 {offsets = [0, 141], sizes = [8, 256], strides = [1, 1]} : vector<8x512xf32> to vector<8x256xf32>
      %80 = vector.broadcast %77 : f32 to vector<8x256xf32>
      %81 = arith.mulf %80, %79 : vector<8x256xf32>
      %82 = arith.addf %76, %81 : vector<8x256xf32>
      %83 = vector.extract_strided_slice %36 {offsets = [0, 141], sizes = [8, 256], strides = [1, 1]} : vector<8x512xf32> to vector<8x256xf32>
      %84 = vector.broadcast %78 : f32 to vector<8x256xf32>
      %85 = arith.mulf %84, %83 : vector<8x256xf32>
      %86 = arith.addf %82, %85 : vector<8x256xf32>
      %c35 = arith.constant 35 : index
      %87 = memref.load %arg2[%c35] : memref<98xf32, #tpu.memory_space<smem>>
      %c84 = arith.constant 84 : index
      %88 = memref.load %arg2[%c84] : memref<98xf32, #tpu.memory_space<smem>>
      %89 = vector.extract_strided_slice %34 {offsets = [0, 157], sizes = [8, 256], strides = [1, 1]} : vector<8x512xf32> to vector<8x256xf32>
      %90 = vector.broadcast %87 : f32 to vector<8x256xf32>
      %91 = arith.mulf %90, %89 : vector<8x256xf32>
      %92 = arith.addf %86, %91 : vector<8x256xf32>
      %93 = vector.extract_strided_slice %36 {offsets = [0, 157], sizes = [8, 256], strides = [1, 1]} : vector<8x512xf32> to vector<8x256xf32>
      %94 = vector.broadcast %88 : f32 to vector<8x256xf32>
      %95 = arith.mulf %94, %93 : vector<8x256xf32>
      %96 = arith.addf %92, %95 : vector<8x256xf32>
      %c42 = arith.constant 42 : index
      %97 = memref.load %arg2[%c42] : memref<98xf32, #tpu.memory_space<smem>>
      %c91 = arith.constant 91 : index
      %98 = memref.load %arg2[%c91] : memref<98xf32, #tpu.memory_space<smem>>
      %99 = vector.extract_strided_slice %34 {offsets = [0, 173], sizes = [8, 256], strides = [1, 1]} : vector<8x512xf32> to vector<8x256xf32>
      %100 = vector.broadcast %97 : f32 to vector<8x256xf32>
      %101 = arith.mulf %100, %99 : vector<8x256xf32>
      %102 = arith.addf %96, %101 : vector<8x256xf32>
      %103 = vector.extract_strided_slice %36 {offsets = [0, 173], sizes = [8, 256], strides = [1, 1]} : vector<8x512xf32> to vector<8x256xf32>
      %104 = vector.broadcast %98 : f32 to vector<8x256xf32>
      %105 = arith.mulf %104, %103 : vector<8x256xf32>
      %106 = arith.addf %102, %105 : vector<8x256xf32>
      %107 = vector.broadcast %20 : vector<1x512xf32> to vector<8x512xf32>
      %108 = arith.mulf %30, %107 : vector<8x512xf32>
      %109 = vector.broadcast %20 : vector<1x512xf32> to vector<8x512xf32>
      %110 = arith.mulf %31, %109 : vector<8x512xf32>
      %c1_41 = arith.constant 1 : index
      %111 = memref.load %arg2[%c1_41] : memref<98xf32, #tpu.memory_space<smem>>
      %c50 = arith.constant 50 : index
      %112 = memref.load %arg2[%c50] : memref<98xf32, #tpu.memory_space<smem>>
      %113 = vector.extract_strided_slice %108 {offsets = [0, 78], sizes = [8, 256], strides = [1, 1]} : vector<8x512xf32> to vector<8x256xf32>
      %114 = vector.broadcast %111 : f32 to vector<8x256xf32>
      %115 = arith.mulf %114, %113 : vector<8x256xf32>
      %116 = arith.addf %106, %115 : vector<8x256xf32>
      %117 = vector.extract_strided_slice %110 {offsets = [0, 78], sizes = [8, 256], strides = [1, 1]} : vector<8x512xf32> to vector<8x256xf32>
      %118 = vector.broadcast %112 : f32 to vector<8x256xf32>
      %119 = arith.mulf %118, %117 : vector<8x256xf32>
      %120 = arith.addf %116, %119 : vector<8x256xf32>
      %c8 = arith.constant 8 : index
      %121 = memref.load %arg2[%c8] : memref<98xf32, #tpu.memory_space<smem>>
      %c57 = arith.constant 57 : index
      %122 = memref.load %arg2[%c57] : memref<98xf32, #tpu.memory_space<smem>>
      %123 = vector.extract_strided_slice %108 {offsets = [0, 94], sizes = [8, 256], strides = [1, 1]} : vector<8x512xf32> to vector<8x256xf32>
      %124 = vector.broadcast %121 : f32 to vector<8x256xf32>
      %125 = arith.mulf %124, %123 : vector<8x256xf32>
      %126 = arith.addf %120, %125 : vector<8x256xf32>
      %127 = vector.extract_strided_slice %110 {offsets = [0, 94], sizes = [8, 256], strides = [1, 1]} : vector<8x512xf32> to vector<8x256xf32>
      %128 = vector.broadcast %122 : f32 to vector<8x256xf32>
      %129 = arith.mulf %128, %127 : vector<8x256xf32>
      %130 = arith.addf %126, %129 : vector<8x256xf32>
      %c15 = arith.constant 15 : index
      %131 = memref.load %arg2[%c15] : memref<98xf32, #tpu.memory_space<smem>>
      %c64 = arith.constant 64 : index
      %132 = memref.load %arg2[%c64] : memref<98xf32, #tpu.memory_space<smem>>
      %133 = vector.extract_strided_slice %108 {offsets = [0, 110], sizes = [8, 256], strides = [1, 1]} : vector<8x512xf32> to vector<8x256xf32>
      %134 = vector.broadcast %131 : f32 to vector<8x256xf32>
      %135 = arith.mulf %134, %133 : vector<8x256xf32>
      %136 = arith.addf %130, %135 : vector<8x256xf32>
      %137 = vector.extract_strided_slice %110 {offsets = [0, 110], sizes = [8, 256], strides = [1, 1]} : vector<8x512xf32> to vector<8x256xf32>
      %138 = vector.broadcast %132 : f32 to vector<8x256xf32>
      %139 = arith.mulf %138, %137 : vector<8x256xf32>
      %140 = arith.addf %136, %139 : vector<8x256xf32>
      %c22 = arith.constant 22 : index
      %141 = memref.load %arg2[%c22] : memref<98xf32, #tpu.memory_space<smem>>
      %c71 = arith.constant 71 : index
      %142 = memref.load %arg2[%c71] : memref<98xf32, #tpu.memory_space<smem>>
      %143 = vector.extract_strided_slice %108 {offsets = [0, 126], sizes = [8, 256], strides = [1, 1]} : vector<8x512xf32> to vector<8x256xf32>
      %144 = vector.broadcast %141 : f32 to vector<8x256xf32>
      %145 = arith.mulf %144, %143 : vector<8x256xf32>
      %146 = arith.addf %140, %145 : vector<8x256xf32>
      %147 = vector.extract_strided_slice %110 {offsets = [0, 126], sizes = [8, 256], strides = [1, 1]} : vector<8x512xf32> to vector<8x256xf32>
      %148 = vector.broadcast %142 : f32 to vector<8x256xf32>
      %149 = arith.mulf %148, %147 : vector<8x256xf32>
      %150 = arith.addf %146, %149 : vector<8x256xf32>
      %c29 = arith.constant 29 : index
      %151 = memref.load %arg2[%c29] : memref<98xf32, #tpu.memory_space<smem>>
      %c78 = arith.constant 78 : index
      %152 = memref.load %arg2[%c78] : memref<98xf32, #tpu.memory_space<smem>>
      %153 = vector.extract_strided_slice %108 {offsets = [0, 142], sizes = [8, 256], strides = [1, 1]} : vector<8x512xf32> to vector<8x256xf32>
      %154 = vector.broadcast %151 : f32 to vector<8x256xf32>
      %155 = arith.mulf %154, %153 : vector<8x256xf32>
      %156 = arith.addf %150, %155 : vector<8x256xf32>
      %157 = vector.extract_strided_slice %110 {offsets = [0, 142], sizes = [8, 256], strides = [1, 1]} : vector<8x512xf32> to vector<8x256xf32>
      %158 = vector.broadcast %152 : f32 to vector<8x256xf32>
      %159 = arith.mulf %158, %157 : vector<8x256xf32>
      %160 = arith.addf %156, %159 : vector<8x256xf32>
      %c36 = arith.constant 36 : index
      %161 = memref.load %arg2[%c36] : memref<98xf32, #tpu.memory_space<smem>>
      %c85 = arith.constant 85 : index
      %162 = memref.load %arg2[%c85] : memref<98xf32, #tpu.memory_space<smem>>
      %163 = vector.extract_strided_slice %108 {offsets = [0, 158], sizes = [8, 256], strides = [1, 1]} : vector<8x512xf32> to vector<8x256xf32>
      %164 = vector.broadcast %161 : f32 to vector<8x256xf32>
      %165 = arith.mulf %164, %163 : vector<8x256xf32>
      %166 = arith.addf %160, %165 : vector<8x256xf32>
      %167 = vector.extract_strided_slice %110 {offsets = [0, 158], sizes = [8, 256], strides = [1, 1]} : vector<8x512xf32> to vector<8x256xf32>
      %168 = vector.broadcast %162 : f32 to vector<8x256xf32>
      %169 = arith.mulf %168, %167 : vector<8x256xf32>
      %170 = arith.addf %166, %169 : vector<8x256xf32>
      %c43 = arith.constant 43 : index
      %171 = memref.load %arg2[%c43] : memref<98xf32, #tpu.memory_space<smem>>
      %c92 = arith.constant 92 : index
      %172 = memref.load %arg2[%c92] : memref<98xf32, #tpu.memory_space<smem>>
      %173 = vector.extract_strided_slice %108 {offsets = [0, 174], sizes = [8, 256], strides = [1, 1]} : vector<8x512xf32> to vector<8x256xf32>
      %174 = vector.broadcast %171 : f32 to vector<8x256xf32>
      %175 = arith.mulf %174, %173 : vector<8x256xf32>
      %176 = arith.addf %170, %175 : vector<8x256xf32>
      %177 = vector.extract_strided_slice %110 {offsets = [0, 174], sizes = [8, 256], strides = [1, 1]} : vector<8x512xf32> to vector<8x256xf32>
      %178 = vector.broadcast %172 : f32 to vector<8x256xf32>
      %179 = arith.mulf %178, %177 : vector<8x256xf32>
      %180 = arith.addf %176, %179 : vector<8x256xf32>
      %181 = vector.broadcast %21 : vector<1x512xf32> to vector<8x512xf32>
      %182 = arith.mulf %30, %181 : vector<8x512xf32>
      %183 = vector.broadcast %21 : vector<1x512xf32> to vector<8x512xf32>
      %184 = arith.mulf %31, %183 : vector<8x512xf32>
      %c2_42 = arith.constant 2 : index
      %185 = memref.load %arg2[%c2_42] : memref<98xf32, #tpu.memory_space<smem>>
      %c51 = arith.constant 51 : index
      %186 = memref.load %arg2[%c51] : memref<98xf32, #tpu.memory_space<smem>>
      %187 = vector.extract_strided_slice %182 {offsets = [0, 79], sizes = [8, 256], strides = [1, 1]} : vector<8x512xf32> to vector<8x256xf32>
      %188 = vector.broadcast %185 : f32 to vector<8x256xf32>
      %189 = arith.mulf %188, %187 : vector<8x256xf32>
      %190 = arith.addf %180, %189 : vector<8x256xf32>
      %191 = vector.extract_strided_slice %184 {offsets = [0, 79], sizes = [8, 256], strides = [1, 1]} : vector<8x512xf32> to vector<8x256xf32>
      %192 = vector.broadcast %186 : f32 to vector<8x256xf32>
      %193 = arith.mulf %192, %191 : vector<8x256xf32>
      %194 = arith.addf %190, %193 : vector<8x256xf32>
      %c9 = arith.constant 9 : index
      %195 = memref.load %arg2[%c9] : memref<98xf32, #tpu.memory_space<smem>>
      %c58 = arith.constant 58 : index
      %196 = memref.load %arg2[%c58] : memref<98xf32, #tpu.memory_space<smem>>
      %197 = vector.extract_strided_slice %182 {offsets = [0, 95], sizes = [8, 256], strides = [1, 1]} : vector<8x512xf32> to vector<8x256xf32>
      %198 = vector.broadcast %195 : f32 to vector<8x256xf32>
      %199 = arith.mulf %198, %197 : vector<8x256xf32>
      %200 = arith.addf %194, %199 : vector<8x256xf32>
      %201 = vector.extract_strided_slice %184 {offsets = [0, 95], sizes = [8, 256], strides = [1, 1]} : vector<8x512xf32> to vector<8x256xf32>
      %202 = vector.broadcast %196 : f32 to vector<8x256xf32>
      %203 = arith.mulf %202, %201 : vector<8x256xf32>
      %204 = arith.addf %200, %203 : vector<8x256xf32>
      %c16 = arith.constant 16 : index
      %205 = memref.load %arg2[%c16] : memref<98xf32, #tpu.memory_space<smem>>
      %c65 = arith.constant 65 : index
      %206 = memref.load %arg2[%c65] : memref<98xf32, #tpu.memory_space<smem>>
      %207 = vector.extract_strided_slice %182 {offsets = [0, 111], sizes = [8, 256], strides = [1, 1]} : vector<8x512xf32> to vector<8x256xf32>
      %208 = vector.broadcast %205 : f32 to vector<8x256xf32>
      %209 = arith.mulf %208, %207 : vector<8x256xf32>
      %210 = arith.addf %204, %209 : vector<8x256xf32>
      %211 = vector.extract_strided_slice %184 {offsets = [0, 111], sizes = [8, 256], strides = [1, 1]} : vector<8x512xf32> to vector<8x256xf32>
      %212 = vector.broadcast %206 : f32 to vector<8x256xf32>
      %213 = arith.mulf %212, %211 : vector<8x256xf32>
      %214 = arith.addf %210, %213 : vector<8x256xf32>
      %c23 = arith.constant 23 : index
      %215 = memref.load %arg2[%c23] : memref<98xf32, #tpu.memory_space<smem>>
      %c72 = arith.constant 72 : index
      %216 = memref.load %arg2[%c72] : memref<98xf32, #tpu.memory_space<smem>>
      %217 = vector.extract_strided_slice %182 {offsets = [0, 127], sizes = [8, 256], strides = [1, 1]} : vector<8x512xf32> to vector<8x256xf32>
      %218 = vector.broadcast %215 : f32 to vector<8x256xf32>
      %219 = arith.mulf %218, %217 : vector<8x256xf32>
      %220 = arith.addf %214, %219 : vector<8x256xf32>
      %221 = vector.extract_strided_slice %184 {offsets = [0, 127], sizes = [8, 256], strides = [1, 1]} : vector<8x512xf32> to vector<8x256xf32>
      %222 = vector.broadcast %216 : f32 to vector<8x256xf32>
      %223 = arith.mulf %222, %221 : vector<8x256xf32>
      %224 = arith.addf %220, %223 : vector<8x256xf32>
      %c30 = arith.constant 30 : index
      %225 = memref.load %arg2[%c30] : memref<98xf32, #tpu.memory_space<smem>>
      %c79 = arith.constant 79 : index
      %226 = memref.load %arg2[%c79] : memref<98xf32, #tpu.memory_space<smem>>
      %227 = vector.extract_strided_slice %182 {offsets = [0, 143], sizes = [8, 256], strides = [1, 1]} : vector<8x512xf32> to vector<8x256xf32>
      %228 = vector.broadcast %225 : f32 to vector<8x256xf32>
      %229 = arith.mulf %228, %227 : vector<8x256xf32>
      %230 = arith.addf %224, %229 : vector<8x256xf32>
      %231 = vector.extract_strided_slice %184 {offsets = [0, 143], sizes = [8, 256], strides = [1, 1]} : vector<8x512xf32> to vector<8x256xf32>
      %232 = vector.broadcast %226 : f32 to vector<8x256xf32>
      %233 = arith.mulf %232, %231 : vector<8x256xf32>
      %234 = arith.addf %230, %233 : vector<8x256xf32>
      %c37 = arith.constant 37 : index
      %235 = memref.load %arg2[%c37] : memref<98xf32, #tpu.memory_space<smem>>
      %c86 = arith.constant 86 : index
      %236 = memref.load %arg2[%c86] : memref<98xf32, #tpu.memory_space<smem>>
      %237 = vector.extract_strided_slice %182 {offsets = [0, 159], sizes = [8, 256], strides = [1, 1]} : vector<8x512xf32> to vector<8x256xf32>
      %238 = vector.broadcast %235 : f32 to vector<8x256xf32>
      %239 = arith.mulf %238, %237 : vector<8x256xf32>
      %240 = arith.addf %234, %239 : vector<8x256xf32>
      %241 = vector.extract_strided_slice %184 {offsets = [0, 159], sizes = [8, 256], strides = [1, 1]} : vector<8x512xf32> to vector<8x256xf32>
      %242 = vector.broadcast %236 : f32 to vector<8x256xf32>
      %243 = arith.mulf %242, %241 : vector<8x256xf32>
      %244 = arith.addf %240, %243 : vector<8x256xf32>
      %c44 = arith.constant 44 : index
      %245 = memref.load %arg2[%c44] : memref<98xf32, #tpu.memory_space<smem>>
      %c93 = arith.constant 93 : index
      %246 = memref.load %arg2[%c93] : memref<98xf32, #tpu.memory_space<smem>>
      %247 = vector.extract_strided_slice %182 {offsets = [0, 175], sizes = [8, 256], strides = [1, 1]} : vector<8x512xf32> to vector<8x256xf32>
      %248 = vector.broadcast %245 : f32 to vector<8x256xf32>
      %249 = arith.mulf %248, %247 : vector<8x256xf32>
      %250 = arith.addf %244, %249 : vector<8x256xf32>
      %251 = vector.extract_strided_slice %184 {offsets = [0, 175], sizes = [8, 256], strides = [1, 1]} : vector<8x512xf32> to vector<8x256xf32>
      %252 = vector.broadcast %246 : f32 to vector<8x256xf32>
      %253 = arith.mulf %252, %251 : vector<8x256xf32>
      %254 = arith.addf %250, %253 : vector<8x256xf32>
      %255 = vector.broadcast %22 : vector<1x512xf32> to vector<8x512xf32>
      %256 = arith.mulf %30, %255 : vector<8x512xf32>
      %257 = vector.broadcast %22 : vector<1x512xf32> to vector<8x512xf32>
      %258 = arith.mulf %31, %257 : vector<8x512xf32>
      %c3_43 = arith.constant 3 : index
      %259 = memref.load %arg2[%c3_43] : memref<98xf32, #tpu.memory_space<smem>>
      %c52 = arith.constant 52 : index
      %260 = memref.load %arg2[%c52] : memref<98xf32, #tpu.memory_space<smem>>
      %261 = vector.extract_strided_slice %256 {offsets = [0, 80], sizes = [8, 256], strides = [1, 1]} : vector<8x512xf32> to vector<8x256xf32>
      %262 = vector.broadcast %259 : f32 to vector<8x256xf32>
      %263 = arith.mulf %262, %261 : vector<8x256xf32>
      %264 = arith.addf %254, %263 : vector<8x256xf32>
      %265 = vector.extract_strided_slice %258 {offsets = [0, 80], sizes = [8, 256], strides = [1, 1]} : vector<8x512xf32> to vector<8x256xf32>
      %266 = vector.broadcast %260 : f32 to vector<8x256xf32>
      %267 = arith.mulf %266, %265 : vector<8x256xf32>
      %268 = arith.addf %264, %267 : vector<8x256xf32>
      %c10 = arith.constant 10 : index
      %269 = memref.load %arg2[%c10] : memref<98xf32, #tpu.memory_space<smem>>
      %c59 = arith.constant 59 : index
      %270 = memref.load %arg2[%c59] : memref<98xf32, #tpu.memory_space<smem>>
      %271 = vector.extract_strided_slice %256 {offsets = [0, 96], sizes = [8, 256], strides = [1, 1]} : vector<8x512xf32> to vector<8x256xf32>
      %272 = vector.broadcast %269 : f32 to vector<8x256xf32>
      %273 = arith.mulf %272, %271 : vector<8x256xf32>
      %274 = arith.addf %268, %273 : vector<8x256xf32>
      %275 = vector.extract_strided_slice %258 {offsets = [0, 96], sizes = [8, 256], strides = [1, 1]} : vector<8x512xf32> to vector<8x256xf32>
      %276 = vector.broadcast %270 : f32 to vector<8x256xf32>
      %277 = arith.mulf %276, %275 : vector<8x256xf32>
      %278 = arith.addf %274, %277 : vector<8x256xf32>
      %c17 = arith.constant 17 : index
      %279 = memref.load %arg2[%c17] : memref<98xf32, #tpu.memory_space<smem>>
      %c66 = arith.constant 66 : index
      %280 = memref.load %arg2[%c66] : memref<98xf32, #tpu.memory_space<smem>>
      %281 = vector.extract_strided_slice %256 {offsets = [0, 112], sizes = [8, 256], strides = [1, 1]} : vector<8x512xf32> to vector<8x256xf32>
      %282 = vector.broadcast %279 : f32 to vector<8x256xf32>
      %283 = arith.mulf %282, %281 : vector<8x256xf32>
      %284 = arith.addf %278, %283 : vector<8x256xf32>
      %285 = vector.extract_strided_slice %258 {offsets = [0, 112], sizes = [8, 256], strides = [1, 1]} : vector<8x512xf32> to vector<8x256xf32>
      %286 = vector.broadcast %280 : f32 to vector<8x256xf32>
      %287 = arith.mulf %286, %285 : vector<8x256xf32>
      %288 = arith.addf %284, %287 : vector<8x256xf32>
      %c24 = arith.constant 24 : index
      %289 = memref.load %arg2[%c24] : memref<98xf32, #tpu.memory_space<smem>>
      %c73 = arith.constant 73 : index
      %290 = memref.load %arg2[%c73] : memref<98xf32, #tpu.memory_space<smem>>
      %291 = vector.extract_strided_slice %256 {offsets = [0, 128], sizes = [8, 256], strides = [1, 1]} : vector<8x512xf32> to vector<8x256xf32>
      %292 = vector.broadcast %289 : f32 to vector<8x256xf32>
      %293 = arith.mulf %292, %291 : vector<8x256xf32>
      %294 = arith.addf %288, %293 : vector<8x256xf32>
      %295 = vector.extract_strided_slice %258 {offsets = [0, 128], sizes = [8, 256], strides = [1, 1]} : vector<8x512xf32> to vector<8x256xf32>
      %296 = vector.broadcast %290 : f32 to vector<8x256xf32>
      %297 = arith.mulf %296, %295 : vector<8x256xf32>
      %298 = arith.addf %294, %297 : vector<8x256xf32>
      %c31 = arith.constant 31 : index
      %299 = memref.load %arg2[%c31] : memref<98xf32, #tpu.memory_space<smem>>
      %c80 = arith.constant 80 : index
      %300 = memref.load %arg2[%c80] : memref<98xf32, #tpu.memory_space<smem>>
      %301 = vector.extract_strided_slice %256 {offsets = [0, 144], sizes = [8, 256], strides = [1, 1]} : vector<8x512xf32> to vector<8x256xf32>
      %302 = vector.broadcast %299 : f32 to vector<8x256xf32>
      %303 = arith.mulf %302, %301 : vector<8x256xf32>
      %304 = arith.addf %298, %303 : vector<8x256xf32>
      %305 = vector.extract_strided_slice %258 {offsets = [0, 144], sizes = [8, 256], strides = [1, 1]} : vector<8x512xf32> to vector<8x256xf32>
      %306 = vector.broadcast %300 : f32 to vector<8x256xf32>
      %307 = arith.mulf %306, %305 : vector<8x256xf32>
      %308 = arith.addf %304, %307 : vector<8x256xf32>
      %c38 = arith.constant 38 : index
      %309 = memref.load %arg2[%c38] : memref<98xf32, #tpu.memory_space<smem>>
      %c87 = arith.constant 87 : index
      %310 = memref.load %arg2[%c87] : memref<98xf32, #tpu.memory_space<smem>>
      %311 = vector.extract_strided_slice %256 {offsets = [0, 160], sizes = [8, 256], strides = [1, 1]} : vector<8x512xf32> to vector<8x256xf32>
      %312 = vector.broadcast %309 : f32 to vector<8x256xf32>
      %313 = arith.mulf %312, %311 : vector<8x256xf32>
      %314 = arith.addf %308, %313 : vector<8x256xf32>
      %315 = vector.extract_strided_slice %258 {offsets = [0, 160], sizes = [8, 256], strides = [1, 1]} : vector<8x512xf32> to vector<8x256xf32>
      %316 = vector.broadcast %310 : f32 to vector<8x256xf32>
      %317 = arith.mulf %316, %315 : vector<8x256xf32>
      %318 = arith.addf %314, %317 : vector<8x256xf32>
      %c45 = arith.constant 45 : index
      %319 = memref.load %arg2[%c45] : memref<98xf32, #tpu.memory_space<smem>>
      %c94 = arith.constant 94 : index
      %320 = memref.load %arg2[%c94] : memref<98xf32, #tpu.memory_space<smem>>
      %321 = vector.extract_strided_slice %256 {offsets = [0, 176], sizes = [8, 256], strides = [1, 1]} : vector<8x512xf32> to vector<8x256xf32>
      %322 = vector.broadcast %319 : f32 to vector<8x256xf32>
      %323 = arith.mulf %322, %321 : vector<8x256xf32>
      %324 = arith.addf %318, %323 : vector<8x256xf32>
      %325 = vector.extract_strided_slice %258 {offsets = [0, 176], sizes = [8, 256], strides = [1, 1]} : vector<8x512xf32> to vector<8x256xf32>
      %326 = vector.broadcast %320 : f32 to vector<8x256xf32>
      %327 = arith.mulf %326, %325 : vector<8x256xf32>
      %328 = arith.addf %324, %327 : vector<8x256xf32>
      %329 = vector.broadcast %23 : vector<1x512xf32> to vector<8x512xf32>
      %330 = arith.mulf %30, %329 : vector<8x512xf32>
      %331 = vector.broadcast %23 : vector<1x512xf32> to vector<8x512xf32>
      %332 = arith.mulf %31, %331 : vector<8x512xf32>
      %c4_44 = arith.constant 4 : index
      %333 = memref.load %arg2[%c4_44] : memref<98xf32, #tpu.memory_space<smem>>
      %c53 = arith.constant 53 : index
      %334 = memref.load %arg2[%c53] : memref<98xf32, #tpu.memory_space<smem>>
      %335 = vector.extract_strided_slice %330 {offsets = [0, 81], sizes = [8, 256], strides = [1, 1]} : vector<8x512xf32> to vector<8x256xf32>
      %336 = vector.broadcast %333 : f32 to vector<8x256xf32>
      %337 = arith.mulf %336, %335 : vector<8x256xf32>
      %338 = arith.addf %328, %337 : vector<8x256xf32>
      %339 = vector.extract_strided_slice %332 {offsets = [0, 81], sizes = [8, 256], strides = [1, 1]} : vector<8x512xf32> to vector<8x256xf32>
      %340 = vector.broadcast %334 : f32 to vector<8x256xf32>
      %341 = arith.mulf %340, %339 : vector<8x256xf32>
      %342 = arith.addf %338, %341 : vector<8x256xf32>
      %c11 = arith.constant 11 : index
      %343 = memref.load %arg2[%c11] : memref<98xf32, #tpu.memory_space<smem>>
      %c60 = arith.constant 60 : index
      %344 = memref.load %arg2[%c60] : memref<98xf32, #tpu.memory_space<smem>>
      %345 = vector.extract_strided_slice %330 {offsets = [0, 97], sizes = [8, 256], strides = [1, 1]} : vector<8x512xf32> to vector<8x256xf32>
      %346 = vector.broadcast %343 : f32 to vector<8x256xf32>
      %347 = arith.mulf %346, %345 : vector<8x256xf32>
      %348 = arith.addf %342, %347 : vector<8x256xf32>
      %349 = vector.extract_strided_slice %332 {offsets = [0, 97], sizes = [8, 256], strides = [1, 1]} : vector<8x512xf32> to vector<8x256xf32>
      %350 = vector.broadcast %344 : f32 to vector<8x256xf32>
      %351 = arith.mulf %350, %349 : vector<8x256xf32>
      %352 = arith.addf %348, %351 : vector<8x256xf32>
      %c18 = arith.constant 18 : index
      %353 = memref.load %arg2[%c18] : memref<98xf32, #tpu.memory_space<smem>>
      %c67 = arith.constant 67 : index
      %354 = memref.load %arg2[%c67] : memref<98xf32, #tpu.memory_space<smem>>
      %355 = vector.extract_strided_slice %330 {offsets = [0, 113], sizes = [8, 256], strides = [1, 1]} : vector<8x512xf32> to vector<8x256xf32>
      %356 = vector.broadcast %353 : f32 to vector<8x256xf32>
      %357 = arith.mulf %356, %355 : vector<8x256xf32>
      %358 = arith.addf %352, %357 : vector<8x256xf32>
      %359 = vector.extract_strided_slice %332 {offsets = [0, 113], sizes = [8, 256], strides = [1, 1]} : vector<8x512xf32> to vector<8x256xf32>
      %360 = vector.broadcast %354 : f32 to vector<8x256xf32>
      %361 = arith.mulf %360, %359 : vector<8x256xf32>
      %362 = arith.addf %358, %361 : vector<8x256xf32>
      %c25 = arith.constant 25 : index
      %363 = memref.load %arg2[%c25] : memref<98xf32, #tpu.memory_space<smem>>
      %c74 = arith.constant 74 : index
      %364 = memref.load %arg2[%c74] : memref<98xf32, #tpu.memory_space<smem>>
      %365 = vector.extract_strided_slice %330 {offsets = [0, 129], sizes = [8, 256], strides = [1, 1]} : vector<8x512xf32> to vector<8x256xf32>
      %366 = vector.broadcast %363 : f32 to vector<8x256xf32>
      %367 = arith.mulf %366, %365 : vector<8x256xf32>
      %368 = arith.addf %362, %367 : vector<8x256xf32>
      %369 = vector.extract_strided_slice %332 {offsets = [0, 129], sizes = [8, 256], strides = [1, 1]} : vector<8x512xf32> to vector<8x256xf32>
      %370 = vector.broadcast %364 : f32 to vector<8x256xf32>
      %371 = arith.mulf %370, %369 : vector<8x256xf32>
      %372 = arith.addf %368, %371 : vector<8x256xf32>
      %c32 = arith.constant 32 : index
      %373 = memref.load %arg2[%c32] : memref<98xf32, #tpu.memory_space<smem>>
      %c81 = arith.constant 81 : index
      %374 = memref.load %arg2[%c81] : memref<98xf32, #tpu.memory_space<smem>>
      %375 = vector.extract_strided_slice %330 {offsets = [0, 145], sizes = [8, 256], strides = [1, 1]} : vector<8x512xf32> to vector<8x256xf32>
      %376 = vector.broadcast %373 : f32 to vector<8x256xf32>
      %377 = arith.mulf %376, %375 : vector<8x256xf32>
      %378 = arith.addf %372, %377 : vector<8x256xf32>
      %379 = vector.extract_strided_slice %332 {offsets = [0, 145], sizes = [8, 256], strides = [1, 1]} : vector<8x512xf32> to vector<8x256xf32>
      %380 = vector.broadcast %374 : f32 to vector<8x256xf32>
      %381 = arith.mulf %380, %379 : vector<8x256xf32>
      %382 = arith.addf %378, %381 : vector<8x256xf32>
      %c39 = arith.constant 39 : index
      %383 = memref.load %arg2[%c39] : memref<98xf32, #tpu.memory_space<smem>>
      %c88 = arith.constant 88 : index
      %384 = memref.load %arg2[%c88] : memref<98xf32, #tpu.memory_space<smem>>
      %385 = vector.extract_strided_slice %330 {offsets = [0, 161], sizes = [8, 256], strides = [1, 1]} : vector<8x512xf32> to vector<8x256xf32>
      %386 = vector.broadcast %383 : f32 to vector<8x256xf32>
      %387 = arith.mulf %386, %385 : vector<8x256xf32>
      %388 = arith.addf %382, %387 : vector<8x256xf32>
      %389 = vector.extract_strided_slice %332 {offsets = [0, 161], sizes = [8, 256], strides = [1, 1]} : vector<8x512xf32> to vector<8x256xf32>
      %390 = vector.broadcast %384 : f32 to vector<8x256xf32>
      %391 = arith.mulf %390, %389 : vector<8x256xf32>
      %392 = arith.addf %388, %391 : vector<8x256xf32>
      %c46 = arith.constant 46 : index
      %393 = memref.load %arg2[%c46] : memref<98xf32, #tpu.memory_space<smem>>
      %c95 = arith.constant 95 : index
      %394 = memref.load %arg2[%c95] : memref<98xf32, #tpu.memory_space<smem>>
      %395 = vector.extract_strided_slice %330 {offsets = [0, 177], sizes = [8, 256], strides = [1, 1]} : vector<8x512xf32> to vector<8x256xf32>
      %396 = vector.broadcast %393 : f32 to vector<8x256xf32>
      %397 = arith.mulf %396, %395 : vector<8x256xf32>
      %398 = arith.addf %392, %397 : vector<8x256xf32>
      %399 = vector.extract_strided_slice %332 {offsets = [0, 177], sizes = [8, 256], strides = [1, 1]} : vector<8x512xf32> to vector<8x256xf32>
      %400 = vector.broadcast %394 : f32 to vector<8x256xf32>
      %401 = arith.mulf %400, %399 : vector<8x256xf32>
      %402 = arith.addf %398, %401 : vector<8x256xf32>
      %403 = vector.broadcast %24 : vector<1x512xf32> to vector<8x512xf32>
      %404 = arith.mulf %30, %403 : vector<8x512xf32>
      %405 = vector.broadcast %24 : vector<1x512xf32> to vector<8x512xf32>
      %406 = arith.mulf %31, %405 : vector<8x512xf32>
      %c5_45 = arith.constant 5 : index
      %407 = memref.load %arg2[%c5_45] : memref<98xf32, #tpu.memory_space<smem>>
      %c54 = arith.constant 54 : index
      %408 = memref.load %arg2[%c54] : memref<98xf32, #tpu.memory_space<smem>>
      %409 = vector.extract_strided_slice %404 {offsets = [0, 82], sizes = [8, 256], strides = [1, 1]} : vector<8x512xf32> to vector<8x256xf32>
      %410 = vector.broadcast %407 : f32 to vector<8x256xf32>
      %411 = arith.mulf %410, %409 : vector<8x256xf32>
      %412 = arith.addf %402, %411 : vector<8x256xf32>
      %413 = vector.extract_strided_slice %406 {offsets = [0, 82], sizes = [8, 256], strides = [1, 1]} : vector<8x512xf32> to vector<8x256xf32>
      %414 = vector.broadcast %408 : f32 to vector<8x256xf32>
      %415 = arith.mulf %414, %413 : vector<8x256xf32>
      %416 = arith.addf %412, %415 : vector<8x256xf32>
      %c12 = arith.constant 12 : index
      %417 = memref.load %arg2[%c12] : memref<98xf32, #tpu.memory_space<smem>>
      %c61 = arith.constant 61 : index
      %418 = memref.load %arg2[%c61] : memref<98xf32, #tpu.memory_space<smem>>
      %419 = vector.extract_strided_slice %404 {offsets = [0, 98], sizes = [8, 256], strides = [1, 1]} : vector<8x512xf32> to vector<8x256xf32>
      %420 = vector.broadcast %417 : f32 to vector<8x256xf32>
      %421 = arith.mulf %420, %419 : vector<8x256xf32>
      %422 = arith.addf %416, %421 : vector<8x256xf32>
      %423 = vector.extract_strided_slice %406 {offsets = [0, 98], sizes = [8, 256], strides = [1, 1]} : vector<8x512xf32> to vector<8x256xf32>
      %424 = vector.broadcast %418 : f32 to vector<8x256xf32>
      %425 = arith.mulf %424, %423 : vector<8x256xf32>
      %426 = arith.addf %422, %425 : vector<8x256xf32>
      %c19 = arith.constant 19 : index
      %427 = memref.load %arg2[%c19] : memref<98xf32, #tpu.memory_space<smem>>
      %c68 = arith.constant 68 : index
      %428 = memref.load %arg2[%c68] : memref<98xf32, #tpu.memory_space<smem>>
      %429 = vector.extract_strided_slice %404 {offsets = [0, 114], sizes = [8, 256], strides = [1, 1]} : vector<8x512xf32> to vector<8x256xf32>
      %430 = vector.broadcast %427 : f32 to vector<8x256xf32>
      %431 = arith.mulf %430, %429 : vector<8x256xf32>
      %432 = arith.addf %426, %431 : vector<8x256xf32>
      %433 = vector.extract_strided_slice %406 {offsets = [0, 114], sizes = [8, 256], strides = [1, 1]} : vector<8x512xf32> to vector<8x256xf32>
      %434 = vector.broadcast %428 : f32 to vector<8x256xf32>
      %435 = arith.mulf %434, %433 : vector<8x256xf32>
      %436 = arith.addf %432, %435 : vector<8x256xf32>
      %c26 = arith.constant 26 : index
      %437 = memref.load %arg2[%c26] : memref<98xf32, #tpu.memory_space<smem>>
      %c75 = arith.constant 75 : index
      %438 = memref.load %arg2[%c75] : memref<98xf32, #tpu.memory_space<smem>>
      %439 = vector.extract_strided_slice %404 {offsets = [0, 130], sizes = [8, 256], strides = [1, 1]} : vector<8x512xf32> to vector<8x256xf32>
      %440 = vector.broadcast %437 : f32 to vector<8x256xf32>
      %441 = arith.mulf %440, %439 : vector<8x256xf32>
      %442 = arith.addf %436, %441 : vector<8x256xf32>
      %443 = vector.extract_strided_slice %406 {offsets = [0, 130], sizes = [8, 256], strides = [1, 1]} : vector<8x512xf32> to vector<8x256xf32>
      %444 = vector.broadcast %438 : f32 to vector<8x256xf32>
      %445 = arith.mulf %444, %443 : vector<8x256xf32>
      %446 = arith.addf %442, %445 : vector<8x256xf32>
      %c33 = arith.constant 33 : index
      %447 = memref.load %arg2[%c33] : memref<98xf32, #tpu.memory_space<smem>>
      %c82 = arith.constant 82 : index
      %448 = memref.load %arg2[%c82] : memref<98xf32, #tpu.memory_space<smem>>
      %449 = vector.extract_strided_slice %404 {offsets = [0, 146], sizes = [8, 256], strides = [1, 1]} : vector<8x512xf32> to vector<8x256xf32>
      %450 = vector.broadcast %447 : f32 to vector<8x256xf32>
      %451 = arith.mulf %450, %449 : vector<8x256xf32>
      %452 = arith.addf %446, %451 : vector<8x256xf32>
      %453 = vector.extract_strided_slice %406 {offsets = [0, 146], sizes = [8, 256], strides = [1, 1]} : vector<8x512xf32> to vector<8x256xf32>
      %454 = vector.broadcast %448 : f32 to vector<8x256xf32>
      %455 = arith.mulf %454, %453 : vector<8x256xf32>
      %456 = arith.addf %452, %455 : vector<8x256xf32>
      %c40 = arith.constant 40 : index
      %457 = memref.load %arg2[%c40] : memref<98xf32, #tpu.memory_space<smem>>
      %c89 = arith.constant 89 : index
      %458 = memref.load %arg2[%c89] : memref<98xf32, #tpu.memory_space<smem>>
      %459 = vector.extract_strided_slice %404 {offsets = [0, 162], sizes = [8, 256], strides = [1, 1]} : vector<8x512xf32> to vector<8x256xf32>
      %460 = vector.broadcast %457 : f32 to vector<8x256xf32>
      %461 = arith.mulf %460, %459 : vector<8x256xf32>
      %462 = arith.addf %456, %461 : vector<8x256xf32>
      %463 = vector.extract_strided_slice %406 {offsets = [0, 162], sizes = [8, 256], strides = [1, 1]} : vector<8x512xf32> to vector<8x256xf32>
      %464 = vector.broadcast %458 : f32 to vector<8x256xf32>
      %465 = arith.mulf %464, %463 : vector<8x256xf32>
      %466 = arith.addf %462, %465 : vector<8x256xf32>
      %c47 = arith.constant 47 : index
      %467 = memref.load %arg2[%c47] : memref<98xf32, #tpu.memory_space<smem>>
      %c96 = arith.constant 96 : index
      %468 = memref.load %arg2[%c96] : memref<98xf32, #tpu.memory_space<smem>>
      %469 = vector.extract_strided_slice %404 {offsets = [0, 178], sizes = [8, 256], strides = [1, 1]} : vector<8x512xf32> to vector<8x256xf32>
      %470 = vector.broadcast %467 : f32 to vector<8x256xf32>
      %471 = arith.mulf %470, %469 : vector<8x256xf32>
      %472 = arith.addf %466, %471 : vector<8x256xf32>
      %473 = vector.extract_strided_slice %406 {offsets = [0, 178], sizes = [8, 256], strides = [1, 1]} : vector<8x512xf32> to vector<8x256xf32>
      %474 = vector.broadcast %468 : f32 to vector<8x256xf32>
      %475 = arith.mulf %474, %473 : vector<8x256xf32>
      %476 = arith.addf %472, %475 : vector<8x256xf32>
      %477 = vector.broadcast %25 : vector<1x512xf32> to vector<8x512xf32>
      %478 = arith.mulf %30, %477 : vector<8x512xf32>
      %479 = vector.broadcast %25 : vector<1x512xf32> to vector<8x512xf32>
      %480 = arith.mulf %31, %479 : vector<8x512xf32>
      %c6_46 = arith.constant 6 : index
      %481 = memref.load %arg2[%c6_46] : memref<98xf32, #tpu.memory_space<smem>>
      %c55 = arith.constant 55 : index
      %482 = memref.load %arg2[%c55] : memref<98xf32, #tpu.memory_space<smem>>
      %483 = vector.extract_strided_slice %478 {offsets = [0, 83], sizes = [8, 256], strides = [1, 1]} : vector<8x512xf32> to vector<8x256xf32>
      %484 = vector.broadcast %481 : f32 to vector<8x256xf32>
      %485 = arith.mulf %484, %483 : vector<8x256xf32>
      %486 = arith.addf %476, %485 : vector<8x256xf32>
      %487 = vector.extract_strided_slice %480 {offsets = [0, 83], sizes = [8, 256], strides = [1, 1]} : vector<8x512xf32> to vector<8x256xf32>
      %488 = vector.broadcast %482 : f32 to vector<8x256xf32>
      %489 = arith.mulf %488, %487 : vector<8x256xf32>
      %490 = arith.addf %486, %489 : vector<8x256xf32>
      %c13 = arith.constant 13 : index
      %491 = memref.load %arg2[%c13] : memref<98xf32, #tpu.memory_space<smem>>
      %c62 = arith.constant 62 : index
      %492 = memref.load %arg2[%c62] : memref<98xf32, #tpu.memory_space<smem>>
      %493 = vector.extract_strided_slice %478 {offsets = [0, 99], sizes = [8, 256], strides = [1, 1]} : vector<8x512xf32> to vector<8x256xf32>
      %494 = vector.broadcast %491 : f32 to vector<8x256xf32>
      %495 = arith.mulf %494, %493 : vector<8x256xf32>
      %496 = arith.addf %490, %495 : vector<8x256xf32>
      %497 = vector.extract_strided_slice %480 {offsets = [0, 99], sizes = [8, 256], strides = [1, 1]} : vector<8x512xf32> to vector<8x256xf32>
      %498 = vector.broadcast %492 : f32 to vector<8x256xf32>
      %499 = arith.mulf %498, %497 : vector<8x256xf32>
      %500 = arith.addf %496, %499 : vector<8x256xf32>
      %c20 = arith.constant 20 : index
      %501 = memref.load %arg2[%c20] : memref<98xf32, #tpu.memory_space<smem>>
      %c69 = arith.constant 69 : index
      %502 = memref.load %arg2[%c69] : memref<98xf32, #tpu.memory_space<smem>>
      %503 = vector.extract_strided_slice %478 {offsets = [0, 115], sizes = [8, 256], strides = [1, 1]} : vector<8x512xf32> to vector<8x256xf32>
      %504 = vector.broadcast %501 : f32 to vector<8x256xf32>
      %505 = arith.mulf %504, %503 : vector<8x256xf32>
      %506 = arith.addf %500, %505 : vector<8x256xf32>
      %507 = vector.extract_strided_slice %480 {offsets = [0, 115], sizes = [8, 256], strides = [1, 1]} : vector<8x512xf32> to vector<8x256xf32>
      %508 = vector.broadcast %502 : f32 to vector<8x256xf32>
      %509 = arith.mulf %508, %507 : vector<8x256xf32>
      %510 = arith.addf %506, %509 : vector<8x256xf32>
      %c27 = arith.constant 27 : index
      %511 = memref.load %arg2[%c27] : memref<98xf32, #tpu.memory_space<smem>>
      %c76 = arith.constant 76 : index
      %512 = memref.load %arg2[%c76] : memref<98xf32, #tpu.memory_space<smem>>
      %513 = vector.extract_strided_slice %478 {offsets = [0, 131], sizes = [8, 256], strides = [1, 1]} : vector<8x512xf32> to vector<8x256xf32>
      %514 = vector.broadcast %511 : f32 to vector<8x256xf32>
      %515 = arith.mulf %514, %513 : vector<8x256xf32>
      %516 = arith.addf %510, %515 : vector<8x256xf32>
      %517 = vector.extract_strided_slice %480 {offsets = [0, 131], sizes = [8, 256], strides = [1, 1]} : vector<8x512xf32> to vector<8x256xf32>
      %518 = vector.broadcast %512 : f32 to vector<8x256xf32>
      %519 = arith.mulf %518, %517 : vector<8x256xf32>
      %520 = arith.addf %516, %519 : vector<8x256xf32>
      %c34 = arith.constant 34 : index
      %521 = memref.load %arg2[%c34] : memref<98xf32, #tpu.memory_space<smem>>
      %c83 = arith.constant 83 : index
      %522 = memref.load %arg2[%c83] : memref<98xf32, #tpu.memory_space<smem>>
      %523 = vector.extract_strided_slice %478 {offsets = [0, 147], sizes = [8, 256], strides = [1, 1]} : vector<8x512xf32> to vector<8x256xf32>
      %524 = vector.broadcast %521 : f32 to vector<8x256xf32>
      %525 = arith.mulf %524, %523 : vector<8x256xf32>
      %526 = arith.addf %520, %525 : vector<8x256xf32>
      %527 = vector.extract_strided_slice %480 {offsets = [0, 147], sizes = [8, 256], strides = [1, 1]} : vector<8x512xf32> to vector<8x256xf32>
      %528 = vector.broadcast %522 : f32 to vector<8x256xf32>
      %529 = arith.mulf %528, %527 : vector<8x256xf32>
      %530 = arith.addf %526, %529 : vector<8x256xf32>
      %c41 = arith.constant 41 : index
      %531 = memref.load %arg2[%c41] : memref<98xf32, #tpu.memory_space<smem>>
      %c90 = arith.constant 90 : index
      %532 = memref.load %arg2[%c90] : memref<98xf32, #tpu.memory_space<smem>>
      %533 = vector.extract_strided_slice %478 {offsets = [0, 163], sizes = [8, 256], strides = [1, 1]} : vector<8x512xf32> to vector<8x256xf32>
      %534 = vector.broadcast %531 : f32 to vector<8x256xf32>
      %535 = arith.mulf %534, %533 : vector<8x256xf32>
      %536 = arith.addf %530, %535 : vector<8x256xf32>
      %537 = vector.extract_strided_slice %480 {offsets = [0, 163], sizes = [8, 256], strides = [1, 1]} : vector<8x512xf32> to vector<8x256xf32>
      %538 = vector.broadcast %532 : f32 to vector<8x256xf32>
      %539 = arith.mulf %538, %537 : vector<8x256xf32>
      %540 = arith.addf %536, %539 : vector<8x256xf32>
      %c48 = arith.constant 48 : index
      %541 = memref.load %arg2[%c48] : memref<98xf32, #tpu.memory_space<smem>>
      %c97 = arith.constant 97 : index
      %542 = memref.load %arg2[%c97] : memref<98xf32, #tpu.memory_space<smem>>
      %543 = vector.extract_strided_slice %478 {offsets = [0, 179], sizes = [8, 256], strides = [1, 1]} : vector<8x512xf32> to vector<8x256xf32>
      %544 = vector.broadcast %541 : f32 to vector<8x256xf32>
      %545 = arith.mulf %544, %543 : vector<8x256xf32>
      %546 = arith.addf %540, %545 : vector<8x256xf32>
      %547 = vector.extract_strided_slice %480 {offsets = [0, 179], sizes = [8, 256], strides = [1, 1]} : vector<8x512xf32> to vector<8x256xf32>
      %548 = vector.broadcast %542 : f32 to vector<8x256xf32>
      %549 = arith.mulf %548, %547 : vector<8x256xf32>
      %550 = arith.addf %546, %549 : vector<8x256xf32>
      %551 = arith.negf %550 : vector<8x256xf32>
      %552 = math.exp %551 : vector<8x256xf32>
      %cst_47 = arith.constant 1.000000e+00 : f32
      %553 = vector.broadcast %cst_47 : f32 to vector<8x256xf32>
      %554 = arith.addf %553, %552 : vector<8x256xf32>
      %555 = arith.divf %553, %554 : vector<8x256xf32>
      %c0_48 = arith.constant 0 : index
      %c0_49 = arith.constant 0 : index
      %556 = vector.load %arg5[%c0_48, %c0_49] : memref<8x256xf32, #tpu.memory_space<vmem>>, vector<8x256xf32>
      tpu.vector_store %arg5[%c0_48, %c0_49], %555 {strides = array<i32>} : memref<8x256xf32, #tpu.memory_space<vmem>>, vector<8x256xf32>,
    } else {
    }
    return
  }
  func.func @transform_0(%arg0: i32, %arg1: i32) -> i32 {
    %c0_i32 = arith.constant 0 : i32
    %c0_i32_0 = arith.constant 0 : i32
    return %c0_i32 : i32
  }
  func.func @transform_1(%arg0: i32, %arg1: i32) -> (i32, i32) {
    %c0_i32 = arith.constant 0 : i32
    %c0_i32_0 = arith.constant 0 : i32
    %c0_i32_1 = arith.constant 0 : i32
    return %c0_i32, %c0_i32_0 : i32, i32
  }
  func.func @transform_2(%arg0: i32, %arg1: i32) -> (i32, i32, i32) {
    %c0_i32 = arith.constant 0 : i32
    %c0_i32_0 = arith.constant 0 : i32
    return %arg0, %arg1, %c0_i32 : i32, i32, i32
  }
  func.func @transform_3(%arg0: i32, %arg1: i32) -> (i32, i32) {
    %c0_i32 = arith.constant 0 : i32
    %c0_i32_0 = arith.constant 0 : i32
    return %arg0, %c0_i32 : i32, i32
  }
}

</mosaic_0001>

<bundles_post_ra>
// kernel: tpu_custom_call.1
= control target key start
LH: loop header
LB: loop body
LE: loop exit
PB: predicated region body
PF: predicated region fallthrough
CT: control target
= control target key end

     0   :  { %8 = vsyncpa [#allocation9], 0  ;;  %s5403_s0 = inlined_call_operand.hbm [shape: f32[98], index: 0, kind: input, shape index: {}]   ;;  %s5404_s1 = inlined_call_operand.hbm [shape: f32[7,512], index: 1, kind: input, shape index: {}]   ;;  %s5405_s2 = inlined_call_operand.hbm [shape: f32[8,4,256], index: 2, kind: input, shape index: {}]   ;;  %s5406_s3 = inlined_call_operand.hbm [shape: f32[8,256], index: 3, kind: output, shape index: {}]  }
   0x1   :  { %9 = vsyncpa [#allocation7], 0 }
   0x2   :  { %10 = vsyncpa [#allocation12], 0 }
   0x3   :  { %11 = vsyncpa [#allocation8], 0  ;;  %s3035_s14 = scalar_lea.hbm %s5403_s0, 16 }
   0x4   :  { %p3036_p0 = scmp.ne.s32.totalorder %s5403_s0, %s3035_s14  ;;  %p3039_p1 = scmp.lt.u32.totalorder %s3035_s14, %s5403_s0 }
   0x6   :  { %p3041_p2 = pnand %p3039_p1, %p3036_p0 }
   0x8   :  { %3044 = shalt.err (!%p3041_p2)
}
   0x9   :  { %s3119_s19 = smov [#allocation6]   ;;  %s3120_s22 = smov [#allocation10]  }
   0xa   :  { %19 = dma.hbm_to_smem %s5403_s0, 16, %s3119_s19, [#allocation9]  }
   0xb   :  { %s26_s23 = sshll.u32 %s3120_s22, 4  ;;  %s3121_s24 = smov [#allocation11]   ;;  %s27_s23 = int_to_ptr.vmem [resolvable:$true] %s26_s23 }
   0xc   :  { %s35_s25 = sshll.u32 %s3121_s24, 4  ;;  %s3045_s28 = scalar_lea.hbm %s5404_s1, 512  ;;  %s36_s25 = int_to_ptr.vmem [resolvable:$true] %s35_s25 }
   0xd   :  { %p3046_p3 = scmp.ne.s32.totalorder %s5404_s1, %s3045_s28  ;;  %p3049_p4 = scmp.lt.u32.totalorder %s3045_s28, %s5404_s1 }
   0xf   :  { %p3051_p5 = pnand %p3049_p4, %p3046_p3 }
  0x11   :  { %3054 = shalt.err (!%p3051_p5)
}
  0x12   :  { %s3055_s0 = scalar_lea.vmem %s27_s23, 512  ;;  %p3060_p7 = scmp.lt.s32.totalorder %s27_s23, %s27_s23 }
  0x13   :  { %p3056_p6 = scmp.ne.s32.totalorder %s27_s23, %s3055_s0  ;;  %p3061_p8 = scmp.lt.s32.totalorder %s3055_s0, %s3055_s0 }
  0x15   :  { %p3062_p9 = por %p3061_p8, %p3060_p7 }
  0x17   :  { %p3063_p10 = pnand %p3062_p9, %p3056_p6 }
  0x19   :  { %3066 = shalt.err (!%p3063_p10)
}
  0x1a   :  { %29 = dma.hbm_to_vmem [thread:$0]  %s5404_s1, 512, %s27_s23, [#allocation7]  }
  0x1b   :  { %s3067_s10 = scalar_lea.hbm %s5405_s2, 1024 }
  0x1c   :  { %p3068_p11 = scmp.ne.s32.totalorder %s5405_s2, %s3067_s10  ;;  %p3071_p12 = scmp.lt.u32.totalorder %s3067_s10, %s5405_s2 }
  0x1e   :  { %p3073_p13 = pnand %p3071_p12, %p3068_p11 }
  0x20   :  { %3076 = shalt.err (!%p3073_p13)
}
  0x21   :  { %s3077_s15 = scalar_lea.vmem %s36_s25, 1024  ;;  %p3082_p1 = scmp.lt.s32.totalorder %s36_s25, %s36_s25 }
  0x22   :  { %p3078_p0 = scmp.ne.s32.totalorder %s36_s25, %s3077_s15  ;;  %p3083_p2 = scmp.lt.s32.totalorder %s3077_s15, %s3077_s15 }
  0x24   :  { %p3084_p3 = por %p3083_p2, %p3082_p1 }
  0x26   :  { %p3085_p4 = pnand %p3084_p3, %p3078_p0 }
  0x28   :  { %3088 = shalt.err (!%p3085_p4)
}
  0x29   :  { %s3122_s1 = smov 128   ;;  %s3123_s16 = smov 8  }
  0x2a   :  { %41 = dma.hbm_to_vmem [thread:$0]  %s5405_s2, 1024, %s36_s25, [#allocation12], %s3122_s1, %s3122_s1, %s3123_s16  }
  0x2b   :  { %3111 = dma.done.wait [#allocation9], 16  }
  0x2c   :  { %3112 = vsyncadd [#allocation9], 4294967280 }
  0x2d   :  { %3113 = dma.done.wait [#allocation7], 512  }
  0x2e   :  { %3114 = vsyncadd [#allocation7], 4294966784 }
  0x2f   :  { %3115 = dma.done.wait [#allocation12], 1024  }
  0x30   :  { %3116 = vsyncadd [#allocation12], 4294966272 }
  0x31   :  { %51 = sfence }
  0x32   :  { %v441_v0 = vlaneseq  ;;  %s2861_s19 = sld [smem:[#allocation6 + $0x7]]  ;;  %s2862_s20 = sld [smem:[#allocation6 + $0x38]]  ;;  %v3230_v1 = vld [vmem:[#allocation11] sm:$0xff]  ;;  %v3234_v3 = vld [vmem:[#allocation11 + $0x8] sm:$0xff]  ;;  %v3236_v4 = vld [vmem:[#allocation11 + $0x10] sm:$0xff]  ;;  %vm94_vm0 = vcmask 1043456  }
  0x33   :  { %s2863_s21 = sld [smem:[#allocation6 + $0xe]]  ;;  %s2864_s22 = sld [smem:[#allocation6 + $0x3f]]  ;;  %v3238_v5 = vld [vmem:[#allocation11 + $0x18] sm:$0xff]  ;;  %v3244_v7 = vcombine.high %v3230_v1, %v3230_v1  ;;  %v3248_v8 = vcombine.high %v3234_v3, %v3234_v3  ;;  %v3255_v10 = vcombine.high %v3236_v4, %v3236_v4  ;;  %v95_v12 = vsel %vm94_vm0, %v3230_v1, 0.0  ;;  %v3273_v18 = vld [vmem:[#allocation11 + $0x20] sm:$0xff]  ;;  %v3285_v30 = vld [vmem:[#allocation11 + $0x28] sm:$0xff] }
  0x34   :  { %v3232_v2 = vshrl.u32 %v441_v0, 7  ;;  %v3240_v6 = vld [vmem:[#allocation10] ss:$8 sm:$0xf]  ;;  %s2865_s2 = sld [smem:[#allocation6 + $0x15]]  ;;  %v3259_v11 = vcombine.high %v3238_v5, %v3238_v5  ;;  %v109_v13 = vsel %vm94_vm0, %v3234_v3, 0.0 }
  0x35   :  { %v123_v14 = vsel %vm94_vm0, %v3236_v4, 0.0  ;;  %v137_v15 = vsel %vm94_vm0, %v3238_v5, 0.0  ;;  %v96_v19 = vrot.slane %v95_v12, 4  ;;  %v110_v20 = vrot.slane %v109_v13, 4  ;;  %v3287_v31 = vld [vmem:[#allocation11 + $0x30] sm:$0xff]  ;;  %v3301_v40 = vld [vmem:[#allocation11 + $0x38] sm:$0xff] }
  0x36   :  { %v3251_v9 = vsub.s32 0, %v3232_v2  ;;  %v124_v23 = vrot.slane %v123_v14, 4  ;;  %v138_v24 = vrot.slane %v137_v15, 4  ;;  %vm223_vm1 = vcmask 1041409   ;;  %s3124_s23 = smov 112   ;;  %s3125_s24 = smov 96  }
  0x37   :  { %v97_v27 = vadd.f32 %v96_v19, %v95_v12  ;;  %v111_v28 = vadd.f32 %v110_v20, %v109_v13  ;;  %v151_v34 = vsel %vm94_vm0, %v3273_v18, 0.0  ;;  %vm225_vm2 = vcmask 1042434   ;;  %s3126_s25 = smov 80   ;;  %s3435_s26 = sld [smem:[#allocation6 + $0x46]] }
  0x38   :  { %v444_v16 = vrot.slane %v3240_v6, %v3251_v9  ;;  %v3271_v17 = vstv %s2861_s19  ;;  %v3275_v21 = vstv %s2862_s20  ;;  %v125_v32 = vadd.f32 %v124_v23, %v123_v14  ;;  %s3446_s27 = sld [smem:[#allocation6 + $0x1c]]  ;;  %s2868_s28 = sld [smem:[#allocation6 + $0x4d]] }
  0x39   :  { %v3277_v22 = vstv %s2863_s21  ;;  %v3281_v26 = vstv %s2864_s22  ;;  %v139_v33 = vadd.f32 %v138_v24, %v137_v15  ;;  %v98_v41 = vrot.slane %v97_v27, 2  ;;  %s2869_s29 = sld [smem:[#allocation6 + $0x23]]  ;;  %s3127_s30 = smov 64  }
  0x3a   :  { %v3279_v25 = vmul.f32 0.0, %v444_v16  ;;  %v3283_v29 = vstv %s2865_s2  ;;  %v112_v42 = vrot.slane %v111_v28, 2  ;;  %v126_v43 = vrot.slane %v125_v32, 2  ;;  %s2870_s4 = sld [smem:[#allocation6 + $0x54]]  ;;  %s2871_s5 = sld [smem:[#allocation6 + $0x2a]] }
  0x3b   :  { %v140_v44 = vrot.slane %v139_v33, 2  ;;  %v152_v45 = vrot.slane %v151_v34, 4  ;;  %v165_v46 = vsel %vm94_vm0, %v3285_v30, 0.0  ;;  %v179_v47 = vsel %vm94_vm0, %v3287_v31, 0.0  ;;  %s469_s0 = sld [smem:[#allocation6]]  ;;  %s2860_s6 = sld [smem:[#allocation6 + $0x31]] }
  0x3c   :  { %v488_v35 = vmul.f32 %v3271_v17, %v3279_v25  ;;  %v510_v36 = vmul.f32 %v3275_v21, %v3279_v25  ;;  %v533_v37 = vmul.f32 %v3277_v22, %v3279_v25  ;;  %v555_v38 = vmul.f32 %v3281_v26, %v3279_v25  ;;  %s3128_s7 = smov 48   ;;  %s2872_s8 = sld [smem:[#allocation6 + $0x5b]] }
  0x3d   :  { %v578_v39 = vmul.f32 %v3283_v29, %v3279_v25  ;;  %v99_v48 = vadd.f32 %v98_v41, %v97_v27  ;;  %v113_v49 = vadd.f32 %v112_v42, %v111_v28  ;;  %v127_v50 = vadd.f32 %v126_v43, %v125_v32  ;;  %s2873_s9 = sld [smem:[#allocation6 + $0x1]]  ;;  %s3129_s10 = smov 32  }
  0x3e   :  { %494 = vrot.lane.b32.xlu0 %v488_v35, %s3124_s23  ;;  %516 = vrot.lane.b32.xlu1 %v510_v36, %s3124_s23  ;;  %v166_v51 = vrot.slane %v165_v46, 4  ;;  %v141_v52 = vadd.f32 %v140_v44, %v139_v33  ;;  %v153_v53 = vadd.f32 %v152_v45, %v151_v34  ;;  %v180_v54 = vrot.slane %v179_v47, 4  ;;  %s2874_s11 = sld [smem:[#allocation6 + $0x32]]  ;;  %s2875_s12 = sld [smem:[#allocation6 + $0x8]] }
  0x3f   :  { %v193_v55 = vsel %vm94_vm0, %v3301_v40, 0.0  ;;  %v100_v56 = vrot.slane %v99_v48, 1  ;;  %v114_v57 = vrot.slane %v113_v49, 1  ;;  %v128_v58 = vrot.slane %v127_v50, 1  ;;  %s3130_s13 = smov 127   ;;  %s2876_s14 = sld [smem:[#allocation6 + $0x39]] }
  0x40   :  { %v167_v59 = vadd.f32 %v166_v51, %v165_v46  ;;  %v142_v60 = vrot.slane %v141_v52, 1  ;;  %v154_v61 = vrot.slane %v153_v53, 2  ;;  %v181_v62 = vadd.f32 %v180_v54, %v179_v47  ;;  %s2877_s15 = sld [smem:[#allocation6 + $0xf]]  ;;  %s3131_s1 = smov 111  }
  0x41   :  { %v194_v63 = vrot.slane %v193_v55, 4  ;;  %v101_v0 = vadd.f32 %v100_v56, %v99_v48  ;;  %v115_v12 = vadd.f32 %v114_v57, %v113_v49  ;;  %v129_v13 = vadd.f32 %v128_v58, %v127_v50  ;;  %s2878_s16 = sld [smem:[#allocation6 + $0x40]]  ;;  %s2879_s17 = sld [smem:[#allocation6 + $0x16]] }
  0x42   :  { %539 = vrot.lane.b32.xlu0 %v533_v37, %s3125_s24  ;;  %561 = vrot.lane.b32.xlu1 %v555_v38, %s3125_s24  ;;  %v168_v14 = vrot.slane %v167_v59, 2  ;;  %v143_v15 = vadd.f32 %v142_v60, %v141_v52  ;;  %v155_v16 = vadd.f32 %v154_v61, %v153_v53  ;;  %v182_v19 = vrot.slane %v181_v62, 2  ;;  %s3132_s18 = smov 95   ;;  %s2880_s19 = sld [smem:[#allocation6 + $0x47]] }
  0x43   :  { %v195_v20 = vadd.f32 %v194_v63, %v193_v55  ;;  %v224_v24 = vsel %vm223_vm1, %v115_v12, %v101_v0  ;;  %vm227_vm3 = vcmask 1043459   ;;  %vm229_vm4 = vcmask 1044484   ;;  %s2881_s20 = sld [smem:[#allocation6 + $0x1d]]  ;;  %s3133_s21 = smov 79  }
  0x44   :  { %v169_v23 = vadd.f32 %v168_v14, %v167_v59  ;;  %v156_v27 = vrot.slane %v155_v16, 1  ;;  %v183_v28 = vadd.f32 %v182_v19, %v181_v62  ;;  %v226_v33 = vsel %vm225_vm2, %v129_v13, %v224_v24  ;;  %s2882_s22 = sld [smem:[#allocation6 + $0x4e]]  ;;  %s2883_s2 = sld [smem:[#allocation6 + $0x24]] }
  0x45   :  { %v196_v32 = vrot.slane %v195_v20, 2  ;;  %v228_v35 = vsel %vm227_vm3, %v143_v15, %v226_v33  ;;  %vm231_vm5 = vcmask 1045509   ;;  %vm233_vm6 = vcmask 1046534  }
  0x46   :  { %584 = vrot.lane.b32.xlu0 %v578_v39, %s3126_s25  ;;  %v170_v34 = vrot.slane %v169_v23, 1  ;;  %v157_v36 = vadd.f32 %v156_v27, %v155_v16  ;;  %v184_v37 = vrot.slane %v183_v28, 1  ;;  %vm235_vm7 = vcmask 1047559  }
  0x47   :  { %v197_v38 = vadd.f32 %v196_v32, %v195_v20  ;;  %v3318_v42 = vsub.s32 1, %v3232_v2  ;;  %v252_v39 = vsel %vm94_vm0, %v3230_v1, -inf  ;;  %v266_v43 = vsel %vm94_vm0, %v3234_v3, -inf }
  0x48   :  { %v171_v41 = vadd.f32 %v170_v34, %v169_v23  ;;  %v185_v44 = vadd.f32 %v184_v37, %v183_v28  ;;  %v230_v46 = vsel %vm229_vm4, %v157_v36, %v228_v35  ;;  %v253_v47 = vrot.slane %v252_v39, 4 }
  0x49   :  { %5485 = vst [vmem:[#allocation18_spill] sm:$0xff] %v3318_v42  ;;  %v198_v45 = vrot.slane %v197_v38, 1  ;;  %v3328_v49 = vrot.slane %v3240_v6, %v3318_v42  ;;  %v267_v50 = vrot.slane %v266_v43, 4  ;;  %v280_v51 = vsel %vm94_vm0, %v3236_v4, -inf }
  0x4a   :  { %v232_v48 = vsel %vm231_vm5, %v171_v41, %v230_v46  ;;  %v254_v53 = vmax.f32 %v252_v39, %v253_v47  ;;  %v281_v3 = vrot.slane %v280_v51, 4  ;;  %v294_v55 = vsel %vm94_vm0, %v3238_v5, -inf }
  0x4b   :  { %v199_v52 = vadd.f32 %v198_v45, %v197_v38  ;;  %v234_v1 = vsel %vm233_vm6, %v185_v44, %v232_v48  ;;  %v268_v54 = vmax.f32 %v266_v43, %v267_v50  ;;  %v308_v56 = vsel %vm94_vm0, %v3273_v18, -inf }
  0x4c   :  { %v322_v57 = vsel %vm94_vm0, %v3285_v30, -inf  ;;  %v255_v59 = vrot.slane %v254_v53, 2  ;;  %v282_v4 = vmax.f32 %v280_v51, %v281_v3  ;;  %v295_v60 = vrot.slane %v294_v55, 4 }
  0x4d   :  { %v3340_v58 = vsel %vm235_vm7, %v199_v52, %v234_v1  ;;  %v269_v62 = vrot.slane %v268_v54, 2  ;;  %v309_v63 = vrot.slane %v308_v56, 4  ;;  %v323_v0 = vrot.slane %v322_v57, 4 }
  0x4e   :  { %5486 = vst [vmem:[#allocation19_spill] sm:$0xff] %v3340_v58  ;;  %v3344_v61 = vmul.f32 %v3328_v49, %v3340_v58  ;;  %v256_v5 = vmax.f32 %v254_v53, %v255_v59  ;;  %v283_v12 = vrot.slane %v282_v4, 2  ;;  %v296_v13 = vmax.f32 %v294_v55, %v295_v60 }
  0x4f   :  { %v336_v14 = vsel %vm94_vm0, %v3287_v31, -inf  ;;  %v270_v20 = vmax.f32 %v268_v54, %v269_v62  ;;  %v310_v28 = vmax.f32 %v308_v56, %v309_v63  ;;  %v324_v33 = vmax.f32 %v322_v57, %v323_v0 }
  0x50   :  { %v534_v15 = vmul.f32 %v3277_v22, %v3344_v61  ;;  %v489_v16 = vmul.f32 %v3271_v17, %v3344_v61  ;;  %v579_v19 = vmul.f32 %v3283_v29, %v3344_v61  ;;  %v257_v23 = vrot.slane %v256_v5, 1 }
  0x51   :  { %v284_v24 = vmax.f32 %v282_v4, %v283_v12  ;;  %v297_v27 = vrot.slane %v296_v13, 2  ;;  %v271_v32 = vrot.slane %v270_v20, 1  ;;  %v337_v34 = vrot.slane %v336_v14, 4 }
  0x52   :  { %541 = vrot.lane.b32.xlu1 %v534_v15, %s3125_s24  ;;  %496 = vrot.lane.b32.xlu0 %v489_v16, %s3124_s23  ;;  %v350_v35 = vsel %vm94_vm0, %v3301_v40, -inf  ;;  %v258_v36 = vmax.f32 %v256_v5, %v257_v23  ;;  %v311_v41 = vrot.slane %v310_v28, 2  ;;  %v325_v43 = vrot.slane %v324_v33, 2 }
  0x53   :  { %v285_v37 = vrot.slane %v284_v24, 1  ;;  %v298_v38 = vmax.f32 %v296_v13, %v297_v27  ;;  %v272_v39 = vmax.f32 %v270_v20, %v271_v32  ;;  %v338_v44 = vmax.f32 %v336_v14, %v337_v34 }
  0x54   :  { %v351_v45 = vrot.slane %v350_v35, 4  ;;  %v312_v48 = vmax.f32 %v310_v28, %v311_v41  ;;  %v3360_v50 = vcombine.high %v3273_v18, %v3273_v18  ;;  %v326_v51 = vmax.f32 %v324_v33, %v325_v43 }
  0x55   :  { %v286_v46 = vmax.f32 %v284_v24, %v285_v37  ;;  %v299_v47 = vrot.slane %v298_v38, 1  ;;  %v339_v52 = vrot.slane %v338_v44, 2  ;;  %v380_v53 = vsel %vm223_vm1, %v272_v39, %v258_v36 }
  0x56   :  { %586 = vrot.lane.b32.xlu1 %v579_v19, %s3126_s25  ;;  %v352_v1 = vmax.f32 %v350_v35, %v351_v45  ;;  %v313_v54 = vrot.slane %v312_v48, 1  ;;  %v3367_v56 = vcombine.high %v3285_v30, %v3285_v30  ;;  %v327_v57 = vrot.slane %v326_v51, 1 }
  0x57   :  { %v300_v3 = vmax.f32 %v298_v38, %v299_v47  ;;  %v381_v55 = vsel %vm225_vm2, %v286_v46, %v380_v53  ;;  %v340_v59 = vmax.f32 %v338_v44, %v339_v52  ;;  %v3371_v18 = vcombine.high %v3287_v31, %v3287_v31 }
  0x58   :  { %v353_v4 = vrot.slane %v352_v1, 2  ;;  %v314_v60 = vmax.f32 %v312_v48, %v313_v54  ;;  %v3376_v63 = vcombine.high %v3301_v40, %v3301_v40  ;;  %v102_v0 = vsel %vm94_vm0, %v3244_v7, 0.0 }
  0x59   :  { %v382_v62 = vsel %vm227_vm3, %v300_v3, %v381_v55  ;;  %v328_v5 = vmax.f32 %v326_v51, %v327_v57  ;;  %v341_v30 = vrot.slane %v340_v59, 1  ;;  %v103_v13 = vrot.slane %v102_v0, 4 }
  0x5a   :  { %v354_v12 = vmax.f32 %v352_v1, %v353_v4  ;;  %v383_v14 = vsel %vm229_vm4, %v314_v60, %v382_v62  ;;  %v116_v31 = vsel %vm94_vm0, %v3248_v8, 0.0  ;;  %v130_v15 = vsel %vm94_vm0, %v3255_v10, 0.0 }
  0x5b   :  { %v144_v16 = vsel %vm94_vm0, %v3259_v11, 0.0  ;;  %v342_v40 = vmax.f32 %v340_v59, %v341_v30  ;;  %v384_v20 = vsel %vm231_vm5, %v328_v5, %v383_v14  ;;  %v104_v23 = vadd.f32 %v103_v13, %v102_v0 }
  0x5c   :  { %v355_v19 = vrot.slane %v354_v12, 1  ;;  %v117_v24 = vrot.slane %v116_v31, 4  ;;  %v131_v27 = vrot.slane %v130_v15, 4  ;;  %v145_v28 = vrot.slane %v144_v16, 4 }
  0x5d   :  { %v158_v32 = vsel %vm94_vm0, %v3360_v50, 0.0  ;;  %v385_v34 = vsel %vm233_vm6, %v342_v40, %v384_v20  ;;  %v105_v35 = vrot.slane %v104_v23, 2  ;;  %v172_v39 = vsel %vm94_vm0, %v3367_v56, 0.0 }
  0x5e   :  { %v356_v33 = vmax.f32 %v354_v12, %v355_v19  ;;  %v159_v36 = vrot.slane %v158_v32, 4  ;;  %v118_v37 = vadd.f32 %v117_v24, %v116_v31  ;;  %v132_v38 = vadd.f32 %v131_v27, %v130_v15 }
  0x5f   :  { %v146_v41 = vadd.f32 %v145_v28, %v144_v16  ;;  %v106_v44 = vadd.f32 %v105_v35, %v104_v23  ;;  %v173_v46 = vrot.slane %v172_v39, 4  ;;  %v186_v54 = vsel %vm94_vm0, %v3371_v18, 0.0 }
  0x60   :  { %v3394_v43 = vsel %vm235_vm7, %v356_v33, %v385_v34  ;;  %v160_v45 = vadd.f32 %v159_v36, %v158_v32  ;;  %v119_v48 = vrot.slane %v118_v37, 2  ;;  %v133_v51 = vrot.slane %v132_v38, 2 }
  0x61   :  { %5487 = vst [vmem:[#allocation20_spill] sm:$0xff] %v3394_v43  ;;  %v3398_v47 = vmul.f32 %v3328_v49, %v3394_v43  ;;  %v147_v52 = vrot.slane %v146_v41, 2  ;;  %v107_v1 = vrot.slane %v106_v44, 1  ;;  %v174_v3 = vadd.f32 %v173_v46, %v172_v39 }
  0x62   :  { %v161_v53 = vrot.slane %v160_v45, 2  ;;  %v120_v59 = vadd.f32 %v119_v48, %v118_v37  ;;  %v134_v4 = vadd.f32 %v133_v51, %v132_v38  ;;  %v187_v12 = vrot.slane %v186_v54, 4 }
  0x63   :  { %v511_v55 = vmul.f32 %v3275_v21, %v3398_v47  ;;  %v556_v57 = vmul.f32 %v3281_v26, %v3398_v47  ;;  %v108_v60 = vadd.f32 %v107_v1, %v106_v44  ;;  %v148_v49 = vadd.f32 %v147_v52, %v146_v41 }
  0x64   :  { %v162_v62 = vadd.f32 %v161_v53, %v160_v45  ;;  %v175_v0 = vrot.slane %v174_v3, 2  ;;  %v121_v5 = vrot.slane %v120_v59, 1  ;;  %v135_v30 = vrot.slane %v134_v4, 1 }
  0x65   :  { %518 = vrot.lane.b32.xlu0 %v511_v55, %s3124_s23  ;;  %v200_v13 = vsel %vm94_vm0, %v3376_v63, 0.0  ;;  %v149_v14 = vrot.slane %v148_v49, 1  ;;  %v188_v20 = vadd.f32 %v187_v12, %v186_v54  ;;  %v3410_v23 = vsub.s32 2, %v3232_v2 }
  0x66   :  { %v163_v31 = vrot.slane %v162_v62, 1  ;;  %v176_v15 = vadd.f32 %v175_v0, %v174_v3  ;;  %v201_v16 = vrot.slane %v200_v13, 4  ;;  %v122_v40 = vadd.f32 %v121_v5, %v120_v59 }
  0x67   :  { %v136_v19 = vadd.f32 %v135_v30, %v134_v4  ;;  %v150_v24 = vadd.f32 %v149_v14, %v148_v49  ;;  %v189_v33 = vrot.slane %v188_v20, 2  ;;  %v3416_v35 = vrot.slane %v3240_v6, %v3410_v23 }
  0x68   :  { %v164_v27 = vadd.f32 %v163_v31, %v162_v62  ;;  %v177_v28 = vrot.slane %v176_v15, 1  ;;  %v202_v32 = vadd.f32 %v201_v16, %v200_v13  ;;  %v237_v34 = vsel %vm223_vm1, %v122_v40, %v108_v60 }
  0x69   :  { %563 = vrot.lane.b32.xlu0 %v556_v57, %s3125_s24  ;;  %v259_v36 = vsel %vm94_vm0, %v3244_v7, -inf  ;;  %v238_v41 = vsel %vm225_vm2, %v136_v19, %v237_v34  ;;  %v190_v44 = vadd.f32 %v189_v33, %v188_v20  ;;  %v273_v46 = vsel %vm94_vm0, %v3248_v8, -inf }
  0x6a   :  { %v178_v37 = vadd.f32 %v177_v28, %v176_v15  ;;  %v203_v38 = vrot.slane %v202_v32, 2  ;;  %v260_v39 = vrot.slane %v259_v36, 4  ;;  %v239_v45 = vsel %vm227_vm3, %v150_v24, %v238_v41 }
  0x6b   :  { %v287_v48 = vsel %vm94_vm0, %v3255_v10, -inf  ;;  %v240_v52 = vsel %vm229_vm4, %v164_v27, %v239_v45  ;;  %v274_v53 = vrot.slane %v273_v46, 4  ;;  %v191_v7 = vrot.slane %v190_v44, 1 }
  0x6c   :  { %v204_v51 = vadd.f32 %v203_v38, %v202_v32  ;;  %v261_v1 = vmax.f32 %v259_v36, %v260_v39  ;;  %v241_v3 = vsel %vm231_vm5, %v178_v37, %v240_v52  ;;  %v288_v54 = vrot.slane %v287_v48, 4 }
  0x6d   :  { %v301_v55 = vsel %vm94_vm0, %v3259_v11, -inf  ;;  %v275_v4 = vmax.f32 %v273_v46, %v274_v53  ;;  %v192_v8 = vadd.f32 %v191_v7, %v190_v44  ;;  %v315_v10 = vsel %vm94_vm0, %v3360_v50, -inf }
  0x6e   :  { %v205_v57 = vrot.slane %v204_v51, 1  ;;  %v262_v59 = vrot.slane %v261_v1, 2  ;;  %v302_v60 = vrot.slane %v301_v55, 4  ;;  %v289_v49 = vmax.f32 %v287_v48, %v288_v54 }
  0x6f   :  { %v329_v62 = vsel %vm94_vm0, %v3367_v56, -inf  ;;  %v276_v30 = vrot.slane %v275_v4, 2  ;;  %v242_v13 = vsel %vm233_vm6, %v192_v8, %v241_v3  ;;  %v316_v11 = vrot.slane %v315_v10, 4 }
  0x70   :  { %v206_v0 = vadd.f32 %v205_v57, %v204_v51  ;;  %v263_v5 = vmax.f32 %v261_v1, %v262_v59  ;;  %v303_v12 = vmax.f32 %v301_v55, %v302_v60  ;;  %v290_v14 = vrot.slane %v289_v49, 2 }
  0x71   :  { %v330_v31 = vrot.slane %v329_v62, 4  ;;  %v277_v40 = vmax.f32 %v275_v4, %v276_v30  ;;  %v317_v20 = vmax.f32 %v315_v10, %v316_v11  ;;  %v343_v33 = vsel %vm94_vm0, %v3371_v18, -inf }
  0x72   :  { %v3438_v15 = vsel %vm235_vm7, %v206_v0, %v242_v13  ;;  %v264_v16 = vrot.slane %v263_v5, 1  ;;  %v304_v50 = vrot.slane %v303_v12, 2  ;;  %v291_v19 = vmax.f32 %v289_v49, %v290_v14 }
  0x73   :  { %5488 = vst [vmem:[#allocation21_spill] sm:$0xff] %v3438_v15  ;;  %v3442_v56 = vmul.f32 %v3416_v35, %v3438_v15  ;;  %v331_v24 = vmax.f32 %v329_v62, %v330_v31  ;;  %v278_v28 = vrot.slane %v277_v40, 1  ;;  %v318_v38 = vrot.slane %v317_v20, 2 }
  0x74   :  { %v265_v27 = vmax.f32 %v263_v5, %v264_v16  ;;  %v305_v32 = vmax.f32 %v303_v12, %v304_v50  ;;  %v292_v37 = vrot.slane %v291_v19, 1  ;;  %v344_v45 = vrot.slane %v343_v33, 4 }
  0x75   :  { %v490_v34 = vmul.f32 %v3271_v17, %v3442_v56  ;;  %v535_v36 = vmul.f32 %v3277_v22, %v3442_v56  ;;  %v279_v41 = vmax.f32 %v277_v40, %v278_v28  ;;  %v332_v44 = vrot.slane %v331_v24, 2 }
  0x76   :  { %v306_v39 = vrot.slane %v305_v32, 1  ;;  %v293_v18 = vmax.f32 %v291_v19, %v292_v37  ;;  %v319_v46 = vmax.f32 %v317_v20, %v318_v38  ;;  %v357_v48 = vsel %vm94_vm0, %v3376_v63, -inf }
  0x77   :  { %498 = vrot.lane.b32.xlu1 %v490_v34, %s3124_s23  ;;  %543 = vrot.lane.b32.xlu0 %v535_v36, %s3125_s24  ;;  %v580_v17 = vmul.f32 %v3283_v29, %v3442_v56  ;;  %v333_v51 = vmax.f32 %v331_v24, %v332_v44  ;;  %v345_v52 = vmax.f32 %v343_v33, %v344_v45  ;;  %v358_v1 = vrot.slane %v357_v48, 4 }
  0x78   :  { %v307_v22 = vmax.f32 %v305_v32, %v306_v39  ;;  %v320_v53 = vrot.slane %v319_v46, 1  ;;  %v387_v7 = vsel %vm223_vm1, %v279_v41, %v265_v27  ;;  %v599_v3 = vstv %s3435_s26  ;;  %s3135_s26 = smov 47  }
  0x79   :  { %v334_v54 = vrot.slane %v333_v51, 1  ;;  %v346_v55 = vrot.slane %v345_v52, 2  ;;  %v359_v57 = vmax.f32 %v357_v48, %v358_v1  ;;  %v388_v59 = vsel %vm225_vm2, %v293_v18, %v387_v7 }
  0x7a   :  { %v321_v4 = vmax.f32 %v319_v46, %v320_v53  ;;  %v389_v63 = vsel %vm227_vm3, %v307_v22, %v388_v59  ;;  %v601_v29 = vmul.f32 %v599_v3, %v3398_v47  ;;  %v622_v10 = vstv %s3446_s27  ;;  %v3507_v46 = vld [vmem:[#allocation10 + $0x1] ss:$8 sm:$0xf]  ;;  %s2886_s27 = sld [smem:[#allocation6 + $0x5c]] }
  0x7b   :  { %588 = vrot.lane.b32.xlu0 %v580_v17, %s3126_s25  ;;  %v335_v60 = vmax.f32 %v333_v51, %v334_v54  ;;  %v347_v8 = vmax.f32 %v345_v52, %v346_v55  ;;  %v360_v49 = vrot.slane %v359_v57, 2  ;;  %v3467_v0 = vsub.s32 3, %v3232_v2 }
  0x7c   :  { %v390_v62 = vsel %vm229_vm4, %v321_v4, %v389_v63  ;;  %v623_v13 = vmul.f32 %v622_v10, %v3344_v61  ;;  %v644_v20 = vstv %s2868_s28  ;;  %v667_v28 = vstv %s2869_s29  ;;  %s2887_s28 = sld [smem:[#allocation6 + $0x2]]  ;;  %s3136_s29 = smov 31  }
  0x7d   :  { %5489 = vst [vmem:[#allocation22_spill] sm:$0xff] %v3467_v0  ;;  %v348_v5 = vrot.slane %v347_v8, 1  ;;  %v361_v30 = vmax.f32 %v359_v57, %v360_v49  ;;  %v391_v12 = vsel %vm231_vm5, %v335_v60, %v390_v62  ;;  %v456_v14 = vrot.slane %v3240_v6, %v3467_v0 }
  0x7e   :  { %v668_v33 = vmul.f32 %v667_v28, %v3344_v61  ;;  %v689_v34 = vstv %s2870_s4  ;;  %v712_v37 = vstv %s2871_s5  ;;  %v624_v38 = vmul.f32 %v622_v10, %v3442_v56  ;;  %s2889_s4 = sld [smem:[#allocation6 + $0x9]]  ;;  %s3137_s5 = smov 126  }
  0x7f   :  { %608 = vrot.lane.b32.xlu0 %v601_v29, %s3126_s25  ;;  %v349_v11 = vmax.f32 %v347_v8, %v348_v5  ;;  %v362_v31 = vrot.slane %v361_v30, 1  ;;  %v3474_v16 = vmul.f32 0.0, %v456_v14  ;;  %v3498_v41 = vstv %s469_s0  ;;  %s2890_s0 = sld [smem:[#allocation6 + $0x3a]] }
  0x80   :  { %v3500_v39 = vstv %s2860_s6  ;;  %v474_v45 = vmul.f32 %v3498_v41, %v3442_v56  ;;  %v713_v18 = vmul.f32 %v712_v37, %v3344_v61  ;;  %v645_v17 = vmul.f32 %v644_v20, %v3398_v47  ;;  %s2891_s6 = sld [smem:[#allocation6 + $0x10]] }
  0x81   :  { %v363_v40 = vmax.f32 %v361_v30, %v362_v31  ;;  %v392_v2 = vsel %vm233_vm6, %v349_v11, %v391_v12  ;;  %v625_v50 = vmul.f32 %v622_v10, %v3474_v16  ;;  %v715_v22 = vmul.f32 %v712_v37, %v3474_v16 }
  0x82   :  { %v759_v51 = vrot.slane %v3507_v46, %v3251_v9  ;;  %v734_v52 = vstv %s2872_s8  ;;  %v647_v1 = vmul.f32 %v644_v20, %v3474_v16  ;;  %v786_v54 = vstv %s2873_s9  ;;  %s2892_s8 = sld [smem:[#allocation6 + $0x41]]  ;;  %s2893_s9 = sld [smem:[#allocation6 + $0x17]] }
  0x83   :  { %629 = vrot.lane.b32.xlu0 %v623_v13, %s3127_s30  ;;  %v3480_v19 = vsel %vm235_vm7, %v363_v40, %v392_v2  ;;  %v669_v55 = vmul.f32 %v667_v28, %v3442_v56  ;;  %v690_v4 = vmul.f32 %v689_v34, %v3398_v47  ;;  %v763_v63 = vrot.slane %v3507_v46, %v3318_v42 }
  0x84   :  { %5490 = vst [vmem:[#allocation23_spill] sm:$0xff] %v3480_v19  ;;  %v467_v6 = vmul.f32 %v3416_v35, %v3480_v19  ;;  %v600_v35 = vmul.f32 %v599_v3, %v3279_v25  ;;  %v3520_v7 = vmul.f32 0.0, %v759_v51  ;;  %v808_v8 = vstv %s2874_s11  ;;  %s2894_s11 = sld [smem:[#allocation6 + $0x48]] }
  0x85   :  { %v3538_v60 = vmul.f32 %v763_v63, %v3394_v43  ;;  %v692_v49 = vmul.f32 %v689_v34, %v3474_v16  ;;  %v831_v62 = vstv %s2875_s12  ;;  %v714_v5 = vmul.f32 %v712_v37, %v3442_v56  ;;  %s2895_s12 = sld [smem:[#allocation6 + $0x1e]] }
  0x86   :  { %v512_v24 = vmul.f32 %v3275_v21, %v467_v6  ;;  %v646_v27 = vmul.f32 %v644_v20, %v467_v6  ;;  %v557_v32 = vmul.f32 %v3281_v26, %v467_v6  ;;  %v670_v21 = vmul.f32 %v667_v28, %v3474_v16 }
  0x87   :  { %633 = vrot.lane.b32.xlu0 %v625_v50, %s3127_s30  ;;  %v602_v26 = vmul.f32 %v599_v3, %v467_v6  ;;  %v691_v36 = vmul.f32 %v689_v34, %v467_v6  ;;  %v481_v44 = vmul.f32 %v3500_v39, %v467_v6  ;;  %v736_v53 = vmul.f32 %v734_v52, %v467_v6 }
  0x88   :  { %520 = vrot.lane.b32.xlu1 %v512_v24, %s3124_s23  ;;  %v767_v3 = vrot.slane %v3507_v46, %v3410_v23  ;;  %v787_v57 = vmul.f32 %v786_v54, %v3520_v7  ;;  %v810_v10 = vmul.f32 %v808_v8, %v3538_v60  ;;  %v832_v30 = vmul.f32 %v831_v62, %v3520_v7  ;;  %s3134_s23 = smov 63  }
  0x89   :  { %v3509_v48 = vadd.f32 %v481_v44, %v474_v45  ;;  %v735_v12 = vmul.f32 %v734_v52, %v3398_v47  ;;  %v853_v14 = vstv %s2876_s14  ;;  %v737_v11 = vmul.f32 %v734_v52, %v3474_v16  ;;  %s2896_s14 = sld [smem:[#allocation6 + $0x4f]] }
  0x8a   :  { %v3529_v59 = vmul.f32 %v767_v3, %v3438_v15  ;;  %v3555_v56 = vmul.f32 %v763_v63, %v3340_v58  ;;  %v855_v31 = vmul.f32 %v853_v14, %v3538_v60  ;;  %v876_v40 = vstv %s2877_s15  ;;  %s2897_s15 = sld [smem:[#allocation6 + $0x25]] }
  0x8b   :  { %653 = vrot.lane.b32.xlu0 %v646_v27, %s3127_s30  ;;  %v877_v50 = vmul.f32 %v876_v40, %v3520_v7  ;;  %v809_v16 = vmul.f32 %v808_v8, %v3520_v7  ;;  %v3566_v20 = vmul.f32 %v767_v3, %v3480_v19  ;;  %v898_v24 = vstv %s2878_s16  ;;  %s2898_s16 = sld [smem:[#allocation6 + $0x56]] }
  0x8c   :  { %565 = vrot.lane.b32.xlu1 %v557_v32, %s3125_s24  ;;  %v789_v29 = vmul.f32 %v786_v54, %v3529_v59  ;;  %v834_v13 = vmul.f32 %v831_v62, %v3529_v59  ;;  %v788_v2 = vmul.f32 %v786_v54, %v3555_v56  ;;  %v879_v6 = vmul.f32 %v876_v40, %v3529_v59  ;;  %s2884_s24 = sld [smem:[#allocation6 + $0x55]] }
  0x8d   :  { %v811_v27 = vmul.f32 %v808_v8, %v3566_v20  ;;  %v900_v28 = vmul.f32 %v898_v24, %v3538_v60  ;;  %v921_v32 = vstv %s2879_s17  ;;  %v854_v34 = vmul.f32 %v853_v14, %v3520_v7  ;;  %s2899_s17 = sld [smem:[#allocation6 + $0x2c]] }
  0x8e   :  { %v943_v37 = vstv %s2880_s19  ;;  %v771_v45 = vrot.slane %v3507_v46, %v3467_v0  ;;  %v988_v3 = vstv %s2882_s22  ;;  %v901_v54 = vmul.f32 %v898_v24, %v3566_v20  ;;  %s2900_s19 = sld [smem:[#allocation6 + $0x5d]]  ;;  %s2902_s22 = sld [smem:[#allocation6 + $0x34]] }
  0x8f   :  { %674 = vrot.lane.b32.xlu0 %v668_v33, %s3128_s7  ;;  %v833_v33 = vmul.f32 %v831_v62, %v3555_v56  ;;  %v945_v44 = vmul.f32 %v943_v37, %v3538_v60  ;;  %vm500_vm8 = vcmask 916480   ;;  %vm545_vm9 = vcmask 785408  }
  0x90   :  { %606 = vrot.lane.b32.xlu1 %v600_v35, %s3126_s25  ;;  %v3598_v52 = vmul.f32 0.0, %v771_v45  ;;  %vm590_vm10 = vcmask 654336   ;;  %vm635_vm11 = vcmask 523264   ;;  %vm680_vm12 = vcmask 392192  }
  0x91   :  { %vm725_vm13 = vcmask 261120   ;;  %vm799_vm14 = vcmask 1039360   ;;  %vm844_vm15 = vcmask 908288   ;;  %vm889_vm0 = vcmask 777216  }
  0x92   :  { %vm934_vm1 = vcmask 646144   ;;  %vm979_vm2 = vcmask 515072   ;;  %vm1024_vm3 = vcmask 384000   ;;  %vm1069_vm4 = vcmask 252928  }
  0x93   :  { %678 = vrot.lane.b32.xlu0 %v670_v21, %s3128_s7  ;;  %v922_v21 = vmul.f32 %v921_v32, %v3520_v7  ;;  %vm1143_vm5 = vcmask 1031168   ;;  %vm1188_vm6 = vcmask 900096   ;;  %vm1233_vm7 = vcmask 769024  }
  0x94   :  { %610 = vrot.lane.b32.xlu1 %v602_v26, %s3126_s25  ;;  %v924_v26 = vmul.f32 %v921_v32, %v3529_v59  ;;  %s2885_s25 = sld [smem:[#allocation6 + $0x2b]] }
  0x97   :  { %698 = vrot.lane.b32.xlu0 %v691_v36, %s3128_s7 }
  0x98   :  { %631 = vrot.lane.b32.xlu1 %v624_v38, %s3127_s30  ;;  %v856_v38 = vmul.f32 %v853_v14, %v3566_v20 }
  0x9a   :  { %v1056_v14 = vstv %s2885_s25  ;;  %s2905_s25 = sld [smem:[#allocation6 + $0x11]] }
  0x9b   :  { %719 = vrot.lane.b32.xlu0 %v713_v18, %s3129_s10  ;;  %v966_v18 = vstv %s2881_s20  ;;  %s2901_s20 = sld [smem:[#allocation6 + $0x3]] }
  0x9c   :  { %651 = vrot.lane.b32.xlu1 %v645_v17, %s3127_s30  ;;  %v878_v17 = vmul.f32 %v876_v40, %v3555_v56  ;;  %v967_v51 = vmul.f32 %v966_v18, %v3555_v56  ;;  %v969_v46 = vmul.f32 %v966_v18, %v3598_v52  ;;  %v1057_v40 = vmul.f32 %v1056_v14, %v3555_v56 }
  0x9f   :  { %723 = vrot.lane.b32.xlu0 %v715_v22, %s3129_s10 }
  0xa0   :  { %655 = vrot.lane.b32.xlu1 %v647_v1, %s3127_s30  ;;  %v899_v1 = vmul.f32 %v898_v24, %v3520_v7  ;;  %v1059_v24 = vmul.f32 %v1056_v14, %v3598_v52  ;;  %s2888_s30 = sld [smem:[#allocation6 + $0x33]] }
  0xa3   :  { %743 = vrot.lane.b32.xlu0 %v736_v53, %s3129_s10 }
  0xa4   :  { %676 = vrot.lane.b32.xlu1 %v669_v55, %s3128_s7  ;;  %v990_v55 = vmul.f32 %v988_v3, %v3566_v20 }
  0xa7   :  { %793 = vrot.lane.b32.xlu0 %v787_v57, %s3130_s13  ;;  %v1011_v57 = vstv %s2883_s2  ;;  %s2903_s2 = sld [smem:[#allocation6 + $0xa]] }
  0xa8   :  { %696 = vrot.lane.b32.xlu1 %v690_v4, %s3128_s7  ;;  %v923_v4 = vmul.f32 %v921_v32, %v3555_v56  ;;  %v1012_v8 = vmul.f32 %v1011_v57, %v3555_v56  ;;  %v1078_v56 = vstv %s2886_s27  ;;  %s2906_s27 = sld [smem:[#allocation6 + $0x42]] }
  0xab   :  { %797 = vrot.lane.b32.xlu0 %v789_v29, %s3130_s13 }
  0xac   :  { %700 = vrot.lane.b32.xlu1 %v692_v49, %s3128_s7  ;;  %v944_v49 = vmul.f32 %v943_v37, %v3520_v7  ;;  %v968_v7 = vmul.f32 %v966_v18, %v3529_v59  ;;  %s3138_s7 = smov 110  }
  0xaf   :  { %817 = vrot.lane.b32.xlu0 %v810_v10, %s3130_s13 }
  0xb0   :  { %721 = vrot.lane.b32.xlu1 %v714_v5, %s3129_s10  ;;  %v3576_v35 = vpop.permute.xlu0 %494  ;;  %v3612_v63 = vpop.permute.xlu1 %516  ;;  %v1014_v5 = vmul.f32 %v1011_v57, %v3598_v52 }
  0xb3   :  { %838 = vrot.lane.b32.xlu0 %v832_v30, %s3131_s1  ;;  %v1033_v30 = vstv %s2884_s24  ;;  %s2904_s24 = sld [smem:[#allocation6 + $0x3b]] }
  0xb4   :  { %741 = vrot.lane.b32.xlu1 %v735_v12, %s3129_s10  ;;  %v3584_v36 = vpop.permute.xlu0 %539  ;;  %v3620_v10 = vpop.permute.xlu1 %561  ;;  %v946_v12 = vmul.f32 %v943_v37, %v3566_v20  ;;  %v1034_v18 = vmul.f32 %v1033_v30, %v3538_v60 }
  0xb7   :  { %842 = vrot.lane.b32.xlu0 %v834_v13, %s3131_s1  ;;  %v1035_v13 = vmul.f32 %v1033_v30, %v3566_v20 }
  0xb8   :  { %745 = vrot.lane.b32.xlu1 %v737_v11, %s3129_s10  ;;  %v3594_v22 = vpop.permute.xlu0 %584  ;;  %s3139_s10 = smov 94  }
  0xbb   :  { %862 = vrot.lane.b32.xlu0 %v855_v31, %s3131_s1 }
  0xbc   :  { %795 = vrot.lane.b32.xlu1 %v788_v2, %s3130_s13  ;;  %v3638_v2 = vld [vmem:[#allocation10 + $0x2] ss:$8 sm:$0xf] }
  0xbf   :  { %883 = vrot.lane.b32.xlu0 %v877_v50, %s3132_s18  ;;  %v989_v50 = vmul.f32 %v988_v3, %v3538_v60 }
  0xc0   :  { %815 = vrot.lane.b32.xlu1 %v809_v16, %s3130_s13 }
  0xc3   :  { %887 = vrot.lane.b32.xlu0 %v879_v6, %s3132_s18 }
  0xc4   :  { %819 = vrot.lane.b32.xlu1 %v811_v27, %s3130_s13  ;;  %v3604_v53 = vpop.permute.xlu0 %496  ;;  %v3632_v11 = vpop.permute.xlu1 %541  ;;  %v1103_v27 = vrot.slane %v3638_v2, %v3251_v9  ;;  %s3140_s13 = smov 78  }
  0xc7   :  { %907 = vrot.lane.b32.xlu0 %v900_v28, %s3132_s18  ;;  %v991_v28 = vmul.f32 %v988_v3, %v3598_v52 }
  0xc8   :  { %840 = vrot.lane.b32.xlu1 %v833_v33, %s3131_s1  ;;  %v3644_v6 = vpop.permute.xlu1 %586  ;;  %v1080_v33 = vmul.f32 %v1078_v56, %v3566_v20 }
  0xcb   :  { %928 = vrot.lane.b32.xlu0 %v922_v21, %s3133_s21  ;;  %v3656_v21 = vmul.f32 0.0, %v1103_v27 }
  0xcc   :  { %860 = vrot.lane.b32.xlu1 %v854_v34, %s3131_s1  ;;  %v1111_v34 = vrot.slane %v3638_v2, %v3410_v23 }
  0xce   :  { %v3669_v20 = vmul.f32 %v1111_v34, %v3438_v15 }
  0xcf   :  { %932 = vrot.lane.b32.xlu0 %v924_v26, %s3133_s21  ;;  %v1130_v26 = vstv %s2887_s28  ;;  %s3921_s28 = sld [smem:[#allocation6 + $0x18]] }
  0xd0   :  { %864 = vrot.lane.b32.xlu1 %v856_v38, %s3131_s1  ;;  %v1013_v38 = vmul.f32 %v1011_v57, %v3529_v59  ;;  %v1131_v45 = vmul.f32 %v1130_v26, %v3656_v21  ;;  %s3141_s1 = smov 62  }
  0xd3   :  { %952 = vrot.lane.b32.xlu0 %v945_v44, %s3133_s21 }
  0xd4   :  { %885 = vrot.lane.b32.xlu1 %v878_v17, %s3132_s18 }
  0xd7   :  { %973 = vrot.lane.b32.xlu0 %v967_v51, %s3134_s23  ;;  %v3614_v29 = vpop.permute.xlu0 %518  ;;  %v1107_v51 = vrot.slane %v3638_v2, %v3318_v42 }
  0xd8   :  { %905 = vrot.lane.b32.xlu1 %v899_v1, %s3132_s18 }
  0xd9   :  { %v3682_v3 = vmul.f32 %v1107_v51, %v3394_v43  ;;  %v3711_v27 = vmul.f32 %v1107_v51, %v3340_v58 }
  0xdb   :  { %977 = vrot.lane.b32.xlu0 %v969_v46, %s3134_s23  ;;  %v3623_v62 = vpop.permute.xlu0 %563  ;;  %v1133_v46 = vmul.f32 %v1130_v26, %v3669_v20 }
  0xdc   :  { %909 = vrot.lane.b32.xlu1 %v901_v54, %s3132_s18  ;;  %v1152_v54 = vstv %s2888_s30  ;;  %s3142_s18 = smov 46   ;;  %s3934_s30 = sld [smem:[#allocation6 + $0x49]] }
  0xdd   :  { %v1153_v51 = vmul.f32 %v1152_v54, %v3656_v21 }
  0xdf   :  { %997 = vrot.lane.b32.xlu0 %v990_v55, %s3134_s23  ;;  %v1036_v55 = vmul.f32 %v1033_v30, %v3598_v52 }
  0xe0   :  { %930 = vrot.lane.b32.xlu1 %v923_v4, %s3133_s21 }
  0xe3   :  { %1018 = vrot.lane.b32.xlu0 %v1012_v8, %s3135_s26  ;;  %v1154_v8 = vmul.f32 %v1152_v54, %v3682_v3 }
  0xe4   :  { %950 = vrot.lane.b32.xlu1 %v944_v49, %s3133_s21  ;;  %v1175_v49 = vstv %s2889_s4  ;;  %s2909_s4 = sld [smem:[#allocation6 + $0x1f]] }
  0xe5   :  { %v1176_v30 = vmul.f32 %v1175_v49, %v3656_v21 }
  0xe7   :  { %1022 = vrot.lane.b32.xlu0 %v1014_v5, %s3135_s26  ;;  %v1058_v5 = vmul.f32 %v1056_v14, %v3529_v59  ;;  %v1178_v59 = vmul.f32 %v1175_v49, %v3669_v20  ;;  %v1197_v14 = vstv %s2890_s0  ;;  %s2910_s0 = sld [smem:[#allocation6 + $0x50]] }
  0xe8   :  { %954 = vrot.lane.b32.xlu1 %v946_v12, %s3133_s21  ;;  %s3143_s21 = smov 30  }
  0xe9   :  { %v3634_v31 = vpop.permute.xlu0 %543  ;;  %v3661_v37 = vpop.permute.xlu1 %498 }
  0xeb   :  { %1042 = vrot.lane.b32.xlu0 %v1035_v13, %s3135_s26 }
  0xec   :  { %975 = vrot.lane.b32.xlu1 %v968_v7, %s3134_s23  ;;  %v1079_v7 = vmul.f32 %v1078_v56, %v3538_v60 }
  0xed   :  { %v3642_v16 = vpop.permute.xlu0 %588 }
  0xef   :  { %1063 = vrot.lane.b32.xlu0 %v1057_v40, %s3136_s29 }
  0xf0   :  { %995 = vrot.lane.b32.xlu1 %v989_v50, %s3134_s23 }
  0xf1   :  { %v3652_v32 = vpop.permute.xlu0 %608 }
  0xf3   :  { %1067 = vrot.lane.b32.xlu0 %v1059_v24, %s3136_s29  ;;  %v1081_v24 = vmul.f32 %v1078_v56, %v3598_v52 }
  0xf4   :  { %999 = vrot.lane.b32.xlu1 %v991_v28, %s3134_s23  ;;  %s3144_s23 = smov 125  }
  0xf5   :  { %v3664_v44 = vpop.permute.xlu0 %629 }
  0xf7   :  { %1087 = vrot.lane.b32.xlu0 %v1080_v33, %s3136_s29  ;;  %v1199_v33 = vmul.f32 %v1197_v14, %v3682_v3 }
  0xf8   :  { %1020 = vrot.lane.b32.xlu1 %v1013_v38, %s3135_s26  ;;  %v1220_v38 = vstv %s2891_s6  ;;  %s2911_s6 = sld [smem:[#allocation6 + $0x26]] }
  0xf9   :  { %v3673_v17 = vpop.permute.xlu0 %633  ;;  %v1221_v56 = vmul.f32 %v1220_v38, %v3656_v21 }
  0xfa   :  { %v3677_v1 = vpop.permute.xlu1 %520 }
  0xfb   :  { %1137 = vrot.lane.b32.xlu0 %v1131_v45, %s3137_s5  ;;  %v1132_v45 = vmul.f32 %v1130_v26, %v3711_v27  ;;  %v1223_v26 = vmul.f32 %v1220_v38, %v3669_v20 }
  0xfc   :  { %1040 = vrot.lane.b32.xlu1 %v1034_v18, %s3135_s26 }
  0xfd   :  { %v3686_v57 = vpop.permute.xlu0 %653 }
  0xfe   :  { %v3688_v4 = vpop.permute.xlu1 %565 }
  0xff   :  { %1141 = vrot.lane.b32.xlu0 %v1133_v46, %s3137_s5  ;;  %v3730_v46 = vmul.f32 %v1111_v34, %v3480_v19 }
 0x100   :  { %1044 = vrot.lane.b32.xlu1 %v1036_v55, %s3135_s26  ;;  %s3145_s26 = smov 109  }
 0x101   :  { %v3694_v12 = vpop.permute.xlu0 %674 }
 0x102   :  { %5491 = vst [vmem:[#allocation24_spill] sm:$0xff] %v3694_v12  ;;  %v3696_v13 = vpop.permute.xlu1 %606  ;;  %v1519_v12 = vstv %s2903_s2  ;;  %s2923_s2 = sld [smem:[#allocation6 + $0x20]] }
 0x103   :  { %1161 = vrot.lane.b32.xlu0 %v1154_v8, %s3137_s5 }
 0x104   :  { %1065 = vrot.lane.b32.xlu1 %v1058_v5, %s3136_s29  ;;  %v1242_v5 = vstv %s2892_s8  ;;  %s2912_s8 = sld [smem:[#allocation6 + $0x57]] }
 0x105   :  { %v3702_v40 = vpop.permute.xlu0 %678  ;;  %v1244_v34 = vmul.f32 %v1242_v5, %v3682_v3 }
 0x106   :  { %v3704_v50 = vpop.permute.xlu1 %610 }
 0x107   :  { %1182 = vrot.lane.b32.xlu0 %v1176_v30, %s3138_s7  ;;  %v1155_v30 = vmul.f32 %v1152_v54, %v3730_v46 }
 0x108   :  { %1085 = vrot.lane.b32.xlu1 %v1079_v7, %s3136_s29 }
 0x109   :  { %v3713_v28 = vpop.permute.xlu0 %698 }
 0x10a   :  { %5492 = vst [vmem:[#allocation25_spill] sm:$0xff] %v3713_v28  ;;  %v3715_v60 = vpop.permute.xlu1 %631 }
 0x10b   :  { %1186 = vrot.lane.b32.xlu0 %v1178_v59, %s3138_s7 }
 0x10c   :  { %1089 = vrot.lane.b32.xlu1 %v1081_v24, %s3136_s29  ;;  %v1265_v24 = vstv %s2893_s9  ;;  %s3146_s29 = smov 93   ;;  %s2913_s9 = sld [smem:[#allocation6 + $0x2d]] }
 0x10d   :  { %v3721_v18 = vpop.permute.xlu0 %719  ;;  %v1266_v54 = vmul.f32 %v1265_v24, %v3656_v21 }
 0x10e   :  { %5493 = vst [vmem:[#allocation26_spill] sm:$0xff] %v3721_v18  ;;  %v3723_v52 = vpop.permute.xlu1 %651 }
 0x10f   :  { %1206 = vrot.lane.b32.xlu0 %v1199_v33, %s3138_s7  ;;  %v1177_v33 = vmul.f32 %v1175_v49, %v3711_v27  ;;  %v1268_v49 = vmul.f32 %v1265_v24, %v3669_v20 }
 0x110   :  { %1139 = vrot.lane.b32.xlu1 %v1132_v45, %s3137_s5 }
 0x111   :  { %v3732_v55 = vpop.permute.xlu0 %723 }
 0x112   :  { %5494 = vst [vmem:[#allocation27_spill] sm:$0xff] %v3732_v55  ;;  %v3734_v8 = vpop.permute.xlu1 %655 }
 0x113   :  { %1227 = vrot.lane.b32.xlu0 %v1221_v56, %s3139_s10 }
 0x114   :  { %1159 = vrot.lane.b32.xlu1 %v1153_v51, %s3137_s5  ;;  %v1198_v51 = vmul.f32 %v1197_v14, %v3656_v21 }
 0x115   :  { %v3740_v7 = vpop.permute.xlu0 %743 }
 0x116   :  { %5495 = vst [vmem:[#allocation28_spill] sm:$0xff] %v3740_v7  ;;  %v3742_v59 = vpop.permute.xlu1 %676 }
 0x117   :  { %1231 = vrot.lane.b32.xlu0 %v1223_v26, %s3139_s10 }
 0x118   :  { %1163 = vrot.lane.b32.xlu1 %v1155_v30, %s3137_s5  ;;  %v1287_v30 = vstv %s2894_s11  ;;  %s3147_s5 = smov 77   ;;  %s2914_s11 = sld [smem:[#allocation6 + $0x5e]] }
 0x119   :  { %v3748_v45 = vpop.permute.xlu0 %793 }
 0x11a   :  { %5496 = vst [vmem:[#allocation29_spill] sm:$0xff] %v3748_v45  ;;  %v3750_v56 = vpop.permute.xlu1 %696 }
 0x11b   :  { %5497 = vst [vmem:[#allocation30_spill] sm:$0xff] %v3750_v56  ;;  %1251 = vrot.lane.b32.xlu0 %v1244_v34, %s3139_s10  ;;  %v1200_v34 = vmul.f32 %v1197_v14, %v3730_v46  ;;  %v1310_v56 = vstv %s2895_s12  ;;  %s2915_s12 = sld [smem:[#allocation6 + $0x4]] }
 0x11c   :  { %1184 = vrot.lane.b32.xlu1 %v1177_v33, %s3138_s7  ;;  %v1289_v33 = vmul.f32 %v1287_v30, %v3682_v3 }
 0x11d   :  { %v3756_v26 = vpop.permute.xlu0 %797 }
 0x11e   :  { %5498 = vst [vmem:[#allocation31_spill] sm:$0xff] %v3756_v26  ;;  %v3758_v18 = vpop.permute.xlu1 %700  ;;  %v1115_v26 = vrot.slane %v3638_v2, %v3467_v0  ;;  %v1243_v2 = vmul.f32 %v1242_v5, %v3656_v21 }
 0x11f   :  { %5499 = vst [vmem:[#allocation32_spill] sm:$0xff] %v3758_v18  ;;  %1272 = vrot.lane.b32.xlu0 %v1266_v54, %s3140_s13  ;;  %v1222_v54 = vmul.f32 %v1220_v38, %v3711_v27 }
 0x120   :  { %1204 = vrot.lane.b32.xlu1 %v1198_v51, %s3138_s7 }
 0x121   :  { %v3764_v45 = vpop.permute.xlu0 %817 }
 0x122   :  { %5500 = vst [vmem:[#allocation33_spill] sm:$0xff] %v3764_v45  ;;  %v3766_v7 = vpop.permute.xlu1 %721  ;;  %v1311_v45 = vmul.f32 %v1310_v56, %v3711_v27 }
 0x123   :  { %5501 = vst [vmem:[#allocation34_spill] sm:$0xff] %v3766_v7  ;;  %1276 = vrot.lane.b32.xlu0 %v1268_v49, %s3140_s13  ;;  %v3780_v49 = vmul.f32 0.0, %v1115_v26  ;;  %v1245_v26 = vmul.f32 %v1242_v5, %v3730_v46 }
 0x124   :  { %1208 = vrot.lane.b32.xlu1 %v1200_v34, %s3138_s7  ;;  %s3148_s7 = smov 61  }
 0x125   :  { %v3774_v51 = vpop.permute.xlu0 %838  ;;  %v1313_v38 = vmul.f32 %v1310_v56, %v3780_v49 }
 0x126   :  { %5502 = vst [vmem:[#allocation35_spill] sm:$0xff] %v3774_v51  ;;  %v3776_v14 = vpop.permute.xlu1 %741  ;;  %v1332_v51 = vstv %s2896_s14  ;;  %s2916_s14 = sld [smem:[#allocation6 + $0x35]] }
 0x127   :  { %5503 = vst [vmem:[#allocation36_spill] sm:$0xff] %v3776_v14  ;;  %1296 = vrot.lane.b32.xlu0 %v1289_v33, %s3140_s13 }
 0x128   :  { %1229 = vrot.lane.b32.xlu1 %v1222_v54, %s3139_s10  ;;  %v1334_v54 = vmul.f32 %v1332_v51, %v3730_v46 }
 0x129   :  { %v3784_v7 = vpop.permute.xlu0 %842 }
 0x12a   :  { %5504 = vst [vmem:[#allocation37_spill] sm:$0xff] %v3784_v7  ;;  %v3786_v34 = vpop.permute.xlu1 %745  ;;  %v1355_v7 = vstv %s2897_s15  ;;  %s2917_s15 = sld [smem:[#allocation6 + $0xb]] }
 0x12b   :  { %5505 = vst [vmem:[#allocation38_spill] sm:$0xff] %v3786_v34  ;;  %1317 = vrot.lane.b32.xlu0 %v1311_v45, %s3141_s1  ;;  %v1267_v45 = vmul.f32 %v1265_v24, %v3711_v27  ;;  %v1356_v5 = vmul.f32 %v1355_v7, %v3711_v27  ;;  %v1358_v24 = vmul.f32 %v1355_v7, %v3780_v49 }
 0x12c   :  { %1249 = vrot.lane.b32.xlu1 %v1243_v2, %s3139_s10  ;;  %v1288_v2 = vmul.f32 %v1287_v30, %v3656_v21 }
 0x12d   :  { %v3792_v33 = vpop.permute.xlu0 %862 }
 0x12e   :  { %5506 = vst [vmem:[#allocation39_spill] sm:$0xff] %v3792_v33  ;;  %v3794_v14 = vpop.permute.xlu1 %795 }
 0x12f   :  { %5507 = vst [vmem:[#allocation40_spill] sm:$0xff] %v3794_v14  ;;  %1321 = vrot.lane.b32.xlu0 %v1313_v38, %s3141_s1 }
 0x130   :  { %1253 = vrot.lane.b32.xlu1 %v1245_v26, %s3139_s10  ;;  %v1377_v26 = vstv %s2898_s16  ;;  %s3149_s10 = smov 45   ;;  %s2918_s16 = sld [smem:[#allocation6 + $0x3c]] }
 0x131   :  { %v3800_v34 = vpop.permute.xlu0 %883  ;;  %v1379_v21 = vmul.f32 %v1377_v26, %v3730_v46 }
 0x132   :  { %5508 = vst [vmem:[#allocation41_spill] sm:$0xff] %v3800_v34  ;;  %v3802_v55 = vpop.permute.xlu1 %815 }
 0x133   :  { %5509 = vst [vmem:[#allocation42_spill] sm:$0xff] %v3802_v55  ;;  %1341 = vrot.lane.b32.xlu0 %v1334_v54, %s3141_s1  ;;  %v1290_v54 = vmul.f32 %v1287_v30, %v3730_v46 }
 0x134   :  { %1274 = vrot.lane.b32.xlu1 %v1267_v45, %s3140_s13  ;;  %v1400_v45 = vstv %s2899_s17  ;;  %s2919_s17 = sld [smem:[#allocation6 + $0x12]] }
 0x135   :  { %v3808_v38 = vpop.permute.xlu0 %887  ;;  %v1401_v30 = vmul.f32 %v1400_v45, %v3711_v27  ;;  %v1422_v27 = vstv %s2900_s19  ;;  %s2920_s19 = sld [smem:[#allocation6 + $0x43]] }
 0x136   :  { %5510 = vst [vmem:[#allocation43_spill] sm:$0xff] %v3808_v38  ;;  %v3810_v33 = vpop.permute.xlu1 %819 }
 0x137   :  { %5511 = vst [vmem:[#allocation44_spill] sm:$0xff] %v3810_v33  ;;  %1362 = vrot.lane.b32.xlu0 %v1356_v5, %s3142_s18  ;;  %v1312_v5 = vmul.f32 %v1310_v56, %v3669_v20  ;;  %v1403_v56 = vmul.f32 %v1400_v45, %v3780_v49 }
 0x138   :  { %1294 = vrot.lane.b32.xlu1 %v1288_v2, %s3140_s13  ;;  %v3830_v2 = vld [vmem:[#allocation10 + $0x3] ss:$8 sm:$0xf] }
 0x139   :  { %v3816_v34 = vpop.permute.xlu0 %907 }
 0x13a   :  { %5512 = vst [vmem:[#allocation45_spill] sm:$0xff] %v3816_v34  ;;  %v3818_v55 = vpop.permute.xlu1 %840 }
 0x13b   :  { %5513 = vst [vmem:[#allocation46_spill] sm:$0xff] %v3818_v55  ;;  %1366 = vrot.lane.b32.xlu0 %v1358_v24, %s3142_s18  ;;  %v1333_v24 = vmul.f32 %v1332_v51, %v3682_v3  ;;  %v1474_v55 = vstv %s2901_s20  ;;  %s2921_s20 = sld [smem:[#allocation6 + $0x19]] }
 0x13c   :  { %1298 = vrot.lane.b32.xlu1 %v1290_v54, %s3140_s13  ;;  %s3150_s13 = smov 29  }
 0x13d   :  { %v3824_v38 = vpop.permute.xlu0 %928 }
 0x13e   :  { %5514 = vst [vmem:[#allocation47_spill] sm:$0xff] %v3824_v38  ;;  %v3826_v33 = vpop.permute.xlu1 %860  ;;  %v1335_v38 = vmul.f32 %v1332_v51, %v3780_v49 }
 0x13f   :  { %5515 = vst [vmem:[#allocation48_spill] sm:$0xff] %v3826_v33  ;;  %1386 = vrot.lane.b32.xlu0 %v1379_v21, %s3142_s18  ;;  %v1447_v21 = vrot.slane %v3830_v2, %v3251_v9 }
 0x140   :  { %1319 = vrot.lane.b32.xlu1 %v1312_v5, %s3141_s1 }
 0x141   :  { %v3834_v34 = vpop.permute.xlu0 %932 }
 0x142   :  { %5516 = vst [vmem:[#allocation49_spill] sm:$0xff] %v3834_v34  ;;  %v3836_v54 = vpop.permute.xlu1 %864  ;;  %v1424_v34 = vmul.f32 %v1422_v27, %v3730_v46 }
 0x143   :  { %5517 = vst [vmem:[#allocation50_spill] sm:$0xff] %v3836_v54  ;;  %1407 = vrot.lane.b32.xlu0 %v1401_v30, %s3143_s21  ;;  %v3850_v54 = vmul.f32 0.0, %v1447_v21  ;;  %v1455_v30 = vrot.slane %v3830_v2, %v3410_v23  ;;  %v1378_v21 = vmul.f32 %v1377_v26, %v3682_v3 }
 0x144   :  { %1339 = vrot.lane.b32.xlu1 %v1333_v24, %s3141_s1  ;;  %v1357_v24 = vmul.f32 %v1355_v7, %v3669_v20  ;;  %v1451_v7 = vrot.slane %v3830_v2, %v3318_v42 }
 0x145   :  { %v3844_v5 = vpop.permute.xlu0 %952  ;;  %v3863_v46 = vmul.f32 %v1455_v30, %v3438_v15 }
 0x146   :  { %5518 = vst [vmem:[#allocation51_spill] sm:$0xff] %v3844_v5  ;;  %v3846_v33 = vpop.permute.xlu1 %885 }
 0x147   :  { %5519 = vst [vmem:[#allocation52_spill] sm:$0xff] %v3846_v33  ;;  %1411 = vrot.lane.b32.xlu0 %v1403_v56, %s3143_s21  ;;  %v1475_v56 = vmul.f32 %v1474_v55, %v3850_v54 }
 0x148   :  { %1343 = vrot.lane.b32.xlu1 %v1335_v38, %s3141_s1  ;;  %s3151_s1 = smov 124  }
 0x149   :  { %v3856_v51 = vpop.permute.xlu0 %973 }
 0x14a   :  { %5520 = vst [vmem:[#allocation53_spill] sm:$0xff] %v3856_v51  ;;  %v3858_v5 = vpop.permute.xlu1 %905  ;;  %v3876_v51 = vmul.f32 %v1451_v7, %v3394_v43 }
 0x14b   :  { %5521 = vst [vmem:[#allocation54_spill] sm:$0xff] %v3858_v5  ;;  %1431 = vrot.lane.b32.xlu0 %v1424_v34, %s3143_s21  ;;  %v1477_v34 = vmul.f32 %v1474_v55, %v3863_v46  ;;  %v1496_v5 = vstv %s2902_s22  ;;  %s2922_s22 = sld [smem:[#allocation6 + $0x4a]] }
 0x14c   :  { %1364 = vrot.lane.b32.xlu1 %v1357_v24, %s3142_s18  ;;  %v1380_v24 = vmul.f32 %v1377_v26, %v3780_v49  ;;  %v1520_v26 = vmul.f32 %v1519_v12, %v3850_v54 }
 0x14d   :  { %v3867_v33 = vpop.permute.xlu0 %977 }
 0x14e   :  { %5522 = vst [vmem:[#allocation55_spill] sm:$0xff] %v3867_v33  ;;  %v3871_v38 = vpop.permute.xlu1 %909 }
 0x14f   :  { %5523 = vst [vmem:[#allocation56_spill] sm:$0xff] %v3871_v38  ;;  %1481 = vrot.lane.b32.xlu0 %v1475_v56, %s3144_s23  ;;  %v1498_v38 = vmul.f32 %v1496_v5, %v3876_v51  ;;  %v1402_v56 = vmul.f32 %v1400_v45, %v3669_v20  ;;  %v1522_v20 = vmul.f32 %v1519_v12, %v3863_v46  ;;  %v1541_v45 = vstv %s2904_s24  ;;  %s2924_s24 = sld [smem:[#allocation6 + $0x51]] }
 0x150   :  { %1384 = vrot.lane.b32.xlu1 %v1378_v21, %s3142_s18  ;;  %v1423_v21 = vmul.f32 %v1422_v27, %v3682_v3 }
 0x151   :  { %v3880_v14 = vpop.permute.xlu0 %997 }
 0x152   :  { %5524 = vst [vmem:[#allocation57_spill] sm:$0xff] %v3880_v14  ;;  %v3882_v33 = vpop.permute.xlu1 %930 }
 0x153   :  { %5525 = vst [vmem:[#allocation58_spill] sm:$0xff] %v3882_v33  ;;  %1485 = vrot.lane.b32.xlu0 %v1477_v34, %s3144_s23 }
 0x154   :  { %1388 = vrot.lane.b32.xlu1 %v1380_v24, %s3142_s18  ;;  %v3905_v24 = vmul.f32 %v1451_v7, %v3340_v58  ;;  %v1497_v7 = vmul.f32 %v1496_v5, %v3850_v54  ;;  %s3152_s18 = smov 108  }
 0x155   :  { %v3888_v28 = vpop.permute.xlu0 %1018 }
 0x156   :  { %5526 = vst [vmem:[#allocation59_spill] sm:$0xff] %v3888_v28  ;;  %v3890_v18 = vpop.permute.xlu1 %950  ;;  %v1543_v28 = vmul.f32 %v1541_v45, %v3876_v51 }
 0x157   :  { %5527 = vst [vmem:[#allocation60_spill] sm:$0xff] %v3890_v18  ;;  %1505 = vrot.lane.b32.xlu0 %v1498_v38, %s3144_s23  ;;  %v1425_v38 = vmul.f32 %v1422_v27, %v3780_v49 }
 0x158   :  { %1409 = vrot.lane.b32.xlu1 %v1402_v56, %s3143_s21 }
 0x159   :  { %v3896_v34 = vpop.permute.xlu0 %1022 }
 0x15a   :  { %5528 = vst [vmem:[#allocation61_spill] sm:$0xff] %v3896_v34  ;;  %v3898_v14 = vpop.permute.xlu1 %954  ;;  %v1564_v34 = vstv %s2905_s25  ;;  %s2925_s25 = sld [smem:[#allocation6 + $0x27]] }
 0x15b   :  { %5529 = vst [vmem:[#allocation62_spill] sm:$0xff] %v3898_v14  ;;  %1526 = vrot.lane.b32.xlu0 %v1520_v26, %s3145_s26  ;;  %v1476_v26 = vmul.f32 %v1474_v55, %v3905_v24  ;;  %v1565_v27 = vmul.f32 %v1564_v34, %v3850_v54 }
 0x15c   :  { %1429 = vrot.lane.b32.xlu1 %v1423_v21, %s3143_s21 }
 0x15d   :  { %v3907_v56 = vpop.permute.xlu0 %1042 }
 0x15e   :  { %5530 = vst [vmem:[#allocation63_spill] sm:$0xff] %v3907_v56  ;;  %v3909_v3 = vpop.permute.xlu1 %975 }
 0x15f   :  { %5531 = vst [vmem:[#allocation64_spill] sm:$0xff] %v3909_v3  ;;  %1530 = vrot.lane.b32.xlu0 %v1522_v20, %s3145_s26  ;;  %v3926_v20 = vmul.f32 %v1455_v30, %v3480_v19  ;;  %v1853_v3 = vstv %s2917_s15  ;;  %s4632_s15 = sld [smem:[#allocation6 + $0x21]] }
 0x160   :  { %1433 = vrot.lane.b32.xlu1 %v1425_v38, %s3143_s21  ;;  %s3153_s21 = smov 92  }
 0x161   :  { %v3915_v21 = vpop.permute.xlu0 %1063 }
 0x162   :  { %5532 = vst [vmem:[#allocation65_spill] sm:$0xff] %v3915_v21  ;;  %v3917_v49 = vpop.permute.xlu1 %995  ;;  %v1586_v21 = vstv %s2906_s27  ;;  %s2926_s27 = sld [smem:[#allocation6 + $0x58]] }
 0x163   :  { %5533 = vst [vmem:[#allocation66_spill] sm:$0xff] %v3917_v49  ;;  %1550 = vrot.lane.b32.xlu0 %v1543_v28, %s3145_s26  ;;  %v1567_v28 = vmul.f32 %v1564_v34, %v3863_v46  ;;  %v1609_v49 = vstv %s3921_s28  ;;  %s2927_s28 = sld [smem:[#allocation6 + $0x2e]] }
 0x164   :  { %1483 = vrot.lane.b32.xlu1 %v1476_v26, %s3144_s23  ;;  %v1499_v26 = vmul.f32 %v1496_v5, %v3926_v20  ;;  %v1610_v5 = vmul.f32 %v1609_v49, %v3905_v24 }
 0x165   :  { %v3928_v38 = vpop.permute.xlu0 %1067 }
 0x166   :  { %5534 = vst [vmem:[#allocation67_spill] sm:$0xff] %v3928_v38  ;;  %v3930_v55 = vpop.permute.xlu1 %999  ;;  %v1588_v38 = vmul.f32 %v1586_v21, %v3876_v51 }
 0x167   :  { %5535 = vst [vmem:[#allocation68_spill] sm:$0xff] %v3930_v55  ;;  %1571 = vrot.lane.b32.xlu0 %v1565_v27, %s3146_s29  ;;  %v1521_v27 = vmul.f32 %v1519_v12, %v3905_v24 }
 0x168   :  { %1503 = vrot.lane.b32.xlu1 %v1497_v7, %s3144_s23  ;;  %v1626_v7 = vstv %s3934_s30  ;;  %s4259_s30 = sld [smem:[#allocation6 + $0x5f]] }
 0x169   :  { %v3938_v56 = vpop.permute.xlu0 %1087  ;;  %v1627_v12 = vmul.f32 %v1626_v7, %v3876_v51 }
 0x16a   :  { %5536 = vst [vmem:[#allocation69_spill] sm:$0xff] %v3938_v56  ;;  %v3940_v30 = vpop.permute.xlu1 %1020 }
 0x16b   :  { %5537 = vst [vmem:[#allocation70_spill] sm:$0xff] %v3940_v30  ;;  %1575 = vrot.lane.b32.xlu0 %v1567_v28, %s3146_s29  ;;  %v1542_v28 = vmul.f32 %v1541_v45, %v3850_v54 }
 0x16c   :  { %1507 = vrot.lane.b32.xlu1 %v1499_v26, %s3144_s23  ;;  %v1459_v26 = vrot.slane %v3830_v2, %v3467_v0  ;;  %v1566_v2 = vmul.f32 %v1564_v34, %v3905_v24  ;;  %s3154_s23 = smov 76  }
 0x16d   :  { %v3947_v55 = vpop.permute.xlu0 %1137 }
 0x16e   :  { %5538 = vst [vmem:[#allocation71_spill] sm:$0xff] %v3947_v55  ;;  %v3949_v14 = vpop.permute.xlu1 %1040 }
 0x16f   :  { %5539 = vst [vmem:[#allocation72_spill] sm:$0xff] %v3949_v14  ;;  %1595 = vrot.lane.b32.xlu0 %v1588_v38, %s3146_s29  ;;  %v1644_v38 = vstv %s2909_s4  ;;  %s4283_s4 = sld [smem:[#allocation6 + $0x5]] }
 0x170   :  { %1528 = vrot.lane.b32.xlu1 %v1521_v27, %s3145_s26  ;;  %v1544_v27 = vmul.f32 %v1541_v45, %v3926_v20 }
 0x171   :  { %v3956_v56 = vpop.permute.xlu0 %1141 }
 0x172   :  { %5540 = vst [vmem:[#allocation73_spill] sm:$0xff] %v3956_v56  ;;  %v3958_v30 = vpop.permute.xlu1 %1044  ;;  %v1645_v56 = vmul.f32 %v1644_v38, %v3905_v24 }
 0x173   :  { %5541 = vst [vmem:[#allocation74_spill] sm:$0xff] %v3958_v30  ;;  %1614 = vrot.lane.b32.xlu0 %v1610_v5, %s3147_s5  ;;  %v3972_v5 = vmul.f32 0.0, %v1459_v26 }
 0x174   :  { %1548 = vrot.lane.b32.xlu1 %v1542_v28, %s3145_s26 }
 0x175   :  { %v3966_v55 = vpop.permute.xlu0 %1161  ;;  %v1647_v45 = vmul.f32 %v1644_v38, %v3972_v5 }
 0x176   :  { %5542 = vst [vmem:[#allocation75_spill] sm:$0xff] %v3966_v55  ;;  %v3968_v14 = vpop.permute.xlu1 %1065  ;;  %v1666_v55 = vstv %s2910_s0  ;;  %s4344_s0 = sld [smem:[#allocation6 + $0x36]] }
 0x177   :  { %5543 = vst [vmem:[#allocation76_spill] sm:$0xff] %v3968_v14  ;;  %1631 = vrot.lane.b32.xlu0 %v1627_v12, %s3147_s5  ;;  %v1587_v12 = vmul.f32 %v1586_v21, %v3850_v54  ;;  %v1668_v34 = vmul.f32 %v1666_v55, %v3926_v20 }
 0x178   :  { %1552 = vrot.lane.b32.xlu1 %v1544_v27, %s3145_s26  ;;  %v1689_v27 = vstv %s2911_s6  ;;  %s3155_s26 = smov 60   ;;  %s4374_s6 = sld [smem:[#allocation6 + $0xc]] }
 0x179   :  { %v3976_v30 = vpop.permute.xlu0 %1182  ;;  %v1690_v54 = vmul.f32 %v1689_v27, %v3905_v24 }
 0x17a   :  { %5544 = vst [vmem:[#allocation77_spill] sm:$0xff] %v3976_v30  ;;  %v3978_v28 = vpop.permute.xlu1 %1085 }
 0x17b   :  { %5545 = vst [vmem:[#allocation78_spill] sm:$0xff] %v3978_v28  ;;  %1651 = vrot.lane.b32.xlu0 %v1645_v56, %s3148_s7  ;;  %v1589_v56 = vmul.f32 %v1586_v21, %v3926_v20  ;;  %v1692_v21 = vmul.f32 %v1689_v27, %v3972_v5 }
 0x17c   :  { %1573 = vrot.lane.b32.xlu1 %v1566_v2, %s3146_s29  ;;  %v1611_v2 = vmul.f32 %v1609_v49, %v3863_v46 }
 0x17d   :  { %v3984_v26 = vpop.permute.xlu0 %1186 }
 0x17e   :  { %5546 = vst [vmem:[#allocation79_spill] sm:$0xff] %v3984_v26  ;;  %v3986_v14 = vpop.permute.xlu1 %1089 }
 0x17f   :  { %5547 = vst [vmem:[#allocation80_spill] sm:$0xff] %v3986_v14  ;;  %1655 = vrot.lane.b32.xlu0 %v1647_v45, %s3148_s7 }
 0x180   :  { %1593 = vrot.lane.b32.xlu1 %v1587_v12, %s3146_s29  ;;  %v1711_v12 = vstv %s2912_s8  ;;  %s4434_s8 = sld [smem:[#allocation6 + $0x3d]] }
 0x181   :  { %v3992_v30 = vpop.permute.xlu0 %1206  ;;  %v1713_v49 = vmul.f32 %v1711_v12, %v3926_v20 }
 0x182   :  { %5548 = vst [vmem:[#allocation81_spill] sm:$0xff] %v3992_v30  ;;  %v3994_v28 = vpop.permute.xlu1 %1139 }
 0x183   :  { %5549 = vst [vmem:[#allocation82_spill] sm:$0xff] %v3994_v28  ;;  %1675 = vrot.lane.b32.xlu0 %v1668_v34, %s3148_s7  ;;  %v1628_v34 = vmul.f32 %v1626_v7, %v3926_v20 }
 0x184   :  { %1597 = vrot.lane.b32.xlu1 %v1589_v56, %s3146_s29  ;;  %v1734_v56 = vstv %s2913_s9  ;;  %s3156_s29 = smov 44   ;;  %s4460_s9 = sld [smem:[#allocation6 + $0x13]] }
 0x185   :  { %v4000_v45 = vpop.permute.xlu0 %1227  ;;  %v1735_v7 = vmul.f32 %v1734_v56, %v3905_v24  ;;  %v1756_v24 = vstv %s2914_s11  ;;  %s4520_s11 = sld [smem:[#allocation6 + $0x44]] }
 0x186   :  { %5550 = vst [vmem:[#allocation83_spill] sm:$0xff] %v4000_v45  ;;  %v4002_v26 = vpop.permute.xlu1 %1159 }
 0x187   :  { %5551 = vst [vmem:[#allocation84_spill] sm:$0xff] %v4002_v26  ;;  %1696 = vrot.lane.b32.xlu0 %v1690_v54, %s3149_s10  ;;  %v1646_v54 = vmul.f32 %v1644_v38, %v3863_v46  ;;  %v1737_v38 = vmul.f32 %v1734_v56, %v3972_v5 }
 0x188   :  { %1616 = vrot.lane.b32.xlu1 %v1611_v2, %s3147_s5  ;;  %v4022_v2 = vld [vmem:[#allocation10 + $0x4] ss:$8 sm:$0xf] }
 0x189   :  { %v4008_v30 = vpop.permute.xlu0 %1231 }
 0x18a   :  { %5552 = vst [vmem:[#allocation85_spill] sm:$0xff] %v4008_v30  ;;  %v4010_v28 = vpop.permute.xlu1 %1163 }
 0x18b   :  { %5553 = vst [vmem:[#allocation86_spill] sm:$0xff] %v4010_v28  ;;  %1700 = vrot.lane.b32.xlu0 %v1692_v21, %s3149_s10  ;;  %v1667_v21 = vmul.f32 %v1666_v55, %v3876_v51 }
 0x18c   :  { %1633 = vrot.lane.b32.xlu1 %v1628_v34, %s3147_s5  ;;  %s3157_s5 = smov 28  }
 0x18d   :  { %v4016_v45 = vpop.permute.xlu0 %1251 }
 0x18e   :  { %5554 = vst [vmem:[#allocation87_spill] sm:$0xff] %v4016_v45  ;;  %v4018_v26 = vpop.permute.xlu1 %1184  ;;  %v1669_v45 = vmul.f32 %v1666_v55, %v3972_v5 }
 0x18f   :  { %5555 = vst [vmem:[#allocation88_spill] sm:$0xff] %v4018_v26  ;;  %1720 = vrot.lane.b32.xlu0 %v1713_v49, %s3149_s10  ;;  %v1781_v49 = vrot.slane %v4022_v2, %v3251_v9  ;;  %v1808_v26 = vstv %s2915_s12  ;;  %s4546_s12 = sld [smem:[#allocation6 + $0x1a]] }
 0x190   :  { %1653 = vrot.lane.b32.xlu1 %v1646_v54, %s3148_s7 }
 0x191   :  { %v4026_v30 = vpop.permute.xlu0 %1272 }
 0x192   :  { %5556 = vst [vmem:[#allocation89_spill] sm:$0xff] %v4026_v30  ;;  %v4028_v34 = vpop.permute.xlu1 %1204  ;;  %v1758_v30 = vmul.f32 %v1756_v24, %v3926_v20 }
 0x193   :  { %5557 = vst [vmem:[#allocation90_spill] sm:$0xff] %v4028_v34  ;;  %1741 = vrot.lane.b32.xlu0 %v1735_v7, %s3150_s13  ;;  %v4042_v34 = vmul.f32 0.0, %v1781_v49  ;;  %v1789_v7 = vrot.slane %v4022_v2, %v3410_v23  ;;  %v1712_v49 = vmul.f32 %v1711_v12, %v3876_v51 }
 0x194   :  { %1673 = vrot.lane.b32.xlu1 %v1667_v21, %s3148_s7  ;;  %v1691_v21 = vmul.f32 %v1689_v27, %v3863_v46  ;;  %v1785_v27 = vrot.slane %v4022_v2, %v3318_v42 }
 0x195   :  { %v4036_v54 = vpop.permute.xlu0 %1276  ;;  %v4055_v20 = vmul.f32 %v1789_v7, %v3438_v15 }
 0x196   :  { %5558 = vst [vmem:[#allocation91_spill] sm:$0xff] %v4036_v54  ;;  %v4038_v28 = vpop.permute.xlu1 %1208 }
 0x197   :  { %5559 = vst [vmem:[#allocation92_spill] sm:$0xff] %v4038_v28  ;;  %1745 = vrot.lane.b32.xlu0 %v1737_v38, %s3150_s13  ;;  %v1809_v38 = vmul.f32 %v1808_v26, %v4042_v34 }
 0x198   :  { %1677 = vrot.lane.b32.xlu1 %v1669_v45, %s3148_s7  ;;  %s3158_s7 = smov 123  }
 0x199   :  { %v4048_v55 = vpop.permute.xlu0 %1296 }
 0x19a   :  { %5560 = vst [vmem:[#allocation93_spill] sm:$0xff] %v4048_v55  ;;  %v4050_v54 = vpop.permute.xlu1 %1229  ;;  %v4068_v55 = vmul.f32 %v1785_v27, %v3394_v43 }
 0x19b   :  { %5561 = vst [vmem:[#allocation94_spill] sm:$0xff] %v4050_v54  ;;  %1765 = vrot.lane.b32.xlu0 %v1758_v30, %s3150_s13  ;;  %v1811_v30 = vmul.f32 %v1808_v26, %v4055_v20  ;;  %v1830_v54 = vstv %s2916_s14  ;;  %s4605_s14 = sld [smem:[#allocation6 + $0x4b]] }
 0x19c   :  { %1698 = vrot.lane.b32.xlu1 %v1691_v21, %s3149_s10  ;;  %v1714_v21 = vmul.f32 %v1711_v12, %v3972_v5  ;;  %v1854_v12 = vmul.f32 %v1853_v3, %v4042_v34 }
 0x19d   :  { %v4059_v28 = vpop.permute.xlu0 %1317 }
 0x19e   :  { %5562 = vst [vmem:[#allocation95_spill] sm:$0xff] %v4059_v28  ;;  %v4063_v45 = vpop.permute.xlu1 %1249 }
 0x19f   :  { %5563 = vst [vmem:[#allocation96_spill] sm:$0xff] %v4063_v45  ;;  %1815 = vrot.lane.b32.xlu0 %v1809_v38, %s3151_s1  ;;  %v1832_v45 = vmul.f32 %v1830_v54, %v4068_v55  ;;  %v1736_v38 = vmul.f32 %v1734_v56, %v3863_v46  ;;  %v1856_v46 = vmul.f32 %v1853_v3, %v4055_v20  ;;  %v1875_v56 = vstv %s2918_s16  ;;  %s4688_s16 = sld [smem:[#allocation6 + $0x52]] }
 0x1a0   :  { %1718 = vrot.lane.b32.xlu1 %v1712_v49, %s3149_s10  ;;  %v1757_v49 = vmul.f32 %v1756_v24, %v3876_v51 }
 0x1a1   :  { %v4072_v14 = vpop.permute.xlu0 %1321 }
 0x1a2   :  { %5564 = vst [vmem:[#allocation97_spill] sm:$0xff] %v4072_v14  ;;  %v4074_v28 = vpop.permute.xlu1 %1253 }
 0x1a3   :  { %1819 = vrot.lane.b32.xlu0 %v1811_v30, %s3151_s1 }
 0x1a4   :  { %1722 = vrot.lane.b32.xlu1 %v1714_v21, %s3149_s10  ;;  %v4097_v21 = vmul.f32 %v1785_v27, %v3340_v58  ;;  %v1831_v27 = vmul.f32 %v1830_v54, %v4042_v34  ;;  %s3159_s10 = smov 107  }
 0x1a5   :  { %v4080_v18 = vpop.permute.xlu0 %1341 }
 0x1a6   :  { %5565 = vst [vmem:[#allocation98_spill] sm:$0xff] %v4080_v18  ;;  %v4082_v33 = vpop.permute.xlu1 %1274  ;;  %v1898_v18 = vstv %s2919_s17  ;;  %s4714_s17 = sld [smem:[#allocation6 + $0x28]] }
 0x1a7   :  { %1839 = vrot.lane.b32.xlu0 %v1832_v45, %s3151_s1  ;;  %v1759_v45 = vmul.f32 %v1756_v24, %v3972_v5  ;;  %v1899_v24 = vmul.f32 %v1898_v18, %v4042_v34 }
 0x1a8   :  { %1743 = vrot.lane.b32.xlu1 %v1736_v38, %s3150_s13 }
 0x1a9   :  { %v4088_v30 = vpop.permute.xlu0 %1362 }
 0x1aa   :  { %5566 = vst [vmem:[#allocation99_spill] sm:$0xff] %v4088_v30  ;;  %v4090_v14 = vpop.permute.xlu1 %1294  ;;  %v1877_v30 = vmul.f32 %v1875_v56, %v4068_v55 }
 0x1ab   :  { %1860 = vrot.lane.b32.xlu0 %v1854_v12, %s3152_s18  ;;  %v1810_v12 = vmul.f32 %v1808_v26, %v4097_v21  ;;  %v1901_v26 = vmul.f32 %v1898_v18, %v4055_v20 }
 0x1ac   :  { %1763 = vrot.lane.b32.xlu1 %v1757_v49, %s3150_s13 }
 0x1ad   :  { %v4099_v38 = vpop.permute.xlu0 %1366 }
 0x1ae   :  { %5567 = vst [vmem:[#allocation100_spill] sm:$0xff] %v4099_v38  ;;  %v4101_v51 = vpop.permute.xlu1 %1298 }
 0x1af   :  { %5568 = vst [vmem:[#allocation101_spill] sm:$0xff] %v4101_v51  ;;  %1864 = vrot.lane.b32.xlu0 %v1856_v46, %s3152_s18  ;;  %v4116_v46 = vmul.f32 %v1789_v7, %v3480_v19  ;;  %v1793_v7 = vrot.slane %v4022_v2, %v3467_v0 }
 0x1b0   :  { %1767 = vrot.lane.b32.xlu1 %v1759_v45, %s3150_s13  ;;  %s3160_s13 = smov 91  }
 0x1b1   :  { %v4107_v49 = vpop.permute.xlu0 %1386 }
 0x1b2   :  { %5569 = vst [vmem:[#allocation102_spill] sm:$0xff] %v4107_v49  ;;  %v4109_v5 = vpop.permute.xlu1 %1319  ;;  %v1833_v49 = vmul.f32 %v1830_v54, %v4116_v46  ;;  %v4138_v54 = vmul.f32 0.0, %v1793_v7  ;;  %v4152_v7 = vstv %s2922_s22  ;;  %s4842_s22 = sld [smem:[#allocation6 + $0x60]] }
 0x1b3   :  { %1884 = vrot.lane.b32.xlu0 %v1877_v30, %s3152_s18  ;;  %v1920_v30 = vstv %s2920_s19  ;;  %s4770_s19 = sld [smem:[#allocation6 + $0x59]] }
 0x1b4   :  { %1817 = vrot.lane.b32.xlu1 %v1810_v12, %s3151_s1 }
 0x1b5   :  { %v4118_v38 = vpop.permute.xlu0 %1407 }
 0x1b6   :  { %5570 = vst [vmem:[#allocation103_spill] sm:$0xff] %v4118_v38  ;;  %v4120_v45 = vpop.permute.xlu1 %1339  ;;  %v1922_v38 = vmul.f32 %v1920_v30, %v4068_v55 }
 0x1b7   :  { %5571 = vst [vmem:[#allocation104_spill] sm:$0xff] %v4120_v45  ;;  %1905 = vrot.lane.b32.xlu0 %v1899_v24, %s3153_s21  ;;  %v1943_v45 = vstv %s2921_s20  ;;  %v1855_v24 = vmul.f32 %v1853_v3, %v4097_v21  ;;  %s4796_s20 = sld [smem:[#allocation6 + $0x2f]] }
 0x1b8   :  { %1837 = vrot.lane.b32.xlu1 %v1831_v27, %s3151_s1  ;;  %v1944_v2 = vmul.f32 %v1943_v45, %v4097_v21  ;;  %v1946_v3 = vmul.f32 %v1943_v45, %v4138_v54 }
 0x1b9   :  { %v4126_v12 = vpop.permute.xlu0 %1411 }
 0x1ba   :  { %5572 = vst [vmem:[#allocation105_spill] sm:$0xff] %v4126_v12  ;;  %v4130_v51 = vpop.permute.xlu1 %1343 }
 0x1bb   :  { %5573 = vst [vmem:[#allocation106_spill] sm:$0xff] %v4130_v51  ;;  %1909 = vrot.lane.b32.xlu0 %v1901_v26, %s3153_s21  ;;  %v1876_v26 = vmul.f32 %v1875_v56, %v4042_v34 }
 0x1bc   :  { %1841 = vrot.lane.b32.xlu1 %v1833_v49, %s3151_s1  ;;  %s3161_s1 = smov 75  }
 0x1bd   :  { %v4136_v27 = vpop.permute.xlu0 %1431 }
 0x1be   :  { %5574 = vst [vmem:[#allocation107_spill] sm:$0xff] %v4136_v27  ;;  %v4140_v12 = vpop.permute.xlu1 %1364 }
 0x1bf   :  { %5575 = vst [vmem:[#allocation108_spill] sm:$0xff] %v4140_v12  ;;  %1929 = vrot.lane.b32.xlu0 %v1922_v38, %s3153_s21  ;;  %v1878_v38 = vmul.f32 %v1875_v56, %v4116_v46 }
 0x1c0   :  { %1862 = vrot.lane.b32.xlu1 %v1855_v24, %s3152_s18 }
 0x1c1   :  { %v4146_v51 = vpop.permute.xlu0 %1481 }
 0x1c2   :  { %5576 = vst [vmem:[#allocation109_spill] sm:$0xff] %v4146_v51  ;;  %v4148_v49 = vpop.permute.xlu1 %1384  ;;  %v1967_v51 = vmul.f32 %v4152_v7, %v4116_v46 }
 0x1c3   :  { %5577 = vst [vmem:[#allocation110_spill] sm:$0xff] %v4148_v49  ;;  %1950 = vrot.lane.b32.xlu0 %v1944_v2, %s3154_s23  ;;  %v4163_v49 = vstv %s2923_s2  ;;  %v1900_v2 = vmul.f32 %v1898_v18, %v4097_v21  ;;  %v479_v18 = vmul.f32 %v3500_v39, %v3279_v25  ;;  %s4876_s2 = sld [smem:[#allocation6 + $0x6]] }
 0x1c4   :  { %1882 = vrot.lane.b32.xlu1 %v1876_v26, %s3152_s18  ;;  %v1989_v56 = vmul.f32 %v4163_v49, %v4097_v21 }
 0x1c5   :  { %v4156_v27 = vpop.permute.xlu0 %1485 }
 0x1c6   :  { %5578 = vst [vmem:[#allocation111_spill] sm:$0xff] %v4156_v27  ;;  %v4158_v24 = vpop.permute.xlu1 %1388 }
 0x1c7   :  { %5579 = vst [vmem:[#allocation112_spill] sm:$0xff] %v4158_v24  ;;  %1954 = vrot.lane.b32.xlu0 %v1946_v3, %s3154_s23  ;;  %v1921_v3 = vmul.f32 %v1920_v30, %v4042_v34  ;;  %v1923_v34 = vmul.f32 %v1920_v30, %v4116_v46  ;;  %v4201_v24 = vstv %s2925_s25  ;;  %v522_v30 = vsel %vm500_vm8, %v3612_v63, %v3614_v29  ;;  %s4966_s25 = sld [smem:[#allocation6 + $0xd]] }
 0x1c8   :  { %1886 = vrot.lane.b32.xlu1 %v1878_v38, %s3152_s18  ;;  %v472_v38 = vmul.f32 %v3498_v41, %v3279_v25  ;;  %v501_v25 = vsel %vm500_vm8, %v3576_v35, %v3604_v53  ;;  %v2034_v63 = vmul.f32 %v4201_v24, %v4097_v21  ;;  %s3162_s18 = smov 59  }
 0x1c9   :  { %v4167_v12 = vpop.permute.xlu0 %1505 }
 0x1ca   :  { %5580 = vst [vmem:[#allocation113_spill] sm:$0xff] %v4167_v12  ;;  %v4169_v26 = vpop.permute.xlu1 %1409 }
 0x1cb   :  { %5581 = vst [vmem:[#allocation114_spill] sm:$0xff] %v4169_v26  ;;  %1974 = vrot.lane.b32.xlu0 %v1967_v51, %s3154_s23  ;;  %v1991_v51 = vmul.f32 %v4163_v49, %v4138_v54  ;;  %v482_v26 = vadd.f32 %v479_v18, %v472_v38  ;;  %v473_v18 = vmul.f32 %v3498_v41, %v3344_v61 }
 0x1cc   :  { %1907 = vrot.lane.b32.xlu1 %v1900_v2, %s3153_s21  ;;  %v4187_v2 = vstv %s2924_s24  ;;  %v1966_v61 = vmul.f32 %v4152_v7, %v4068_v55  ;;  %s4935_s24 = sld [smem:[#allocation6 + $0x37]] }
 0x1cd   :  { %v4176_v27 = vpop.permute.xlu0 %1526  ;;  %v506_v35 = vadd.f32 %v501_v25, %v482_v26 }
 0x1ce   :  { %5582 = vst [vmem:[#allocation115_spill] sm:$0xff] %v4176_v27  ;;  %v4182_v12 = vpop.permute.xlu1 %1429 }
 0x1cf   :  { %5583 = vst [vmem:[#allocation116_spill] sm:$0xff] %v4182_v12  ;;  %1995 = vrot.lane.b32.xlu0 %v1989_v56, %s3155_s26  ;;  %v2012_v56 = vmul.f32 %v4187_v2, %v4116_v46 }
 0x1d0   :  { %1927 = vrot.lane.b32.xlu1 %v1921_v3, %s3153_s21  ;;  %v1945_v3 = vmul.f32 %v1943_v45, %v4055_v20  ;;  %v527_v45 = vadd.f32 %v522_v30, %v506_v35  ;;  %v567_v30 = vsel %vm545_vm9, %v3620_v10, %v3623_v62 }
 0x1d1   :  { %v4191_v27 = vpop.permute.xlu0 %1530 }
 0x1d2   :  { %5584 = vst [vmem:[#allocation117_spill] sm:$0xff] %v4191_v27  ;;  %v4196_v12 = vpop.permute.xlu1 %1433  ;;  %v508_v27 = vadd.f32 %v3661_v37, %v3509_v48  ;;  %v502_v48 = vsel %vm500_vm8, %v3604_v53, %v3661_v37  ;;  %v1968_v37 = vmul.f32 %v4152_v7, %v4138_v54  ;;  %v1990_v7 = vmul.f32 %v4163_v49, %v4055_v20 }
 0x1d3   :  { %5585 = vst [vmem:[#allocation118_spill] sm:$0xff] %v4196_v12  ;;  %1999 = vrot.lane.b32.xlu0 %v1991_v51, %s3155_s26  ;;  %v480_v51 = vmul.f32 %v3500_v39, %v3398_v47  ;;  %v546_v39 = vsel %vm545_vm9, %v3584_v36, %v3632_v11  ;;  %v523_v36 = vsel %vm500_vm8, %v3614_v29, %v3677_v1  ;;  %vm1278_vm8 = vcmask 637952  }
 0x1d4   :  { %1931 = vrot.lane.b32.xlu1 %v1923_v34, %s3153_s21  ;;  %v529_v26 = vadd.f32 %v3677_v1, %v508_v27  ;;  %v2036_v27 = vmul.f32 %v4201_v24, %v4138_v54  ;;  %v551_v25 = vadd.f32 %v546_v39, %v527_v45  ;;  %v4257_v1 = vstv %s2927_s28  ;;  %s3163_s21 = smov 43   ;;  %s5052_s28 = sld [smem:[#allocation6 + $0x14]] }
 0x1d5   :  { %v4208_v38 = vpop.permute.xlu0 %1550  ;;  %v483_v41 = vadd.f32 %v480_v51, %v473_v18  ;;  %v2079_v49 = vmul.f32 %v4257_v1, %v4097_v21 }
 0x1d6   :  { %v4216_v12 = vpop.permute.xlu1 %1483  ;;  %v553_v53 = vadd.f32 %v3634_v31, %v529_v26  ;;  %v572_v51 = vadd.f32 %v567_v30, %v551_v25  ;;  %v591_v26 = vsel %vm590_vm10, %v3594_v22, %v3644_v6  ;;  %v4281_v25 = vld [vmem:[#allocation10 + $0x5] ss:$8 sm:$0xf]  ;;  %v568_v22 = vsel %vm545_vm9, %v3623_v62, %v3688_v4 }
 0x1d7   :  { %2019 = vrot.lane.b32.xlu0 %v2012_v56, %s3155_s26  ;;  %v4238_v56 = vstv %s2926_s27  ;;  %v507_v35 = vadd.f32 %v502_v48, %v483_v41  ;;  %v612_v41 = vsel %vm590_vm10, %v3696_v13, %v3652_v32  ;;  %v637_v30 = vsel %vm635_vm11, %v3715_v60, %v3673_v17  ;;  %s5027_s27 = sld [smem:[#allocation6 + $0x3e]] }
 0x1d8   :  { %1952 = vrot.lane.b32.xlu1 %v1945_v3, %s3154_s23  ;;  %v2057_v10 = vmul.f32 %v4238_v56, %v4116_v46  ;;  %v596_v48 = vadd.f32 %v591_v26, %v572_v51  ;;  %v2081_v62 = vmul.f32 %v4257_v1, %v4138_v54  ;;  %v4309_v17 = vstv %s4259_s30  ;;  %s5108_s30 = sld [smem:[#allocation6 + $0x45]] }
 0x1d9   :  { %v4225_v47 = vpop.permute.xlu0 %1571  ;;  %v528_v29 = vadd.f32 %v523_v36, %v507_v35  ;;  %v658_v35 = vsel %vm635_vm11, %v3686_v57, %v3734_v8  ;;  %v2013_v51 = vmul.f32 %v4187_v2, %v4138_v54  ;;  %v613_v8 = vsel %vm590_vm10, %v3652_v32, %v3704_v50 }
 0x1da   :  { %v4233_v34 = vpop.permute.xlu1 %1503  ;;  %v617_v21 = vadd.f32 %v612_v41, %v596_v48  ;;  %v682_v26 = vsel %vm680_vm12, %v3742_v59, %v3702_v40  ;;  %v5587_v48 = vld [vmem:[#allocation25_spill] sm:$0xff] }
 0x1db   :  { %2040 = vrot.lane.b32.xlu0 %v2034_v63, %s3156_s29  ;;  %v574_v63 = vadd.f32 %v3688_v4, %v553_v53  ;;  %v2125_v4 = vrot.slane %v4281_v25, %v3251_v9 }
 0x1dc   :  { %1972 = vrot.lane.b32.xlu1 %v1966_v61, %s3154_s23  ;;  %v547_v61 = vsel %vm545_vm9, %v3632_v11, %v3634_v31  ;;  %v2011_v31 = vmul.f32 %v4187_v2, %v4068_v55  ;;  %v2102_v2 = vmul.f32 %v4309_v17, %v4116_v46  ;;  %v636_v46 = vsel %vm635_vm11, %v3664_v44, %v3715_v60 }
 0x1dd   :  { %v4250_v3 = vpop.permute.xlu0 %1575  ;;  %v598_v11 = vadd.f32 %v3642_v16, %v574_v63  ;;  %v592_v63 = vsel %vm590_vm10, %v3644_v6, %v3642_v16  ;;  %v4335_v16 = vrot.slane %v4281_v25, %v3410_v23  ;;  %vm1323_vm9 = vcmask 506880  }
 0x1de   :  { %v4252_v18 = vpop.permute.xlu1 %1507  ;;  %vm1368_vm10 = vcmask 375808  }
 0x1df   :  { %2044 = vrot.lane.b32.xlu0 %v2036_v27, %s3156_s29  ;;  %v552_v27 = vadd.f32 %v547_v61, %v528_v29  ;;  %v619_v36 = vadd.f32 %v3704_v50, %v598_v11  ;;  %v5586_v50 = vld [vmem:[#allocation32_spill] sm:$0xff]  ;;  %v2035_v11 = vmul.f32 %v4201_v24, %v4055_v20 }
 0x1e0   :  { %1976 = vrot.lane.b32.xlu1 %v1968_v37, %s3154_s23  ;;  %v703_v40 = vsel %vm680_vm12, %v5587_v48, %v5586_v50  ;;  %s3164_s23 = smov 27  }
 0x1e1   :  { %v4265_v45 = vpop.permute.xlu0 %1595  ;;  %v573_v37 = vadd.f32 %v568_v22, %v552_v27  ;;  %v4342_v27 = vstv %s4283_s4  ;;  %s5131_s4 = sld [smem:[#allocation6 + $0x1b]] }
 0x1e2   :  { %v4276_v39 = vpop.permute.xlu1 %1528 }
 0x1e3   :  { %2064 = vrot.lane.b32.xlu0 %v2057_v10, %s3156_s29  ;;  %v643_v10 = vadd.f32 %v637_v30, %v619_v36  ;;  %v597_v6 = vadd.f32 %v592_v63, %v573_v37  ;;  %v5588_v30 = vld [vmem:[#allocation24_spill] sm:$0xff]  ;;  %v5591_v63 = vld [vmem:[#allocation30_spill] sm:$0xff] }
 0x1e4   :  { %1997 = vrot.lane.b32.xlu1 %v1990_v7, %s3155_s26  ;;  %v641_v7 = vadd.f32 %v3664_v44, %v617_v21 }
 0x1e5   :  { %v4292_v13 = vpop.permute.xlu0 %1614  ;;  %v664_v61 = vadd.f32 %v658_v35, %v643_v10  ;;  %v618_v21 = vadd.f32 %v613_v8, %v597_v6  ;;  %v657_v35 = vsel %vm635_vm11, %v3723_v52, %v3686_v57  ;;  %v4368_v10 = vmul.f32 %v4335_v16, %v3438_v15  ;;  %v5592_v8 = vld [vmem:[#allocation38_spill] sm:$0xff]  ;;  %v5610_v15 = vld [vmem:[#allocation41_spill] sm:$0xff] }
 0x1e6   :  { %v4298_v53 = vpop.permute.xlu1 %1548  ;;  %v662_v32 = vadd.f32 %v3723_v52, %v641_v7  ;;  %v681_v57 = vsel %vm680_vm12, %v5588_v30, %v3742_v59  ;;  %vm1413_vm11 = vcmask 244736  }
 0x1e7   :  { %2085 = vrot.lane.b32.xlu0 %v2079_v49, %s3157_s5  ;;  %v4331_v49 = vmul.f32 0.0, %v2125_v4  ;;  %v688_v22 = vadd.f32 %v682_v26, %v664_v61  ;;  %v5590_v4 = vld [vmem:[#allocation34_spill] sm:$0xff]  ;;  %v5593_v26 = vld [vmem:[#allocation28_spill] sm:$0xff] }
 0x1e8   :  { %2017 = vrot.lane.b32.xlu1 %v2011_v31, %s3155_s26  ;;  %v686_v36 = vadd.f32 %v5588_v30, %v662_v32  ;;  %v748_v61 = vsel %vm725_vm13, %v5593_v26, %v5592_v8  ;;  %v4386_v32 = vrot.slane %v4281_v25, %v3318_v42  ;;  %v5599_v8 = vld [vmem:[#allocation42_spill] sm:$0xff] }
 0x1e9   :  { %v4314_v29 = vpop.permute.xlu0 %1631  ;;  %v709_v44 = vadd.f32 %v703_v40, %v688_v22  ;;  %v2153_v24 = vmul.f32 %v4342_v27, %v4331_v49  ;;  %v702_v40 = vsel %vm680_vm12, %v5591_v63, %v5587_v48  ;;  %vm1487_vm12 = vcmask 1022976  }
 0x1ea   :  { %v4326_v41 = vpop.permute.xlu1 %1552  ;;  %v707_v7 = vadd.f32 %v5591_v63, %v686_v36 }
 0x1eb   :  { %2089 = vrot.lane.b32.xlu0 %v2081_v62, %s3157_s5  ;;  %v5589_v62 = vld [vmem:[#allocation27_spill] sm:$0xff] }
 0x1ec   :  { %2021 = vrot.lane.b32.xlu1 %v2013_v51, %s3155_s26  ;;  %v727_v37 = vsel %vm725_vm13, %v5590_v4, %v5589_v62  ;;  %v642_v51 = vadd.f32 %v636_v46, %v618_v21  ;;  %v5594_v46 = vld [vmem:[#allocation26_spill] sm:$0xff]  ;;  %v5595_v21 = vld [vmem:[#allocation40_spill] sm:$0xff]  ;;  %v2155_v62 = vmul.f32 %v4342_v27, %v4368_v10  ;;  %s3165_s26 = smov 122  }
 0x1ed   :  { %v4352_v31 = vpop.permute.xlu0 %1651  ;;  %v733_v52 = vadd.f32 %v727_v37, %v709_v44  ;;  %v731_v59 = vadd.f32 %v5594_v46, %v707_v7  ;;  %v4402_v37 = vmul.f32 %v4386_v32, %v3394_v43  ;;  %v726_v63 = vsel %vm725_vm13, %v5594_v46, %v5590_v4  ;;  %v5598_v7 = vld [vmem:[#allocation33_spill] sm:$0xff]  ;;  %v5602_v46 = vld [vmem:[#allocation46_spill] sm:$0xff]  ;;  %v5603_v43 = vld [vmem:[#allocation35_spill] sm:$0xff] }
 0x1ee   :  { %v4361_v60 = vpop.permute.xlu1 %1573  ;;  %v663_v50 = vadd.f32 %v657_v35, %v642_v51  ;;  %v5597_v35 = vld [vmem:[#allocation36_spill] sm:$0xff]  ;;  %v4406_v51 = vstv %s4344_s0  ;;  %v845_v42 = vsel %vm844_vm15, %v5603_v43, %v5602_v46  ;;  %s2950_s0 = sld [smem:[#allocation6 + $0x4c]] }
 0x1ef   :  { %2109 = vrot.lane.b32.xlu0 %v2102_v2, %s3157_s5  ;;  %v2056_v2 = vmul.f32 %v4238_v56, %v4068_v55  ;;  %v754_v22 = vadd.f32 %v748_v61, %v733_v52  ;;  %v752_v44 = vadd.f32 %v5597_v35, %v731_v59  ;;  %v2058_v61 = vmul.f32 %v4238_v56, %v4138_v54 }
 0x1f0   :  { %2042 = vrot.lane.b32.xlu1 %v2035_v11, %s3156_s29  ;;  %v5596_v11 = vld [vmem:[#allocation29_spill] sm:$0xff]  ;;  %v687_v48 = vadd.f32 %v681_v57, %v663_v50  ;;  %v747_v59 = vsel %vm725_vm13, %v5597_v35, %v5593_v26  ;;  %v2176_v56 = vmul.f32 %v4406_v51, %v4402_v37  ;;  %v5606_v35 = vld [vmem:[#allocation48_spill] sm:$0xff]  ;;  %vm1532_vm13 = vcmask 891904  }
 0x1f1   :  { %v4382_v6 = vpop.permute.xlu0 %1655  ;;  %v800_v30 = vsel %vm799_vm14, %v5596_v11, %v5595_v21  ;;  %v5601_v11 = vld [vmem:[#allocation31_spill] sm:$0xff] }
 0x1f2   :  { %v4395_v36 = vpop.permute.xlu1 %1593  ;;  %v708_v52 = vadd.f32 %v702_v40, %v687_v48  ;;  %v805_v50 = vadd.f32 %v800_v30, %v752_v44  ;;  %v807_v4 = vadd.f32 %v5601_v11, %v754_v22  ;;  %v4432_v30 = vstv %s4374_s6  ;;  %v5604_v22 = vld [vmem:[#allocation44_spill] sm:$0xff]  ;;  %v5605_v48 = vld [vmem:[#allocation39_spill] sm:$0xff]  ;;  %s2951_s6 = sld [smem:[#allocation6 + $0x22]] }
 0x1f3   :  { %2159 = vrot.lane.b32.xlu0 %v2153_v24, %s3158_s7  ;;  %v821_v24 = vsel %vm799_vm14, %v5599_v8, %v5598_v7  ;;  %v801_v26 = vsel %vm799_vm14, %v5595_v21, %v5601_v11  ;;  %v2080_v44 = vmul.f32 %v4257_v1, %v4055_v20  ;;  %v5608_v21 = vld [vmem:[#allocation37_spill] sm:$0xff]  ;;  %v2198_v20 = vmul.f32 %v4432_v30, %v4331_v49 }
 0x1f4   :  { %2062 = vrot.lane.b32.xlu1 %v2056_v2, %s3156_s29  ;;  %v732_v2 = vadd.f32 %v726_v63, %v708_v52  ;;  %v826_v40 = vadd.f32 %v821_v24, %v805_v50  ;;  %v828_v43 = vadd.f32 %v5604_v22, %v807_v4  ;;  %v822_v50 = vsel %vm799_vm14, %v5598_v7, %v5604_v22  ;;  %v5609_v4 = vld [vmem:[#allocation52_spill] sm:$0xff]  ;;  %v5611_v7 = vld [vmem:[#allocation50_spill] sm:$0xff] }
 0x1f5   :  { %v4417_v57 = vpop.permute.xlu0 %1675  ;;  %vm1577_vm14 = vcmask 760832  }
 0x1f6   :  { %5600 = vst [vmem:[#allocation32_spill] sm:$0xff] %v4417_v57  ;;  %v4426_v8 = vpop.permute.xlu1 %1597  ;;  %v753_v24 = vadd.f32 %v747_v59, %v732_v2  ;;  %v850_v52 = vadd.f32 %v845_v42, %v826_v40  ;;  %v852_v11 = vadd.f32 %v5608_v21, %v828_v43  ;;  %v890_v57 = vsel %vm889_vm0, %v5610_v15, %v5609_v4  ;;  %v5612_v2 = vld [vmem:[#allocation45_spill] sm:$0xff]  ;;  %v5613_v15 = vld [vmem:[#allocation54_spill] sm:$0xff] }
 0x1f7   :  { %2163 = vrot.lane.b32.xlu0 %v2155_v62, %s3158_s7  ;;  %v866_v62 = vsel %vm844_vm15, %v5606_v35, %v5605_v48  ;;  %v846_v42 = vsel %vm844_vm15, %v5602_v46, %v5608_v21  ;;  %v911_v40 = vsel %vm889_vm0, %v5613_v15, %v5612_v2  ;;  %v5616_v46 = vld [vmem:[#allocation47_spill] sm:$0xff] }
 0x1f8   :  { %2066 = vrot.lane.b32.xlu1 %v2058_v61, %s3156_s29  ;;  %v806_v1 = vadd.f32 %v801_v26, %v753_v24  ;;  %v871_v61 = vadd.f32 %v866_v62, %v850_v52  ;;  %v873_v59 = vadd.f32 %v5611_v7, %v852_v11  ;;  %v5614_v62 = vld [vmem:[#allocation43_spill] sm:$0xff]  ;;  %v5615_v52 = vld [vmem:[#allocation58_spill] sm:$0xff]  ;;  %s3166_s29 = smov 106  }
 0x1f9   :  { %v4446_v63 = vpop.permute.xlu0 %1696  ;;  %v935_v21 = vsel %vm934_vm1, %v5616_v46, %v5615_v52  ;;  %v5618_v15 = vld [vmem:[#allocation51_spill] sm:$0xff]  ;;  %v5619_v46 = vld [vmem:[#allocation60_spill] sm:$0xff] }
 0x1fa   :  { %5607 = vst [vmem:[#allocation25_spill] sm:$0xff] %v4446_v63  ;;  %v4455_v35 = vpop.permute.xlu1 %1616  ;;  %v827_v22 = vadd.f32 %v822_v50, %v806_v1  ;;  %v895_v43 = vadd.f32 %v890_v57, %v871_v61  ;;  %v897_v24 = vadd.f32 %v5614_v62, %v873_v59  ;;  %v867_v57 = vsel %vm844_vm15, %v5605_v48, %v5611_v7  ;;  %v5617_v61 = vld [vmem:[#allocation56_spill] sm:$0xff] }
 0x1fb   :  { %2183 = vrot.lane.b32.xlu0 %v2176_v56, %s3158_s7  ;;  %v2101_v56 = vmul.f32 %v4309_v17, %v4068_v55  ;;  %v4487_v1 = vstv %s4434_s8  ;;  %v956_v63 = vsel %vm934_vm1, %v5619_v46, %v5618_v15  ;;  %v891_v7 = vsel %vm889_vm0, %v5609_v4, %v5614_v62  ;;  %s2952_s8 = sld [smem:[#allocation6 + $0x53]] }
 0x1fc   :  { %2087 = vrot.lane.b32.xlu1 %v2080_v44, %s3157_s5  ;;  %v2200_v44 = vmul.f32 %v4432_v30, %v4368_v10  ;;  %v851_v55 = vadd.f32 %v846_v42, %v827_v22  ;;  %v916_v50 = vadd.f32 %v911_v40, %v895_v43  ;;  %v918_v59 = vadd.f32 %v5617_v61, %v897_v24  ;;  %v5621_v43 = vld [vmem:[#allocation49_spill] sm:$0xff] }
 0x1fd   :  { %v4472_v26 = vpop.permute.xlu0 %1700  ;;  %v4498_v42 = vmul.f32 %v4386_v32, %v3340_v58  ;;  %v5623_v58 = vld [vmem:[#allocation64_spill] sm:$0xff]  ;;  %v4518_v62 = vstv %s4460_s9  ;;  %vm1618_vm15 = vcmask 629760   ;;  %s2953_s9 = sld [smem:[#allocation6 + $0x29]] }
 0x1fe   :  { %v4478_v11 = vpop.permute.xlu1 %1633  ;;  %v940_v40 = vadd.f32 %v935_v21, %v916_v50  ;;  %v872_v22 = vadd.f32 %v867_v57, %v851_v55  ;;  %v942_v24 = vadd.f32 %v5621_v43, %v918_v59  ;;  %v5624_v55 = vld [vmem:[#allocation62_spill] sm:$0xff] }
 0x1ff   :  { %2204 = vrot.lane.b32.xlu0 %v2198_v20, %s3159_s10  ;;  %v2103_v20 = vmul.f32 %v4309_v17, %v4138_v54  ;;  %v2221_v54 = vmul.f32 %v4487_v1, %v4402_v37  ;;  %v912_v17 = vsel %vm889_vm0, %v5612_v2, %v5617_v61  ;;  %v5626_v2 = vld [vmem:[#allocation68_spill] sm:$0xff]  ;;  %v5627_v61 = vld [vmem:[#allocation57_spill] sm:$0xff]  ;;  %vm1657_vm0 = vcmask 498688  }
 0x200   :  { %2107 = vrot.lane.b32.xlu1 %v2101_v56, %s3157_s5  ;;  %v961_v32 = vadd.f32 %v956_v63, %v940_v40  ;;  %v5622_v56 = vld [vmem:[#allocation55_spill] sm:$0xff]  ;;  %v896_v21 = vadd.f32 %v891_v7, %v872_v22  ;;  %v963_v57 = vadd.f32 %v5624_v55, %v942_v24  ;;  %v936_v63 = vsel %vm934_vm1, %v5615_v52, %v5621_v43  ;;  %v5629_v52 = vld [vmem:[#allocation61_spill] sm:$0xff]  ;;  %v5630_v43 = vld [vmem:[#allocation70_spill] sm:$0xff] }
 0x201   :  { %v4500_v48 = vpop.permute.xlu0 %1720  ;;  %v981_v4 = vsel %vm979_vm2, %v5623_v58, %v5622_v56  ;;  %v1002_v59 = vsel %vm979_vm2, %v5627_v61, %v5626_v2  ;;  %v957_v56 = vsel %vm934_vm1, %v5618_v15, %v5624_v55  ;;  %v5632_v55 = vld [vmem:[#allocation66_spill] sm:$0xff]  ;;  %v5634_v2 = vld [vmem:[#allocation63_spill] sm:$0xff]  ;;  %vm1702_vm1 = vcmask 367616  }
 0x202   :  { %5620 = vst [vmem:[#allocation24_spill] sm:$0xff] %v4500_v48  ;;  %v4506_v46 = vpop.permute.xlu1 %1653  ;;  %v917_v40 = vadd.f32 %v912_v17, %v896_v21  ;;  %v987_v7 = vadd.f32 %v981_v4, %v963_v57 }
 0x203   :  { %2208 = vrot.lane.b32.xlu0 %v2200_v44, %s3159_s10  ;;  %v2154_v44 = vmul.f32 %v4342_v27, %v4498_v42  ;;  %v5628_v27 = vld [vmem:[#allocation53_spill] sm:$0xff] }
 0x204   :  { %2111 = vrot.lane.b32.xlu1 %v2103_v20, %s3157_s5  ;;  %v2243_v20 = vmul.f32 %v4518_v62, %v4331_v49  ;;  %v985_v24 = vadd.f32 %v5628_v27, %v961_v32  ;;  %v941_v17 = vadd.f32 %v936_v63, %v917_v40  ;;  %v1008_v4 = vadd.f32 %v1002_v59, %v987_v7  ;;  %v5633_v63 = vld [vmem:[#allocation74_spill] sm:$0xff]  ;;  %s3167_s5 = smov 90  }
 0x205   :  { %v4526_v50 = vpop.permute.xlu0 %1741  ;;  %v4553_v32 = vmul.f32 %v4335_v16, %v3480_v19  ;;  %v980_v21 = vsel %vm979_vm2, %v5628_v27, %v5623_v58  ;;  %v2245_v16 = vmul.f32 %v4518_v62, %v4368_v10  ;;  %v1001_v58 = vsel %vm979_vm2, %v5632_v55, %v5627_v61  ;;  %v5635_v27 = vld [vmem:[#allocation59_spill] sm:$0xff]  ;;  %v5637_v19 = vld [vmem:[#allocation76_spill] sm:$0xff] }
 0x206   :  { %5625 = vst [vmem:[#allocation27_spill] sm:$0xff] %v4526_v50  ;;  %v4534_v22 = vpop.permute.xlu1 %1673  ;;  %v1026_v50 = vsel %vm1024_vm3, %v5630_v43, %v5629_v52  ;;  %v1006_v57 = vadd.f32 %v5632_v55, %v985_v24  ;;  %v962_v59 = vadd.f32 %v957_v56, %v941_v17  ;;  %v5636_v52 = vld [vmem:[#allocation67_spill] sm:$0xff]  ;;  %v4577_v56 = vstv %s4520_s11  ;;  %v5639_v55 = vld [vmem:[#allocation72_spill] sm:$0xff]  ;;  %s2954_s11 = sld [smem:[#allocation6 + $0x5a]] }
 0x207   :  { %2228 = vrot.lane.b32.xlu0 %v2221_v54, %s3159_s10  ;;  %v2175_v54 = vmul.f32 %v4406_v51, %v4331_v49  ;;  %v1032_v40 = vadd.f32 %v1026_v50, %v1008_v4  ;;  %v1025_v61 = vsel %vm1024_vm3, %v5635_v27, %v5630_v43  ;;  %v1046_v43 = vsel %vm1024_vm3, %v5639_v55, %v5634_v2 }
 0x208   :  { %2161 = vrot.lane.b32.xlu1 %v2154_v44, %s3158_s7  ;;  %v1047_v44 = vsel %vm1024_vm3, %v5634_v2, %v5633_v63  ;;  %v1030_v24 = vadd.f32 %v5635_v27, %v1006_v57  ;;  %v1071_v63 = vsel %vm1069_vm4, %v5637_v19, %v5636_v52  ;;  %v986_v50 = vadd.f32 %v980_v21, %v962_v59  ;;  %v5641_v52 = vld [vmem:[#allocation69_spill] sm:$0xff] }
 0x209   :  { %v4555_v15 = vpop.permute.xlu0 %1745  ;;  %v1053_v17 = vadd.f32 %v1047_v44, %v1032_v40  ;;  %v5642_v40 = vld [vmem:[#allocation65_spill] sm:$0xff]  ;;  %vm1747_vm2 = vcmask 236544   ;;  %vm1821_vm3 = vcmask 1014784  }
 0x20a   :  { %5631 = vst [vmem:[#allocation34_spill] sm:$0xff] %v4555_v15  ;;  %v4564_v7 = vpop.permute.xlu1 %1677  ;;  %v1051_v57 = vadd.f32 %v5639_v55, %v1030_v24  ;;  %v5640_v15 = vld [vmem:[#allocation80_spill] sm:$0xff]  ;;  %v1007_v21 = vadd.f32 %v1001_v58, %v986_v50  ;;  %v1070_v2 = vsel %vm1069_vm4, %v5642_v40, %v5637_v19  ;;  %v5646_v55 = vld [vmem:[#allocation78_spill] sm:$0xff] }
 0x20b   :  { %2249 = vrot.lane.b32.xlu0 %v2243_v20, %s3160_s13  ;;  %v2177_v20 = vmul.f32 %v4406_v51, %v4553_v32  ;;  %v1092_v48 = vsel %vm1069_vm4, %v5641_v52, %v5640_v15  ;;  %v1077_v44 = vadd.f32 %v1071_v63, %v1053_v17  ;;  %v2266_v51 = vmul.f32 %v4577_v56, %v4402_v37  ;;  %v5644_v63 = vld [vmem:[#allocation71_spill] sm:$0xff] }
 0x20c   :  { %2181 = vrot.lane.b32.xlu1 %v2175_v54, %s3158_s7  ;;  %v2137_v54 = vrot.slane %v4281_v25, %v3467_v0  ;;  %v1075_v27 = vadd.f32 %v5642_v40, %v1051_v57  ;;  %v4603_v15 = vstv %s4546_s12  ;;  %v1031_v58 = vadd.f32 %v1025_v61, %v1007_v21  ;;  %v5643_v25 = vld [vmem:[#allocation82_spill] sm:$0xff]  ;;  %v5648_v21 = vld [vmem:[#allocation84_spill] sm:$0xff]  ;;  %s2955_s12 = sld [smem:[#allocation6 + $0x30]] }
 0x20d   :  { %v4582_v4 = vpop.permute.xlu0 %1765  ;;  %v1098_v24 = vadd.f32 %v1092_v48, %v1077_v44  ;;  %v1144_v50 = vsel %vm1143_vm5, %v5644_v63, %v5643_v25  ;;  %v5647_v48 = vld [vmem:[#allocation75_spill] sm:$0xff]  ;;  %v1091_v19 = vsel %vm1069_vm4, %v5646_v55, %v5641_v52  ;;  %vm1866_vm4 = vcmask 883712  }
 0x20e   :  { %5638 = vst [vmem:[#allocation30_spill] sm:$0xff] %v4582_v4  ;;  %v4593_v59 = vpop.permute.xlu1 %1698  ;;  %v1096_v57 = vadd.f32 %v5646_v55, %v1075_v27  ;;  %v1052_v61 = vadd.f32 %v1046_v43, %v1031_v58  ;;  %v1165_v44 = vsel %vm1143_vm5, %v5648_v21, %v5647_v48  ;;  %v4622_v63 = vmul.f32 0.0, %v2137_v54  ;;  %v5650_v27 = vld [vmem:[#allocation73_spill] sm:$0xff]  ;;  %v5651_v21 = vld [vmem:[#allocation88_spill] sm:$0xff] }
 0x20f   :  { %2253 = vrot.lane.b32.xlu0 %v2245_v16, %s3160_s13  ;;  %v2199_v16 = vmul.f32 %v4432_v30, %v4498_v42  ;;  %v2288_v30 = vmul.f32 %v4603_v15, %v4498_v42  ;;  %v1151_v58 = vadd.f32 %v5650_v27, %v1098_v24  ;;  %v5652_v54 = vld [vmem:[#allocation77_spill] sm:$0xff]  ;;  %v1145_v52 = vsel %vm1143_vm5, %v5643_v25, %v5650_v27  ;;  %v5654_v24 = vld [vmem:[#allocation86_spill] sm:$0xff] }
 0x210   :  { %2185 = vrot.lane.b32.xlu1 %v2177_v20, %s3158_s7  ;;  %v1149_v40 = vadd.f32 %v1144_v50, %v1096_v57  ;;  %v1076_v43 = vadd.f32 %v1070_v2, %v1052_v61  ;;  %v1189_v0 = vsel %vm1188_vm6, %v5652_v54, %v5651_v21  ;;  %v5655_v57 = vld [vmem:[#allocation81_spill] sm:$0xff]  ;;  %v5656_v61 = vld [vmem:[#allocation90_spill] sm:$0xff]  ;;  %v1166_v25 = vsel %vm1143_vm5, %v5647_v48, %v5654_v24  ;;  %s3168_s7 = smov 74  }
 0x211   :  { %v4613_v17 = vpop.permute.xlu0 %1815  ;;  %v1172_v55 = vadd.f32 %v5654_v24, %v1151_v58  ;;  %v1210_v54 = vsel %vm1188_vm6, %v5656_v61, %v5655_v57  ;;  %v5659_v58 = vld [vmem:[#allocation94_spill] sm:$0xff]  ;;  %v5660_v61 = vld [vmem:[#allocation83_spill] sm:$0xff]  ;;  %vm1911_vm5 = vcmask 752640  }
 0x212   :  { %5645 = vst [vmem:[#allocation38_spill] sm:$0xff] %v4613_v17  ;;  %v4624_v20 = vpop.permute.xlu1 %1718  ;;  %v1170_v50 = vadd.f32 %v1165_v44, %v1149_v40  ;;  %v1097_v2 = vadd.f32 %v1091_v19, %v1076_v43  ;;  %v4659_v19 = vstv %s4605_s14  ;;  %v5658_v43 = vld [vmem:[#allocation79_spill] sm:$0xff]  ;;  %s2956_s14 = sld [smem:[#allocation6 + $0x61]] }
 0x213   :  { %5649 = vst [vmem:[#allocation28_spill] sm:$0xff] %v4624_v20  ;;  %2273 = vrot.lane.b32.xlu0 %v2266_v51, %s3160_s13  ;;  %v2220_v51 = vmul.f32 %v4487_v1, %v4331_v49  ;;  %v1196_v27 = vadd.f32 %v5658_v43, %v1172_v55  ;;  %v5662_v24 = vld [vmem:[#allocation87_spill] sm:$0xff]  ;;  %v5663_v55 = vld [vmem:[#allocation96_spill] sm:$0xff] }
 0x214   :  { %2206 = vrot.lane.b32.xlu1 %v2199_v16, %s3159_s10  ;;  %v2290_v16 = vmul.f32 %v4603_v15, %v4622_v63  ;;  %v1194_v44 = vadd.f32 %v1189_v0, %v1170_v50  ;;  %v1150_v40 = vadd.f32 %v1145_v52, %v1097_v2  ;;  %v1190_v0 = vsel %vm1188_vm6, %v5651_v21, %v5658_v43  ;;  %v5661_v50 = vld [vmem:[#allocation92_spill] sm:$0xff]  ;;  %v5665_v43 = vld [vmem:[#allocation89_spill] sm:$0xff] }
 0x215   :  { %v4641_v17 = vpop.permute.xlu0 %1819  ;;  %v1217_v2 = vadd.f32 %v5661_v50, %v1196_v27  ;;  %v1211_v21 = vsel %vm1188_vm6, %v5655_v57, %v5661_v50  ;;  %v1279_v27 = vsel %vm1278_vm8, %v5665_v43, %v4082_v33  ;;  %v5670_v43 = vld [vmem:[#allocation101_spill] sm:$0xff]  ;;  %vm1956_vm6 = vcmask 621568  }
 0x216   :  { %5653 = vst [vmem:[#allocation26_spill] sm:$0xff] %v4641_v17  ;;  %v4650_v4 = vpop.permute.xlu1 %1722  ;;  %v1234_v17 = vsel %vm1233_vm7, %v5660_v61, %v5659_v58  ;;  %v1215_v48 = vadd.f32 %v1210_v54, %v1194_v44  ;;  %v1171_v52 = vadd.f32 %v1166_v25, %v1150_v40  ;;  %v1255_v61 = vsel %vm1233_vm7, %v5663_v55, %v5662_v24  ;;  %v5664_v44 = vld [vmem:[#allocation85_spill] sm:$0xff] }
 0x217   :  { %5657 = vst [vmem:[#allocation40_spill] sm:$0xff] %v4650_v4  ;;  %2294 = vrot.lane.b32.xlu0 %v2288_v30, %s3161_s1  ;;  %v2222_v30 = vmul.f32 %v4487_v1, %v4553_v32  ;;  %v2311_v1 = vmul.f32 %v4659_v19, %v4553_v32  ;;  %v4686_v54 = vstv %s4632_s15  ;;  %v1241_v40 = vadd.f32 %v5664_v44, %v1217_v2  ;;  %s3171_s15 = smov 26  }
 0x218   :  { %2226 = vrot.lane.b32.xlu1 %v2220_v51, %s3159_s10  ;;  %v1239_v51 = vadd.f32 %v1234_v17, %v1215_v48  ;;  %v1195_v25 = vadd.f32 %v1190_v0, %v1171_v52  ;;  %v1235_v17 = vsel %vm1233_vm7, %v5659_v58, %v5664_v44  ;;  %v5666_v52 = vld [vmem:[#allocation93_spill] sm:$0xff]  ;;  %v1256_v58 = vsel %vm1233_vm7, %v5662_v24, %v4074_v28 }
 0x219   :  { %v4668_v20 = vpop.permute.xlu0 %1839  ;;  %v1262_v48 = vadd.f32 %v4074_v28, %v1241_v40  ;;  %v1300_v50 = vsel %vm1278_vm8, %v4090_v14, %v5666_v52  ;;  %v2265_v14 = vmul.f32 %v4577_v56, %v4331_v49  ;;  %v5669_v28 = vld [vmem:[#allocation97_spill] sm:$0xff]  ;;  %v2335_v49 = vmul.f32 %v4686_v54, %v4622_v63 }
 0x21a   :  { %v4677_v4 = vpop.permute.xlu1 %1743  ;;  %v1260_v57 = vadd.f32 %v1255_v61, %v1239_v51  ;;  %v1216_v0 = vadd.f32 %v1211_v21, %v1195_v25  ;;  %v5667_v21 = vld [vmem:[#allocation91_spill] sm:$0xff]  ;;  %v1325_v24 = vsel %vm1323_vm9, %v4109_v5, %v5669_v28  ;;  %v5676_v28 = vld [vmem:[#allocation108_spill] sm:$0xff]  ;;  %vm2001_vm7 = vcmask 490496  }
 0x21b   :  { %2298 = vrot.lane.b32.xlu0 %v2290_v16, %s3161_s1  ;;  %v2244_v16 = vmul.f32 %v4518_v62, %v4498_v42  ;;  %v2333_v62 = vmul.f32 %v4686_v54, %v4498_v42  ;;  %v1286_v51 = vadd.f32 %v5667_v21, %v1262_v48  ;;  %v1280_v25 = vsel %vm1278_vm8, %v4082_v33, %v5667_v21 }
 0x21c   :  { %2230 = vrot.lane.b32.xlu1 %v2222_v30, %s3159_s10  ;;  %v1284_v30 = vadd.f32 %v1279_v27, %v1260_v57  ;;  %v1240_v61 = vadd.f32 %v1235_v17, %v1216_v0  ;;  %v1301_v33 = vsel %vm1278_vm8, %v5666_v52, %v5670_v43  ;;  %v5672_v57 = vld [vmem:[#allocation98_spill] sm:$0xff]  ;;  %v4741_v48 = vstv %s4688_s16  ;;  %s3169_s10 = smov 58   ;;  %s3173_s16 = smov [#allocation13]  }
 0x21d   :  { %v4697_v55 = vpop.permute.xlu0 %1860  ;;  %v1307_v27 = vadd.f32 %v5670_v43, %v1286_v51  ;;  %v5675_v51 = vld [vmem:[#allocation100_spill] sm:$0xff]  ;;  %vm2046_vm8 = vcmask 359424  }
 0x21e   :  { %v4706_v2 = vpop.permute.xlu1 %1763  ;;  %v1305_v44 = vadd.f32 %v1300_v50, %v1284_v30  ;;  %v1261_v40 = vadd.f32 %v1256_v58, %v1240_v61  ;;  %v5674_v61 = vld [vmem:[#allocation95_spill] sm:$0xff]  ;;  %v1370_v43 = vsel %vm1368_vm10, %v5676_v28, %v5675_v51 }
 0x21f   :  { %2318 = vrot.lane.b32.xlu0 %v2311_v1, %s3161_s1  ;;  %v1331_v58 = vadd.f32 %v1325_v24, %v1307_v27  ;;  %v1324_v52 = vsel %vm1323_vm9, %v5674_v61, %v4109_v5  ;;  %v5678_v27 = vld [vmem:[#allocation112_spill] sm:$0xff] }
 0x220   :  { %2251 = vrot.lane.b32.xlu1 %v2244_v16, %s3160_s13  ;;  %v5671_v16 = vld [vmem:[#allocation106_spill] sm:$0xff]  ;;  %v1285_v50 = vadd.f32 %v1280_v25, %v1261_v40  ;;  %v1329_v21 = vadd.f32 %v5674_v61, %v1305_v44 }
 0x221   :  { %v4720_v1 = vpop.permute.xlu0 %1864  ;;  %v1346_v0 = vsel %vm1323_vm9, %v5672_v57, %v5671_v16  ;;  %v5679_v16 = vld [vmem:[#allocation102_spill] sm:$0xff] }
 0x222   :  { %5668 = vst [vmem:[#allocation29_spill] sm:$0xff] %v4720_v1  ;;  %v4729_v17 = vpop.permute.xlu1 %1767  ;;  %v1306_v25 = vadd.f32 %v1301_v33, %v1285_v50  ;;  %v1352_v24 = vadd.f32 %v1346_v0, %v1331_v58  ;;  %v1391_v61 = vsel %vm1368_vm10, %v5679_v16, %v5678_v27  ;;  %v4768_v33 = vstv %s4714_s17  ;;  %v5682_v27 = vld [vmem:[#allocation114_spill] sm:$0xff]  ;;  %s2849_s17 = sshll.u32 %s3173_s16, 4  ;;  %s2850_s17 = int_to_ptr.vmem [resolvable:$true] %s2849_s17 }
 0x223   :  { %2339 = vrot.lane.b32.xlu0 %v2333_v62, %s3162_s18  ;;  %v2267_v62 = vmul.f32 %v4577_v56, %v4553_v32  ;;  %v2356_v56 = vmul.f32 %v4741_v48, %v4553_v32  ;;  %p3094_p6 = scmp.lt.s32.totalorder %s2850_s17, %s2850_s17 }
 0x224   :  { %2271 = vrot.lane.b32.xlu1 %v2265_v14, %s3160_s13  ;;  %v5677_v14 = vld [vmem:[#allocation104_spill] sm:$0xff]  ;;  %v1330_v0 = vadd.f32 %v1324_v52, %v1306_v25  ;;  %v1376_v50 = vadd.f32 %v1370_v43, %v1352_v24 }
 0x225   :  { %v4746_v30 = vpop.permute.xlu0 %1884  ;;  %v1345_v44 = vsel %vm1323_vm9, %v5677_v14, %v5672_v57  ;;  %v1350_v5 = vadd.f32 %v5677_v14, %v1329_v21  ;;  %v5680_v57 = vld [vmem:[#allocation99_spill] sm:$0xff]  ;;  %v5681_v14 = vld [vmem:[#allocation105_spill] sm:$0xff]  ;;  %vm2091_vm9 = vcmask 228352  }
 0x226   :  { %5673 = vst [vmem:[#allocation36_spill] sm:$0xff] %v4746_v30  ;;  %v4755_v40 = vpop.permute.xlu1 %1817  ;;  %v1369_v21 = vsel %vm1368_vm10, %v5680_v57, %v5676_v28  ;;  %v1415_v30 = vsel %vm1413_vm11, %v5682_v27, %v5681_v14  ;;  %v1351_v1 = vadd.f32 %v1345_v44, %v1330_v0  ;;  %v1397_v52 = vadd.f32 %v1391_v61, %v1376_v50  ;;  %v5684_v28 = vld [vmem:[#allocation118_spill] sm:$0xff] }
 0x227   :  { %2343 = vrot.lane.b32.xlu0 %v2335_v49, %s3162_s18  ;;  %v2289_v49 = vmul.f32 %v4603_v15, %v4368_v10  ;;  %v1374_v51 = vadd.f32 %v5680_v57, %v1350_v5  ;;  %v2378_v15 = vmul.f32 %v4768_v33, %v4498_v42  ;;  %v5685_v5 = vld [vmem:[#allocation107_spill] sm:$0xff] }
 0x228   :  { %2275 = vrot.lane.b32.xlu1 %v2267_v62, %s3160_s13  ;;  %v5683_v62 = vld [vmem:[#allocation110_spill] sm:$0xff]  ;;  %v1436_v57 = vsel %vm1413_vm11, %v5685_v5, %v5684_v28  ;;  %v1375_v44 = vadd.f32 %v1369_v21, %v1351_v1  ;;  %v1421_v61 = vadd.f32 %v1415_v30, %v1397_v52  ;;  %v5687_v28 = vld [vmem:[#allocation109_spill] sm:$0xff]  ;;  %v5688_v21 = vld [vmem:[#allocation116_spill] sm:$0xff]  ;;  %s3170_s13 = smov 42  }
 0x229   :  { %v4775_v58 = vpop.permute.xlu0 %1905  ;;  %v1390_v25 = vsel %vm1368_vm10, %v5683_v62, %v5679_v16  ;;  %v1395_v24 = vadd.f32 %v5683_v62, %v1374_v51  ;;  %v5686_v16 = vld [vmem:[#allocation103_spill] sm:$0xff]  ;;  %v1488_v1 = vsel %vm1487_vm12, %v5687_v28, %v4216_v12  ;;  %v1435_v52 = vsel %vm1413_vm11, %v5688_v21, %v5685_v5 }
 0x22a   :  { %v4784_v43 = vpop.permute.xlu1 %1837  ;;  %v1414_v51 = vsel %vm1413_vm11, %v5686_v16, %v5682_v27  ;;  %v1396_v14 = vadd.f32 %v1390_v25, %v1375_v44  ;;  %v1442_v62 = vadd.f32 %v1436_v57, %v1421_v61  ;;  %v4820_v25 = vstv %s4770_s19  ;;  %v5689_v57 = vld [vmem:[#allocation113_spill] sm:$0xff] }
 0x22b   :  { %2363 = vrot.lane.b32.xlu0 %v2356_v56, %s3162_s18  ;;  %v2310_v56 = vmul.f32 %v4659_v19, %v4402_v37  ;;  %v1419_v50 = vadd.f32 %v5686_v16, %v1395_v24  ;;  %v1509_v44 = vsel %vm1487_vm12, %v4233_v34, %v5689_v57  ;;  %v5690_v16 = vld [vmem:[#allocation111_spill] sm:$0xff]  ;;  %vm2165_vm10 = vcmask 1006592  }
 0x22c   :  { %2296 = vrot.lane.b32.xlu1 %v2289_v49, %s3161_s1  ;;  %v2380_v49 = vmul.f32 %v4768_v33, %v4622_v63  ;;  %v1420_v24 = vadd.f32 %v1414_v51, %v1396_v14  ;;  %v1489_v5 = vsel %vm1487_vm12, %v4216_v12, %v5690_v16  ;;  %v1495_v51 = vadd.f32 %v5690_v16, %v1442_v62  ;;  %v5691_v14 = vld [vmem:[#allocation115_spill] sm:$0xff] }
 0x22d   :  { %v4801_v0 = vpop.permute.xlu0 %1909  ;;  %v1440_v27 = vadd.f32 %v5688_v21, %v1419_v50  ;;  %v1533_v34 = vsel %vm1532_vm13, %v5691_v14, %v4276_v39  ;;  %v1510_v12 = vsel %vm1487_vm12, %v5689_v57, %v4252_v18  ;;  %v4848_v62 = vstv %s4796_s20 }
 0x22e   :  { %v4810_v30 = vpop.permute.xlu1 %1841  ;;  %v1441_v28 = vadd.f32 %v1435_v52, %v1420_v24  ;;  %v1516_v52 = vadd.f32 %v4252_v18, %v1495_v51  ;;  %v1578_v18 = vsel %vm1577_vm14, %v4225_v47, %v4361_v60  ;;  %v1599_v14 = vsel %vm1577_vm14, %v4395_v36, %v4265_v45 }
 0x22f   :  { %2384 = vrot.lane.b32.xlu0 %v2378_v15, %s3163_s21  ;;  %v2312_v15 = vmul.f32 %v4659_v19, %v4622_v63  ;;  %v1493_v50 = vadd.f32 %v1488_v1, %v1440_v27  ;;  %v2401_v19 = vmul.f32 %v4820_v25, %v4553_v32  ;;  %v2334_v27 = vmul.f32 %v4686_v54, %v4368_v10 }
 0x230   :  { %2316 = vrot.lane.b32.xlu1 %v2310_v56, %s3161_s1  ;;  %v1494_v1 = vadd.f32 %v1489_v5, %v1441_v28  ;;  %v2423_v54 = vmul.f32 %v4848_v62, %v4498_v42  ;;  %v4874_v28 = vld [vmem:[#allocation10 + $0x6] ss:$8 sm:$0xf]  ;;  %v2355_v42 = vmul.f32 %v4741_v48, %v4402_v37  ;;  %vm2210_vm11 = vcmask 875520  }
 0x231   :  { %v4828_v61 = vpop.permute.xlu0 %1929  ;;  %v1514_v56 = vadd.f32 %v1509_v44, %v1493_v50  ;;  %v5692_v44 = vld [vmem:[#allocation117_spill] sm:$0xff]  ;;  %vm2255_vm12 = vcmask 744448  }
 0x232   :  { %v4837_v21 = vpop.permute.xlu1 %1862  ;;  %v1534_v57 = vsel %vm1532_vm13, %v4276_v39, %v5692_v44  ;;  %v1515_v50 = vadd.f32 %v1510_v12, %v1494_v1  ;;  %v1540_v5 = vadd.f32 %v5692_v44, %v1516_v52  ;;  %v1555_v39 = vsel %vm1532_vm13, %v4208_v38, %v4326_v41 }
 0x233   :  { %2388 = vrot.lane.b32.xlu0 %v2380_v49, %s3163_s21  ;;  %v1554_v49 = vsel %vm1532_vm13, %v4298_v53, %v4208_v38  ;;  %v1538_v16 = vadd.f32 %v1533_v34, %v1514_v56  ;;  %v1579_v38 = vsel %vm1577_vm14, %v4361_v60, %v4250_v3  ;;  %v4897_v1 = vstv %s4842_s22 }
 0x234   :  { %2320 = vrot.lane.b32.xlu1 %v2312_v15, %s3161_s1  ;;  %v1539_v51 = vadd.f32 %v1534_v57, %v1515_v50  ;;  %v1561_v47 = vadd.f32 %v4326_v41, %v1540_v5  ;;  %v2425_v41 = vmul.f32 %v4848_v62, %v4622_v63  ;;  %v2469_v52 = vrot.slane %v4874_v28, %v3251_v9  ;;  %s3172_s1 = smov 51  }
 0x235   :  { %v4857_v24 = vpop.permute.xlu0 %1950  ;;  %v1559_v15 = vadd.f32 %v1554_v49, %v1538_v16  ;;  %v1600_v60 = vsel %vm1577_vm14, %v4265_v45, %v4426_v8  ;;  %v1619_v9 = vsel %vm1618_vm15, %v4292_v13, %v4455_v35  ;;  %v2446_v16 = vmul.f32 %v4897_v1, %v4553_v32 }
 0x236   :  { %v4866_v53 = vpop.permute.xlu1 %1882  ;;  %v1560_v56 = vadd.f32 %v1555_v39, %v1539_v51  ;;  %v1585_v12 = vadd.f32 %v4250_v3, %v1561_v47  ;;  %v2357_v3 = vmul.f32 %v4741_v48, %v4622_v63  ;;  %v4919_v5 = vmul.f32 0.0, %v2469_v52  ;;  %v5693_v47 = vld [vmem:[#allocation32_spill] sm:$0xff] }
 0x237   :  { %2408 = vrot.lane.b32.xlu0 %v2401_v19, %s3163_s21  ;;  %v1583_v19 = vadd.f32 %v1578_v18, %v1559_v15  ;;  %v4923_v48 = vrot.slane %v4874_v28, %v3410_v23  ;;  %v4933_v32 = vstv %s4876_s2  ;;  %v2379_v23 = vmul.f32 %v4768_v33, %v4368_v10 }
 0x238   :  { %2341 = vrot.lane.b32.xlu1 %v2334_v27, %s3162_s18  ;;  %v1584_v27 = vadd.f32 %v1579_v38, %v1560_v56  ;;  %v1606_v44 = vadd.f32 %v4426_v8, %v1585_v12  ;;  %v2497_v33 = vmul.f32 %v4933_v32, %v4919_v5  ;;  %v2400_v52 = vmul.f32 %v4820_v25, %v4402_v37 }
 0x239   :  { %v4885_v34 = vpop.permute.xlu0 %1954  ;;  %v1604_v49 = vadd.f32 %v1599_v14, %v1583_v19  ;;  %v1680_v14 = vsel %vm1657_vm0, %v5693_v47, %v4564_v7  ;;  %v5694_v19 = vld [vmem:[#allocation21_spill] sm:$0xff]  ;;  %v1704_v7 = vsel %vm1702_vm1, %v4593_v59, %v4472_v26  ;;  %vm2300_vm13 = vcmask 613376  }
 0x23a   :  { %v4893_v36 = vpop.permute.xlu1 %1886  ;;  %v1605_v45 = vadd.f32 %v1600_v60, %v1584_v27  ;;  %v1625_v50 = vadd.f32 %v4455_v35, %v1606_v44  ;;  %v1659_v35 = vsel %vm1657_vm0, %v4506_v46, %v4382_v6  ;;  %v1658_v6 = vsel %vm1657_vm0, %v4352_v31, %v4506_v46  ;;  %v5696_v26 = vld [vmem:[#allocation25_spill] sm:$0xff] }
 0x23b   :  { %2429 = vrot.lane.b32.xlu0 %v2423_v54, %s3164_s23  ;;  %v1623_v18 = vadd.f32 %v4292_v13, %v1604_v49  ;;  %v1635_v54 = vsel %vm1618_vm15, %v4314_v29, %v4478_v11  ;;  %v1679_v46 = vsel %vm1657_vm0, %v4534_v22, %v5693_v47  ;;  %v5695_v49 = vld [vmem:[#allocation18_spill] sm:$0xff]  ;;  %v1703_v44 = vsel %vm1702_vm1, %v5696_v26, %v4593_v59 }
 0x23c   :  { %2361 = vrot.lane.b32.xlu1 %v2355_v42, %s3162_s18  ;;  %v1624_v15 = vadd.f32 %v1619_v9, %v1605_v45  ;;  %v1641_v39 = vadd.f32 %v4478_v11, %v1625_v50  ;;  %v4975_v60 = vrot.slane %v4874_v28, %v5695_v49  ;;  %v5698_v9 = vld [vmem:[#allocation24_spill] sm:$0xff]  ;;  %vm2345_vm14 = vcmask 482304  }
 0x23d   :  { %v4908_v57 = vpop.permute.xlu0 %1974  ;;  %v1639_v51 = vadd.f32 %v4314_v29, %v1623_v18  ;;  %v4957_v29 = vmul.f32 %v4923_v48, %v5694_v19  ;;  %v5702_v19 = vld [vmem:[#allocation27_spill] sm:$0xff]  ;;  %vm2390_vm15 = vcmask 351232   ;;  %vm2435_vm0 = vcmask 220160  }
 0x23e   :  { %v4916_v8 = vpop.permute.xlu1 %1907  ;;  %v1640_v42 = vadd.f32 %v1635_v54, %v1624_v15  ;;  %v1665_v11 = vadd.f32 %v1659_v35, %v1641_v39  ;;  %v5699_v35 = vld [vmem:[#allocation20_spill] sm:$0xff] }
 0x23f   :  { %2433 = vrot.lane.b32.xlu0 %v2425_v41, %s3164_s23  ;;  %v1663_v41 = vadd.f32 %v4352_v31, %v1639_v51  ;;  %v2499_v54 = vmul.f32 %v4933_v32, %v4957_v29  ;;  %v5700_v15 = vld [vmem:[#allocation28_spill] sm:$0xff] }
 0x240   :  { %2365 = vrot.lane.b32.xlu1 %v2357_v3, %s3162_s18  ;;  %v1664_v56 = vadd.f32 %v1658_v6, %v1640_v42  ;;  %v1686_v12 = vadd.f32 %v1680_v14, %v1665_v11  ;;  %v5697_v3 = vld [vmem:[#allocation40_spill] sm:$0xff]  ;;  %v1724_v39 = vsel %vm1702_vm1, %v5700_v15, %v5698_v9  ;;  %v5001_v6 = vstv %s4935_s24  ;;  %s3089_s18 = scalar_lea.vmem %s2850_s17, 256 }
 0x241   :  { %v4941_v13 = vpop.permute.xlu0 %1995  ;;  %v1684_v27 = vadd.f32 %v4534_v22, %v1663_v41  ;;  %v4991_v22 = vmul.f32 %v4975_v60, %v5699_v35  ;;  %v2402_v42 = vmul.f32 %v4820_v25, %v4622_v63  ;;  %v1748_v41 = vsel %vm1747_vm2, %v5702_v19, %v4677_v4  ;;  %p3090_p5 = scmp.ne.s32.totalorder %s2850_s17, %s3089_s18  ;;  %p3095_p7 = scmp.lt.s32.totalorder %s3089_s18, %s3089_s18 }
 0x242   :  { %v4950_v38 = vpop.permute.xlu1 %1927  ;;  %v1685_v45 = vadd.f32 %v1679_v46, %v1664_v56  ;;  %v1710_v50 = vadd.f32 %v1704_v7, %v1686_v12  ;;  %v5703_v46 = vld [vmem:[#allocation30_spill] sm:$0xff] }
 0x243   :  { %2453 = vrot.lane.b32.xlu0 %v2446_v16, %s3164_s23  ;;  %v1725_v16 = vsel %vm1702_vm1, %v5698_v9, %v5697_v3  ;;  %v1708_v59 = vadd.f32 %v5696_v26, %v1684_v27  ;;  %v1770_v7 = vsel %vm1747_vm2, %v5703_v46, %v4729_v17  ;;  %v2520_v25 = vmul.f32 %v5001_v6, %v4991_v22  ;;  %p3096_p8 = por %p3095_p7, %p3094_p6 }
 0x244   :  { %2386 = vrot.lane.b32.xlu1 %v2379_v23, %s3163_s21  ;;  %v5701_v23 = vld [vmem:[#allocation34_spill] sm:$0xff]  ;;  %v1709_v47 = vadd.f32 %v1703_v44, %v1685_v45  ;;  %v1731_v14 = vadd.f32 %v1725_v16, %v1710_v50  ;;  %v5025_v27 = vstv %s4966_s25  ;;  %v2424_v9 = vmul.f32 %v4848_v62, %v4368_v10 }
 0x245   :  { %v4971_v31 = vpop.permute.xlu0 %1999  ;;  %v1749_v51 = vsel %vm1747_vm2, %v4677_v4, %v5701_v23  ;;  %v1769_v4 = vsel %vm1747_vm2, %v4706_v2, %v5703_v46  ;;  %v5704_v44 = vld [vmem:[#allocation38_spill] sm:$0xff]  ;;  %v2542_v10 = vmul.f32 %v5025_v27, %v4919_v5  ;;  %v2445_v23 = vmul.f32 %v4897_v1, %v4402_v37  ;;  %p3097_p9 = pnand %p3096_p8, %p3090_p5 }
 0x246   :  { %v4984_v18 = vpop.permute.xlu1 %1931  ;;  %v1730_v56 = vadd.f32 %v1724_v39, %v1709_v47  ;;  %v1755_v12 = vadd.f32 %v1749_v51, %v1731_v14  ;;  %v1822_v3 = vsel %vm1821_vm3, %v5704_v44, %v4755_v40  ;;  %v5705_v50 = vld [vmem:[#allocation26_spill] sm:$0xff]  ;;  %v5706_v14 = vld [vmem:[#allocation29_spill] sm:$0xff]  ;;  %v2544_v37 = vmul.f32 %v5025_v27, %v4957_v29 }
 0x247   :  { %2503 = vrot.lane.b32.xlu0 %v2497_v33, %s3165_s26  ;;  %v1729_v33 = vadd.f32 %v5700_v15, %v1708_v59  ;;  %v1843_v59 = vsel %vm1821_vm3, %v4784_v43, %v4668_v20  ;;  %v1867_v43 = vsel %vm1866_vm4, %v4697_v55, %v4837_v21  ;;  %vm2509_vm1 = vcmask 998400  }
 0x248   :  { %2406 = vrot.lane.b32.xlu1 %v2400_v52, %s3163_s21  ;;  %v1754_v17 = vadd.f32 %v1748_v41, %v1730_v56  ;;  %v1776_v26 = vadd.f32 %v1770_v7, %v1755_v12  ;;  %v2447_v7 = vmul.f32 %v4897_v1, %v4622_v63  ;;  %v1912_v12 = vsel %vm1911_vm5, %v4775_v58, %v4916_v8 }
 0x249   :  { %v5006_v11 = vpop.permute.xlu0 %2019  ;;  %v1753_v52 = vadd.f32 %v5702_v19, %v1729_v33  ;;  %v5707_v19 = vld [vmem:[#allocation36_spill] sm:$0xff]  ;;  %v1913_v63 = vsel %vm1911_vm5, %v4916_v8, %v4801_v0  ;;  %v1933_v58 = vsel %vm1911_vm5, %v4950_v38, %v4828_v61  ;;  %v5106_v8 = vstv %s5052_s28 }
 0x24a   :  { %v5015_v49 = vpop.permute.xlu1 %1952  ;;  %v1775_v35 = vadd.f32 %v1769_v4, %v1754_v17  ;;  %v1888_v55 = vsel %vm1866_vm4, %v4866_v53, %v5707_v19  ;;  %vm2554_vm2 = vcmask 867328  }
 0x24b   :  { %2507 = vrot.lane.b32.xlu0 %v2499_v54, %s3165_s26  ;;  %v1774_v45 = vadd.f32 %v4706_v2, %v1753_v52  ;;  %v1823_v54 = vsel %vm1821_vm3, %v4755_v40, %v5705_v50  ;;  %v1844_v2 = vsel %vm1821_vm3, %v4668_v20, %v4810_v30  ;;  %v1829_v40 = vadd.f32 %v5705_v50, %v1776_v26 }
 0x24c   :  { %2410 = vrot.lane.b32.xlu1 %v2402_v42, %s3163_s21  ;;  %v1828_v39 = vadd.f32 %v1823_v54, %v1775_v35  ;;  %v1868_v20 = vsel %vm1866_vm4, %v4837_v21, %v5706_v14  ;;  %v1889_v21 = vsel %vm1866_vm4, %v5707_v19, %v4893_v36  ;;  %v1957_v35 = vsel %vm1956_vm6, %v4857_v24, %v5015_v49 }
 0x24d   :  { %v5035_v16 = vpop.permute.xlu0 %2040  ;;  %v1827_v62 = vadd.f32 %v1822_v3, %v1774_v45  ;;  %v1850_v33 = vadd.f32 %v4810_v30, %v1829_v40  ;;  %v5079_v30 = vstv %s5027_s27  ;;  %v5709_v40 = vld [vmem:[#allocation23_spill] sm:$0xff]  ;;  %vm2599_vm3 = vcmask 736256  }
 0x24e   :  { %v5044_v15 = vpop.permute.xlu1 %1972  ;;  %v1849_v42 = vadd.f32 %v1844_v2, %v1828_v39  ;;  %v5138_v39 = vmul.f32 %v4923_v48, %v5709_v40  ;;  %v2589_v48 = vmul.f32 %v5106_v8, %v4957_v29  ;;  %vm2644_vm4 = vcmask 605184  }
 0x24f   :  { %2527 = vrot.lane.b32.xlu0 %v2520_v25, %s3165_s26  ;;  %v1848_v47 = vadd.f32 %v1843_v59, %v1827_v62  ;;  %v1874_v56 = vadd.f32 %v5706_v14, %v1850_v33  ;;  %v5708_v25 = vld [vmem:[#allocation19_spill] sm:$0xff]  ;;  %v1978_v62 = vsel %vm1956_vm6, %v5044_v15, %v4908_v57 }
 0x250   :  { %2431 = vrot.lane.b32.xlu1 %v2424_v9, %s3164_s23  ;;  %v1873_v53 = vadd.f32 %v1868_v20, %v1849_v42  ;;  %v5088_v52 = vmul.f32 %v4975_v60, %v5708_v25  ;;  %v2565_v60 = vmul.f32 %v5079_v30, %v4991_v22  ;;  %v1934_v9 = vsel %vm1911_vm5, %v4828_v61, %v4984_v18 }
 0x251   :  { %v5061_v51 = vpop.permute.xlu0 %2044  ;;  %v1872_v46 = vadd.f32 %v1867_v43, %v1848_v47  ;;  %v1895_v26 = vadd.f32 %v4893_v36, %v1874_v56  ;;  %v1958_v61 = vsel %vm1956_vm6, %v5015_v49, %v4885_v34  ;;  %vm2689_vm5 = vcmask 474112  }
 0x252   :  { %v1977_v41 = vpop.permute.xlu1 %1976  ;;  %v1894_v1 = vadd.f32 %v1889_v21, %v1873_v53  ;;  %v2498_v38 = vmul.f32 %v4933_v32, %v5088_v52  ;;  %v2587_v32 = vmul.f32 %v5106_v8, %v4919_v5  ;;  %v5710_v21 = vld [vmem:[#allocation22_spill] sm:$0xff] }
 0x253   :  { %2548 = vrot.lane.b32.xlu0 %v2542_v10, %s3166_s29  ;;  %v1893_v17 = vadd.f32 %v1888_v55, %v1872_v46  ;;  %v1919_v36 = vadd.f32 %v4801_v0, %v1895_v26  ;;  %v1979_v2 = vsel %vm1956_vm6, %v4908_v57, %v1977_v41  ;;  %v5156_v55 = vstv %s5108_s30 }
 0x254   :  { %2451 = vrot.lane.b32.xlu1 %v2445_v23, %s3164_s23  ;;  %v1918_v45 = vadd.f32 %v1913_v63, %v1894_v1  ;;  %v5174_v63 = vstv %s5131_s4  ;;  %v2543_v1 = vmul.f32 %v5025_v27, %v5088_v52  ;;  %v2564_v27 = vmul.f32 %v5079_v30, %v4919_v5 }
 0x255   :  { %v5090_v4 = vpop.permute.xlu0 %2064  ;;  %v1917_v3 = vadd.f32 %v1912_v12, %v1893_v17  ;;  %v1940_v0 = vadd.f32 %v4984_v18, %v1919_v36  ;;  %v2519_v18 = vmul.f32 %v5001_v6, %v4919_v5  ;;  %v2610_v12 = vmul.f32 %v5156_v55, %v4991_v22 }
 0x256   :  { %v1998_v44 = vpop.permute.xlu1 %1997  ;;  %v1939_v59 = vadd.f32 %v1934_v9, %v1918_v45  ;;  %vm2734_vm6 = vcmask 343040  }
 0x257   :  { %2552 = vrot.lane.b32.xlu0 %v2544_v37, %s3166_s29  ;;  %v1938_v54 = vadd.f32 %v1933_v58, %v1917_v3  ;;  %v1964_v49 = vadd.f32 %v1958_v61, %v1940_v0  ;;  %v2002_v57 = vsel %vm2001_vm7, %v4941_v13, %v1998_v44  ;;  %v2003_v47 = vsel %vm2001_vm7, %v1998_v44, %v4971_v31 }
 0x258   :  { %2455 = vrot.lane.b32.xlu1 %v2447_v7, %s3164_s23  ;;  %v1963_v34 = vadd.f32 %v1957_v35, %v1939_v59  ;;  %v2521_v37 = vmul.f32 %v5001_v6, %v5138_v39  ;;  %v2481_v7 = vrot.slane %v4874_v28, %v5710_v21  ;;  %v5198_v61 = vstv %s2950_s0 }
 0x259   :  { %v5114_v50 = vpop.permute.xlu0 %2085  ;;  %v1962_v23 = vadd.f32 %v4857_v24, %v1938_v54  ;;  %v1985_v20 = vadd.f32 %v1979_v2, %v1964_v49  ;;  %v2566_v0 = vmul.f32 %v5079_v30, %v5138_v39  ;;  %v2588_v30 = vmul.f32 %v5106_v8, %v5088_v52 }
 0x25a   :  { %v2018_v10 = vpop.permute.xlu1 %2017  ;;  %v1984_v14 = vadd.f32 %v1978_v62, %v1963_v34  ;;  %v5182_v44 = vmul.f32 0.0, %v2481_v7  ;;  %v2655_v62 = vmul.f32 %v5198_v61, %v5138_v39  ;;  %v5210_v34 = vstv %s2951_s6 }
 0x25b   :  { %2572 = vrot.lane.b32.xlu0 %v2565_v60, %s3166_s29  ;;  %v1983_v33 = vadd.f32 %v5044_v15, %v1962_v23  ;;  %v2023_v24 = vsel %vm2001_vm7, %v2018_v10, %v5006_v11  ;;  %v2009_v41 = vadd.f32 %v2003_v47, %v1985_v20  ;;  %v5239_v21 = vstv %s2953_s9 }
 0x25c   :  { %2505 = vrot.lane.b32.xlu1 %v2498_v38, %s3165_s26  ;;  %v2008_v31 = vadd.f32 %v2002_v57, %v1984_v14  ;;  %v2634_v54 = vmul.f32 %v5174_v63, %v5182_v44  ;;  %v2609_v14 = vmul.f32 %v5156_v55, %v4919_v5  ;;  %v2611_v5 = vmul.f32 %v5156_v55, %v5138_v39 }
 0x25d   :  { %v5140_v43 = vpop.permute.xlu0 %2089  ;;  %v2007_v15 = vadd.f32 %v4941_v13, %v1983_v33  ;;  %v5228_v33 = vstv %s2952_s8  ;;  %v2633_v55 = vmul.f32 %v5174_v63, %v4957_v29 }
 0x25e   :  { %v2022_v42 = vpop.permute.xlu1 %2021  ;;  %v2029_v56 = vadd.f32 %v2023_v24, %v2008_v31 }
 0x25f   :  { %2593 = vrot.lane.b32.xlu0 %v2587_v32, %s3167_s5  ;;  %v2024_v19 = vsel %vm2001_vm7, %v5006_v11, %v2022_v42  ;;  %v2028_v25 = vadd.f32 %v2018_v10, %v2007_v15  ;;  %v2679_v42 = vmul.f32 %v5210_v34, %v5182_v44  ;;  %vm2779_vm7 = vcmask 211968  }
 0x260   :  { %2525 = vrot.lane.b32.xlu1 %v2519_v18, %s3165_s26  ;;  %v2030_v11 = vadd.f32 %v2024_v19, %v2009_v41 }
 0x261   :  { %v5161_v46 = vpop.permute.xlu0 %2109  ;;  %v2052_v58 = vadd.f32 %v5035_v16, %v2028_v25 }
 0x262   :  { %v2043_v53 = vpop.permute.xlu1 %2042 }
 0x263   :  { %2597 = vrot.lane.b32.xlu0 %v2589_v48, %s3167_s5  ;;  %v2047_v17 = vsel %vm2046_vm8, %v5035_v16, %v2043_v53  ;;  %v2048_v6 = vsel %vm2046_vm8, %v2043_v53, %v5061_v51  ;;  %v2632_v51 = vmul.f32 %v5174_v63, %v5088_v52  ;;  %v2724_v63 = vmul.f32 %v5239_v21, %v5182_v44 }
 0x264   :  { %v2053_v13 = vadd.f32 %v2047_v17, %v2029_v56  ;;  %v2054_v28 = vadd.f32 %v2048_v6, %v2030_v11  ;;  %2529 = vrot.lane.b32.xlu1 %v2521_v37, %s3165_s26  ;;  %v2700_v37 = vmul.f32 %v5228_v33, %v5138_v39  ;;  %v2654_v6 = vmul.f32 %v5198_v61, %v4991_v22 }
 0x265   :  { %v5179_v26 = vpop.permute.xlu0 %2159 }
 0x266   :  { %v2063_v60 = vpop.permute.xlu1 %2062 }
 0x267   :  { %2617 = vrot.lane.b32.xlu0 %v2610_v12, %s3167_s5  ;;  %v2068_v3 = vsel %vm2046_vm8, %v2063_v60, %v5090_v4  ;;  %v2073_v9 = vadd.f32 %v2063_v60, %v2052_v58  ;;  %v2722_v12 = vmul.f32 %v5239_v21, %v5088_v52  ;;  %v5255_v58 = vstv %s2954_s11 }
 0x268   :  { %v2074_v36 = vadd.f32 %v2068_v3, %v2053_v13  ;;  %2550 = vrot.lane.b32.xlu1 %v2543_v1, %s3166_s29 }
 0x269   :  { %v2164_v16 = vpop.permute.xlu0 %2163  ;;  %v2097_v45 = vadd.f32 %v5114_v50, %v2073_v9 }
 0x26a   :  { %v2067_v38 = vpop.permute.xlu1 %2066 }
 0x26b   :  { %2638 = vrot.lane.b32.xlu0 %v2632_v51, %s3168_s7  ;;  %v2069_v35 = vsel %vm2046_vm8, %v5090_v4, %v2067_v38  ;;  %v2656_v51 = vmul.f32 %v5198_v61, %v5182_v44  ;;  %v2766_v38 = vstv %s2955_s12  ;;  %v2678_v61 = vmul.f32 %v5210_v34, %v4957_v29 }
 0x26c   :  { %v2075_v59 = vadd.f32 %v2069_v35, %v2054_v28  ;;  %2570 = vrot.lane.b32.xlu1 %v2564_v27, %s3166_s29  ;;  %v2745_v27 = vmul.f32 %v5255_v58, %v5138_v39  ;;  %vm2836_vm8 = vcmask 416768  }
 0x26d   :  { %v2184_v10 = vpop.permute.xlu0 %2183 }
 0x26e   :  { %v2088_v32 = vpop.permute.xlu1 %2087 }
 0x26f   :  { %2642 = vrot.lane.b32.xlu0 %v2634_v54, %s3168_s7  ;;  %v2092_v2 = vsel %vm2091_vm9, %v5114_v50, %v2088_v32  ;;  %v2093_v4 = vsel %vm2091_vm9, %v2088_v32, %v5140_v43  ;;  %v2677_v50 = vmul.f32 %v5210_v34, %v5088_v52  ;;  %v2769_v34 = vmul.f32 %v2766_v38, %v5182_v44 }
 0x270   :  { %v2098_v49 = vadd.f32 %v2092_v2, %v2074_v36  ;;  %v2099_v18 = vadd.f32 %v2093_v4, %v2075_v59  ;;  %2574 = vrot.lane.b32.xlu1 %v2566_v0, %s3166_s29  ;;  %v2699_v2 = vmul.f32 %v5228_v33, %v4991_v22 }
 0x271   :  { %v2205_v40 = vpop.permute.xlu0 %2204 }
 0x272   :  { %v2108_v23 = vpop.permute.xlu1 %2107 }
 0x273   :  { %2662 = vrot.lane.b32.xlu0 %v2655_v62, %s3168_s7  ;;  %v2113_v43 = vsel %vm2091_vm9, %v2108_v23, %v5161_v46  ;;  %v2118_v57 = vadd.f32 %v2108_v23, %v2097_v45  ;;  %v2701_v23 = vmul.f32 %v5228_v33, %v5182_v44 }
 0x274   :  { %v2119_v47 = vadd.f32 %v2113_v43, %v2098_v49  ;;  %2595 = vrot.lane.b32.xlu1 %v2588_v30, %s3167_s5 }
 0x275   :  { %v2209_v20 = vpop.permute.xlu0 %2208 }
 0x276   :  { %v2112_v8 = vpop.permute.xlu1 %2111 }
 0x277   :  { %2683 = vrot.lane.b32.xlu0 %v2677_v50, %s3169_s10  ;;  %v2114_v48 = vsel %vm2091_vm9, %v5161_v46, %v2112_v8 }
 0x278   :  { %v2120_v24 = vadd.f32 %v2114_v48, %v2099_v18  ;;  %2615 = vrot.lane.b32.xlu1 %v2609_v14, %s3167_s5  ;;  %v2723_v48 = vmul.f32 %v5239_v21, %v4957_v29  ;;  %v2746_v21 = vmul.f32 %v5255_v58, %v5182_v44 }
 0x279   :  { %v2229_v19 = vpop.permute.xlu0 %2228 }
 0x27a   :  { %v2173_v31 = vadd.f32 %v2164_v16, %v2120_v24  ;;  %v2162_v41 = vpop.permute.xlu1 %2161 }
 0x27b   :  { %2687 = vrot.lane.b32.xlu0 %v2679_v42, %s3169_s10  ;;  %v2166_v46 = vsel %vm2165_vm10, %v5179_v26, %v2162_v41  ;;  %v2167_v15 = vsel %vm2165_vm10, %v2162_v41, %v2164_v16 }
 0x27c   :  { %v2171_v7 = vadd.f32 %v2166_v46, %v2118_v57  ;;  %v2172_v56 = vadd.f32 %v2167_v15, %v2119_v47  ;;  %2619 = vrot.lane.b32.xlu1 %v2611_v5, %s3167_s5 }
 0x27d   :  { %v2250_v11 = vpop.permute.xlu0 %2249 }
 0x27e   :  { %v2182_v53 = vpop.permute.xlu1 %2181 }
 0x27f   :  { %2707 = vrot.lane.b32.xlu0 %v2700_v37, %s3169_s10  ;;  %v2187_v25 = vsel %vm2165_vm10, %v2182_v53, %v2184_v10 }
 0x280   :  { %v2192_v17 = vadd.f32 %v2187_v25, %v2171_v7  ;;  %2640 = vrot.lane.b32.xlu1 %v2633_v55, %s3168_s7 }
 0x281   :  { %v2254_v13 = vpop.permute.xlu0 %2253 }
 0x282   :  { %v2186_v28 = vpop.permute.xlu1 %2185 }
 0x283   :  { %2728 = vrot.lane.b32.xlu0 %v2722_v12, %s3170_s13  ;;  %v2188_v1 = vsel %vm2165_vm10, %v2184_v10, %v2186_v28  ;;  %v2194_v26 = vadd.f32 %v2186_v28, %v2173_v31  ;;  %v2767_v10 = vmul.f32 %v2766_v38, %v5088_v52 }
 0x284   :  { %v2193_v60 = vadd.f32 %v2188_v1, %v2172_v56  ;;  %2660 = vrot.lane.b32.xlu1 %v2654_v6, %s3168_s7 }
 0x285   :  { %v2274_v3 = vpop.permute.xlu0 %2273  ;;  %v2218_v9 = vadd.f32 %v2209_v20, %v2194_v26 }
 0x286   :  { %v2207_v36 = vpop.permute.xlu1 %2206 }
 0x287   :  { %2732 = vrot.lane.b32.xlu0 %v2724_v63, %s3170_s13  ;;  %v2211_v16 = vsel %vm2210_vm11, %v2205_v40, %v2207_v36  ;;  %v2212_v45 = vsel %vm2210_vm11, %v2207_v36, %v2209_v20  ;;  %v2788_v40 = vstv %s2956_s14 }
 0x288   :  { %v2216_v54 = vadd.f32 %v2211_v16, %v2192_v17  ;;  %v2217_v35 = vadd.f32 %v2212_v45, %v2193_v60  ;;  %2664 = vrot.lane.b32.xlu1 %v2656_v51, %s3168_s7  ;;  %v2790_v47 = vmul.f32 %v2788_v40, %v5138_v39  ;;  %v2744_v39 = vmul.f32 %v5255_v58, %v4991_v22 }
 0x289   :  { %v2295_v59 = vpop.permute.xlu0 %2294  ;;  %v2768_v17 = vmul.f32 %v2766_v38, %v4957_v29  ;;  %v2789_v26 = vmul.f32 %v2788_v40, %v4991_v22  ;;  %v2791_v29 = vmul.f32 %v2788_v40, %v5182_v44 }
 0x28a   :  { %v2227_v0 = vpop.permute.xlu1 %2226 }
 0x28b   :  { %2752 = vrot.lane.b32.xlu0 %v2745_v27, %s3170_s13  ;;  %v2232_v32 = vsel %vm2210_vm11, %v2227_v0, %v2229_v19 }
 0x28c   :  { %v2237_v62 = vadd.f32 %v2232_v32, %v2216_v54  ;;  %2685 = vrot.lane.b32.xlu1 %v2678_v61, %s3169_s10 }
 0x28d   :  { %v2299_v4 = vpop.permute.xlu0 %2298 }
 0x28e   :  { %v2231_v49 = vpop.permute.xlu1 %2230 }
 0x28f   :  { %2773 = vrot.lane.b32.xlu0 %v2767_v10, %s3171_s15  ;;  %v2233_v18 = vsel %vm2210_vm11, %v2229_v19, %v2231_v49  ;;  %v2239_v30 = vadd.f32 %v2231_v49, %v2218_v9 }
 0x290   :  { %v2238_v52 = vadd.f32 %v2233_v18, %v2217_v35  ;;  %2705 = vrot.lane.b32.xlu1 %v2699_v2, %s3169_s10 }
 0x291   :  { %v2319_v50 = vpop.permute.xlu0 %2318  ;;  %v2263_v43 = vadd.f32 %v2254_v13, %v2239_v30 }
 0x292   :  { %v2252_v57 = vpop.permute.xlu1 %2251 }
 0x293   :  { %2777 = vrot.lane.b32.xlu0 %v2769_v34, %s3171_s15  ;;  %v2256_v14 = vsel %vm2255_vm12, %v2250_v11, %v2252_v57  ;;  %v2257_v20 = vsel %vm2255_vm12, %v2252_v57, %v2254_v13 }
 0x294   :  { %v2261_v8 = vadd.f32 %v2256_v14, %v2237_v62  ;;  %v2262_v42 = vadd.f32 %v2257_v20, %v2238_v52  ;;  %2709 = vrot.lane.b32.xlu1 %v2701_v23, %s3169_s10 }
 0x295   :  { %v2340_v24 = vpop.permute.xlu0 %2339 }
 0x296   :  { %v2272_v33 = vpop.permute.xlu1 %2271 }
 0x297   :  { %2797 = vrot.lane.b32.xlu0 %v2790_v47, %s3171_s15  ;;  %v2277_v5 = vsel %vm2255_vm12, %v2272_v33, %v2274_v3 }
 0x298   :  { %v2282_v19 = vadd.f32 %v2277_v5, %v2261_v8  ;;  %2730 = vrot.lane.b32.xlu1 %v2723_v48, %s3170_s13 }
 0x299   :  { %v2344_v31 = vpop.permute.xlu0 %2343 }
 0x29a   :  { %v2306_v41 = vadd.f32 %v2295_v59, %v2282_v19  ;;  %v2276_v37 = vpop.permute.xlu1 %2275 }
 0x29b   :  { %v2278_v46 = vsel %vm2255_vm12, %v2274_v3, %v2276_v37  ;;  %v2284_v15 = vadd.f32 %v2276_v37, %v2263_v43 }
 0x29c   :  { %v2283_v7 = vadd.f32 %v2278_v46, %v2262_v42  ;;  %2750 = vrot.lane.b32.xlu1 %v2744_v39, %s3170_s13 }
 0x29d   :  { %v2364_v56 = vpop.permute.xlu0 %2363 }
 0x29e   :  { %v2297_v55 = vpop.permute.xlu1 %2296 }
 0x29f   :  { %v2301_v11 = vsel %vm2300_vm13, %v2295_v59, %v2297_v55  ;;  %v2302_v53 = vsel %vm2300_vm13, %v2297_v55, %v2299_v4 }
 0x2a0   :  { %v2307_v12 = vadd.f32 %v2301_v11, %v2283_v7  ;;  %v2308_v25 = vadd.f32 %v2302_v53, %v2284_v15  ;;  %2754 = vrot.lane.b32.xlu1 %v2746_v21, %s3170_s13 }
 0x2a1   :  { %v2385_v6 = vpop.permute.xlu0 %2384 }
 0x2a2   :  { %v2317_v13 = vpop.permute.xlu1 %2316 }
 0x2a3   :  { %v2322_v28 = vsel %vm2300_vm13, %v2317_v13, %v2319_v50  ;;  %v2327_v63 = vadd.f32 %v2317_v13, %v2306_v41 }
 0x2a4   :  { %v2328_v1 = vadd.f32 %v2322_v28, %v2307_v12  ;;  %2775 = vrot.lane.b32.xlu1 %v2768_v17, %s3171_s15 }
 0x2a5   :  { %v2389_v58 = vpop.permute.xlu0 %2388  ;;  %v2351_v60 = vadd.f32 %v2340_v24, %v2327_v63 }
 0x2a6   :  { %v2321_v51 = vpop.permute.xlu1 %2320 }
 0x2a7   :  { %v2323_v3 = vsel %vm2300_vm13, %v2319_v50, %v2321_v51 }
 0x2a8   :  { %v2329_v9 = vadd.f32 %v2323_v3, %v2308_v25  ;;  %2795 = vrot.lane.b32.xlu1 %v2789_v26, %s3171_s15 }
 0x2a9   :  { %v2409_v36 = vpop.permute.xlu0 %2408 }
 0x2aa   :  { %v2342_v27 = vpop.permute.xlu1 %2341 }
 0x2ab   :  { %v2346_v16 = vsel %vm2345_vm14, %v2340_v24, %v2342_v27  ;;  %v2347_v45 = vsel %vm2345_vm14, %v2342_v27, %v2344_v31 }
 0x2ac   :  { %v2352_v38 = vadd.f32 %v2346_v16, %v2328_v1  ;;  %v2353_v54 = vadd.f32 %v2347_v45, %v2329_v9  ;;  %2799 = vrot.lane.b32.xlu1 %v2791_v29, %s3171_s15 }
 0x2ad   :  { %v2430_v22 = vpop.permute.xlu0 %2429 }
 0x2ae   :  { %v2362_v35 = vpop.permute.xlu1 %2361 }
 0x2af   :  { %v2367_v61 = vsel %vm2345_vm14, %v2362_v35, %v2364_v56  ;;  %v2372_v59 = vadd.f32 %v2362_v35, %v2351_v60 }
 0x2b0   :  { %v2373_v0 = vadd.f32 %v2367_v61, %v2352_v38 }
 0x2b1   :  { %v2434_v10 = vpop.permute.xlu0 %2433  ;;  %v2396_v32 = vadd.f32 %v2385_v6, %v2372_v59 }
 0x2b2   :  { %v2366_v62 = vpop.permute.xlu1 %2365 }
 0x2b3   :  { %v2368_v44 = vsel %vm2345_vm14, %v2364_v56, %v2366_v62 }
 0x2b4   :  { %v2374_v2 = vadd.f32 %v2368_v44, %v2353_v54 }
 0x2b5   :  { %v2454_v4 = vpop.permute.xlu0 %2453 }
 0x2b6   :  { %v2387_v49 = vpop.permute.xlu1 %2386 }
 0x2b7   :  { %v2391_v34 = vsel %vm2390_vm15, %v2385_v6, %v2387_v49  ;;  %v2392_v18 = vsel %vm2390_vm15, %v2387_v49, %v2389_v58 }
 0x2b8   :  { %v2397_v30 = vadd.f32 %v2391_v34, %v2373_v0  ;;  %v2398_v40 = vadd.f32 %v2392_v18, %v2374_v2 }
 0x2b9   :  { %v2504_v52 = vpop.permute.xlu0 %2503 }
 0x2ba   :  { %v2407_v23 = vpop.permute.xlu1 %2406 }
 0x2bb   :  { %v2412_v50 = vsel %vm2390_vm15, %v2407_v23, %v2409_v36  ;;  %v2417_v43 = vadd.f32 %v2407_v23, %v2396_v32 }
 0x2bc   :  { %v2418_v57 = vadd.f32 %v2412_v50, %v2397_v30 }
 0x2bd   :  { %v5311_v47 = vpop.permute.xlu0 %2507  ;;  %v2441_v51 = vadd.f32 %v2430_v22, %v2417_v43 }
 0x2be   :  { %v2411_v14 = vpop.permute.xlu1 %2410 }
 0x2bf   :  { %v2413_v20 = vsel %vm2390_vm15, %v2409_v36, %v2411_v14 }
 0x2c0   :  { %v2419_v8 = vadd.f32 %v2413_v20, %v2398_v40 }
 0x2c1   :  { %v2528_v42 = vpop.permute.xlu0 %2527 }
 0x2c2   :  { %v2432_v48 = vpop.permute.xlu1 %2431 }
 0x2c3   :  { %v2436_v3 = vsel %vm2435_vm0, %v2430_v22, %v2432_v48  ;;  %v2437_v29 = vsel %vm2435_vm0, %v2432_v48, %v2434_v10 }
 0x2c4   :  { %v2442_v16 = vadd.f32 %v2436_v3, %v2418_v57  ;;  %v2443_v59 = vadd.f32 %v2437_v29, %v2419_v8 }
 0x2c5   :  { %v2549_v24 = vpop.permute.xlu0 %2548 }
 0x2c6   :  { %v2452_v33 = vpop.permute.xlu1 %2451 }
 0x2c7   :  { %v2457_v36 = vsel %vm2435_vm0, %v2452_v33, %v2454_v4  ;;  %v2462_v27 = vadd.f32 %v2452_v33, %v2441_v51 }
 0x2c8   :  { %v2463_v0 = vadd.f32 %v2457_v36, %v2442_v16 }
 0x2c9   :  { %v5313_v5 = vpop.permute.xlu0 %2552 }
 0x2ca   :  { %v2456_v19 = vpop.permute.xlu1 %2455 }
 0x2cb   :  { %v2458_v54 = vsel %vm2435_vm0, %v2454_v4, %v2456_v19 }
 0x2cc   :  { %v2464_v44 = vadd.f32 %v2458_v54, %v2443_v59 }
 0x2cd   :  { %v2573_v39 = vpop.permute.xlu0 %2572 }
 0x2ce   :  { %v2506_v31 = vpop.permute.xlu1 %2505  ;;  %v2517_v50 = vadd.f32 %v5311_v47, %v2464_v44 }
 0x2cf   :  { %v2510_v9 = vsel %vm2509_vm1, %v2504_v52, %v2506_v31  ;;  %v2511_v35 = vsel %vm2509_vm1, %v2506_v31, %v5311_v47 }
 0x2d0   :  { %v2515_v61 = vadd.f32 %v2510_v9, %v2462_v27  ;;  %v2516_v2 = vadd.f32 %v2511_v35, %v2463_v0 }
 0x2d1   :  { %v2594_v41 = vpop.permute.xlu0 %2593 }
 0x2d2   :  { %v2526_v37 = vpop.permute.xlu1 %2525 }
 0x2d3   :  { %v2531_v45 = vsel %vm2509_vm1, %v2526_v37, %v2528_v42 }
 0x2d4   :  { %v2536_v62 = vadd.f32 %v2531_v45, %v2515_v61 }
 0x2d5   :  { %v5315_v46 = vpop.permute.xlu0 %2597 }
 0x2d6   :  { %v2530_v15 = vpop.permute.xlu1 %2529 }
 0x2d7   :  { %v2532_v10 = vsel %vm2509_vm1, %v2528_v42, %v2530_v15  ;;  %v2538_v48 = vadd.f32 %v2530_v15, %v2517_v50 }
 0x2d8   :  { %v2537_v30 = vadd.f32 %v2532_v10, %v2516_v2 }
 0x2d9   :  { %v2618_v7 = vpop.permute.xlu0 %2617 }
 0x2da   :  { %v2551_v21 = vpop.permute.xlu1 %2550 }
 0x2db   :  { %v2555_v32 = vsel %vm2554_vm2, %v2549_v24, %v2551_v21  ;;  %v2556_v4 = vsel %vm2554_vm2, %v2551_v21, %v5313_v5 }
 0x2dc   :  { %v2560_v18 = vadd.f32 %v2555_v32, %v2536_v62  ;;  %v2561_v43 = vadd.f32 %v2556_v4, %v2537_v30 }
 0x2dd   :  { %v5317_v56 = vpop.permute.xlu0 %2638 }
 0x2de   :  { %v2571_v55 = vpop.permute.xlu1 %2570 }
 0x2df   :  { %v2576_v49 = vsel %vm2554_vm2, %v2571_v55, %v2573_v39 }
 0x2e0   :  { %v2581_v52 = vadd.f32 %v2576_v49, %v2560_v18 }
 0x2e1   :  { %v5319_v11 = vpop.permute.xlu0 %2642 }
 0x2e2   :  { %v2575_v53 = vpop.permute.xlu1 %2574 }
 0x2e3   :  { %v2577_v23 = vsel %vm2554_vm2, %v2573_v39, %v2575_v53  ;;  %v2562_v39 = vadd.f32 %v5313_v5, %v2538_v48 }
 0x2e4   :  { %v2582_v24 = vadd.f32 %v2577_v23, %v2561_v43 }
 0x2e5   :  { %v5321_v12 = vpop.permute.xlu0 %2662  ;;  %v2583_v37 = vadd.f32 %v2575_v53, %v2562_v39 }
 0x2e6   :  { %v2596_v25 = vpop.permute.xlu1 %2595 }
 0x2e7   :  { %v2600_v40 = vsel %vm2599_vm3, %v2594_v41, %v2596_v25  ;;  %v2601_v8 = vsel %vm2599_vm3, %v2596_v25, %v5315_v46 }
 0x2e8   :  { %v2605_v42 = vadd.f32 %v2600_v40, %v2581_v52  ;;  %v2606_v31 = vadd.f32 %v2601_v8, %v2582_v24 }
 0x2e9   :  { %v5323_v17 = vpop.permute.xlu0 %2683 }
 0x2ea   :  { %v2616_v6 = vpop.permute.xlu1 %2615 }
 0x2eb   :  { %v2621_v57 = vsel %vm2599_vm3, %v2616_v6, %v2618_v7  ;;  %v2607_v6 = vadd.f32 %v5315_v46, %v2583_v37 }
 0x2ec   :  { %v2626_v33 = vadd.f32 %v2621_v57, %v2605_v42 }
 0x2ed   :  { %v5327_v28 = vpop.permute.xlu0 %2687 }
 0x2ee   :  { %v5325_v13 = vpop.permute.xlu1 %2619  ;;  %v2650_v15 = vadd.f32 %v5317_v56, %v2626_v33 }
 0x2ef   :  { %v2622_v19 = vsel %vm2599_vm3, %v2618_v7, %v5325_v13  ;;  %v2628_v9 = vadd.f32 %v5325_v13, %v2607_v6 }
 0x2f0   :  { %v2627_v21 = vadd.f32 %v2622_v19, %v2606_v31 }
 0x2f1   :  { %v5331_v1 = vpop.permute.xlu0 %2707 }
 0x2f2   :  { %v5329_v63 = vpop.permute.xlu1 %2640 }
 0x2f3   :  { %v2645_v41 = vsel %vm2644_vm4, %v5317_v56, %v5329_v63  ;;  %v2646_v5 = vsel %vm2644_vm4, %v5329_v63, %v5319_v11 }
 0x2f4   :  { %v2651_v7 = vadd.f32 %v2645_v41, %v2627_v21  ;;  %v2652_v27 = vadd.f32 %v2646_v5, %v2628_v9 }
 0x2f5   :  { %v5335_v60 = vpop.permute.xlu0 %2728 }
 0x2f6   :  { %v2661_v26 = vpop.permute.xlu1 %2660 }
 0x2f7   :  { %v2666_v25 = vsel %vm2644_vm4, %v2661_v26, %v5321_v12  ;;  %v2671_v3 = vadd.f32 %v2661_v26, %v2650_v15 }
 0x2f8   :  { %v2672_v29 = vadd.f32 %v2666_v25, %v2651_v7 }
 0x2f9   :  { %v5342_v22 = vpop.permute.xlu0 %2732  ;;  %v2695_v56 = vadd.f32 %v5323_v17, %v2671_v3 }
 0x2fa   :  { %v5333_v58 = vpop.permute.xlu1 %2664 }
 0x2fb   :  { %v2667_v46 = vsel %vm2644_vm4, %v5321_v12, %v5333_v58 }
 0x2fc   :  { %v2673_v54 = vadd.f32 %v2667_v46, %v2652_v27 }
 0x2fd   :  { %v2753_v20 = vpop.permute.xlu0 %2752 }
 0x2fe   :  { %v2686_v38 = vpop.permute.xlu1 %2685 }
 0x2ff   :  { %v2690_v53 = vsel %vm2689_vm5, %v5323_v17, %v2686_v38  ;;  %v2691_v26 = vsel %vm2689_vm5, %v2686_v38, %v5327_v28 }
 0x300   :  { %v2696_v16 = vadd.f32 %v2690_v53, %v2672_v29  ;;  %v2697_v61 = vadd.f32 %v2691_v26, %v2673_v54 }
 0x301   :  { %v2774_v55 = vpop.permute.xlu0 %2773 }
 0x302   :  { %v2706_v34 = vpop.permute.xlu1 %2705 }
 0x303   :  { %v2711_v36 = vsel %vm2689_vm5, %v2706_v34, %v5331_v1  ;;  %v2716_v45 = vadd.f32 %v2706_v34, %v2695_v56 }
 0x304   :  { %v2717_v17 = vadd.f32 %v2711_v36, %v2696_v16 }
 0x305   :  { %v2778_v63 = vpop.permute.xlu0 %2777  ;;  %v2740_v35 = vadd.f32 %v5335_v60, %v2716_v45 }
 0x306   :  { %v2710_v14 = vpop.permute.xlu1 %2709 }
 0x307   :  { %v2712_v12 = vsel %vm2689_vm5, %v5331_v1, %v2710_v14 }
 0x308   :  { %v2718_v62 = vadd.f32 %v2712_v12, %v2697_v61 }
 0x309   :  { %v2798_v44 = vpop.permute.xlu0 %2797 }
 0x30a   :  { %v2731_v47 = vpop.permute.xlu1 %2730 }
 0x30b   :  { %v2735_v13 = vsel %vm2734_vm6, %v5335_v60, %v2731_v47  ;;  %v2736_v28 = vsel %vm2734_vm6, %v2731_v47, %v5342_v22 }
 0x30c   :  { %v2741_v59 = vadd.f32 %v2735_v13, %v2717_v17  ;;  %v2742_v49 = vadd.f32 %v2736_v28, %v2718_v62 }
 0x30e   :  { %v2751_v51 = vpop.permute.xlu1 %2750 }
 0x30f   :  { %v2756_v58 = vsel %vm2734_vm6, %v2751_v51, %v2753_v20  ;;  %v2761_v38 = vadd.f32 %v2751_v51, %v2740_v35 }
 0x310   :  { %v2762_v10 = vadd.f32 %v2756_v58, %v2741_v59 }
 0x311   :  { %v2785_v2 = vadd.f32 %v2774_v55, %v2761_v38 }
 0x312   :  { %v2755_v11 = vpop.permute.xlu1 %2754 }
 0x313   :  { %v2757_v60 = vsel %vm2734_vm6, %v2753_v20, %v2755_v11 }
 0x314   :  { %v2763_v40 = vadd.f32 %v2757_v60, %v2742_v49 }
 0x316   :  { %v2776_v0 = vpop.permute.xlu1 %2775 }
 0x317   :  { %v2780_v32 = vsel %vm2779_vm7, %v2774_v55, %v2776_v0  ;;  %v2781_v4 = vsel %vm2779_vm7, %v2776_v0, %v2778_v63 }
 0x318   :  { %v2786_v34 = vadd.f32 %v2780_v32, %v2762_v10  ;;  %v2787_v23 = vadd.f32 %v2781_v4, %v2763_v40 }
 0x31a   :  { %v2796_v1 = vpop.permute.xlu1 %2795 }
 0x31b   :  { %v2801_v18 = vsel %vm2779_vm7, %v2796_v1, %v2798_v44  ;;  %v2806_v30 = vadd.f32 %v2796_v1, %v2785_v2 }
 0x31c   :  { %v2807_v52 = vadd.f32 %v2801_v18, %v2786_v34 }
 0x31d   :  { %v2957_v22 = vmul.f32 -1.442695, %v2806_v30 }
 0x31e   :  { %v2958_v50 = vmul.f32 -1.442695, %v2807_v52  ;;  %v2800_v43 = vpop.permute.xlu1 %2799 }
 0x31f   :  { %3023 = vpow2.f32 %v2957_v22  ;;  %v2802_v57 = vsel %vm2779_vm7, %v2798_v44, %v2800_v43 }
 0x320   :  { %3025 = vpow2.f32 %v2958_v50  ;;  %v2808_v14 = vadd.f32 %v2802_v57, %v2787_v23 }
 0x322   :  { %v2959_v20 = vmul.f32 -1.442695, %v2808_v14 }
 0x324   :  { %3027 = vpow2.f32 %v2959_v20 }
 0x329   :  { %v3024_v8 = vpop.eup %3023 }
 0x32a   :  { %v3026_v42 = vpop.eup %3025  ;;  %v2818_v48 = vadd.f32 1.0, %v3024_v8 }
 0x32b   :  { %v2819_v24 = vadd.f32 1.0, %v3026_v42 }
 0x32c   :  { %3029 = vrcp.f32 %v2818_v48 }
 0x32d   :  { %3031 = vrcp.f32 %v2819_v24 }
 0x32e   :  { %v3028_v33 = vpop.eup %3027 }
 0x32f   :  { %v2820_v19 = vadd.f32 1.0, %v3028_v33 }
 0x331   :  { %3033 = vrcp.f32 %v2820_v19 }
 0x336   :  { %v3030_v39 = vpop.eup %3029 }
 0x337   :  { %v3032_v31 = vpop.eup %3031  ;;  %2830 = vrot.lane.b32.xlu0 %v3030_v39, %s3172_s1 }
 0x338   :  { %2832 = vrot.lane.b32.xlu1 %v3032_v31, %s3172_s1 }
 0x33b   :  { %v3034_v47 = vpop.eup %3033 }
 0x33c   :  { %2834 = vrot.lane.b32.xlu0 %v3034_v47, %s3172_s1 }
 0x3a9   :  { %v2831_v41 = vpop.permute.xlu0 %2830 }
 0x3aa   :  { %v2833_v37 = vpop.permute.xlu1 %2832 }
 0x3ab   :  { %v2837_v21 = vsel %vm2836_vm8, %v2831_v41, %v2833_v37 }
 0x3ac   :  { %2841 = vst [vmem:[#allocation13] sm:$0xff] %v2837_v21 }
 0x3ae   :  { %v2835_v55 = vpop.permute.xlu0 %2834 }
 0x3af   :  { %v2838_v15 = vsel %vm2836_vm8, %v2833_v37, %v2835_v55 }
 0x3b0   :  { %2842 = vst [vmem:[#allocation13 + $0x8] sm:$0xff] %v2838_v15 }
 0x3b1   :  { %3100 = shalt.err (!%p3097_p9)
}
 0x3b2   :  { %s3101_s21 = scalar_lea.hbm %s5406_s3, 256 }
 0x3b3   :  { %p3102_p10 = scmp.ne.s32.totalorder %s5406_s3, %s3101_s21  ;;  %p3105_p11 = scmp.lt.u32.totalorder %s3101_s21, %s5406_s3 }
 0x3b5   :  { %p3107_p12 = pnand %p3105_p11, %p3102_p10 }
 0x3b7   :  { %3110 = shalt.err (!%p3107_p12)
}
 0x3b8   :  { %2852 = dma.vmem_to_hbm [thread:$0]  %s2850_s17, 256, %s5406_s3, [#allocation8]  }
 0x3b9   :  { %3117 = dma.done.wait [#allocation8], 256  }
 0x3ba   :  { %3118 = vsyncadd [#allocation8], 4294967040 }
 0x3bb   :  { %2856 = vsyncpa [#allocation7], 1 }
 0x3bc   :  { %2857 = vsyncpa [#allocation12], 1 }
 0x3bd   :  { %2858 = vsyncpa [#allocation8], 1 }
 0x3be   :  { %2859 = vsyncpa [#allocation9], 1 }

</bundles_post_ra>
